<compile_context>
chip_gen: v6e
topology: v6e:2x2x1
jax: 0.10.0
libtpu: 0.0.40
codegen_flags: <defaults>
</compile_context>

<pallas_src>
import functools

import jax
import jax.numpy as jnp
from jax.experimental import pallas as pl
from jax.experimental.pallas import tpu as pltpu


def stretchnet_kernel(
    # inputs
    x_ref,        # (T*Bp, 2F) f32 : [:, :F] = profile(t), [:, F:] = profile(T-1-t)
    mask_ref,     # (T*Bp, 1)  f32 : 1 for real batch rows, 0 for padded rows
    wih_ref,      # (2F, 8H)   bf16: block-diag packed input weights (both dirs)
    whh_ref,      # (2H, 8H)   bf16: block-diag packed recurrent weights
    bias_ref,     # (1, 8H)    f32 : packed biases (b_ih + b_hh) for both dirs
    fcw_ref,      # (1, 2H)    f32 : fc weight as a row
    fcb_ref,      # (1, 1)     f32
    g1_ref, be1_ref,   # (1, 2H) BatchNorm1d(256) affine
    g2_ref, be2_ref,   # (1, 1)  BatchNorm1d(1)   affine
    # outputs
    outp_ref,     # (T*Bp, F)  stretched profile
    outn_ref,     # (T*Bp, 1)  N
    # scratch
    xp_ref,       # (T*Bp, 8H) f32 precomputed input projections (both dirs)
    h_ref,        # (T*Bp, 2H) f32 hidden states in [h_fwd | h_rev] layout
    *, seq_len, b_pad, b_real,
):
    T, Bp, B = seq_len, b_pad, b_real
    H = whh_ref.shape[0] // 2
    F = x_ref.shape[1] // 2
    eps = 1e-5

    # Packed gate-column layout (each block is H lanes wide):
    #   [ i_f | i_r | f_f | f_r | g_f | g_r | o_f | o_r ]
    # so the cell math vectorizes over both directions at once (2H lanes).

    # -------- fused input projection for both directions (one MXU matmul)
    x_bf = x_ref[...].astype(jnp.bfloat16)
    xp_ref[...] = (
        jnp.dot(x_bf, wih_ref[...], preferred_element_type=jnp.float32)
        + bias_ref[...]
    )

    whh = whh_ref[...]   # (2H, 8H) bf16, reused every step

    # -------- single fused recurrence: one dot/step produces BOTH directions
    def step(s, carry):
        h_bf, c = carry                                   # (Bp,2H) bf16 / f32
        row_f = pl.multiple_of(s * Bp, Bp)                # time s        (fwd)
        row_r = pl.multiple_of((T - 1 - s) * Bp, Bp)      # time T-1-s    (rev)

        gates = xp_ref[pl.ds(row_f, Bp), :] + jnp.dot(
            h_bf, whh, preferred_element_type=jnp.float32)          # (Bp, 8H)

        i = jax.nn.sigmoid(gates[:, 0:2 * H])
        f = jax.nn.sigmoid(gates[:, 2 * H:4 * H])
        g = jnp.tanh(gates[:, 4 * H:6 * H])
        o = jax.nn.sigmoid(gates[:, 6 * H:8 * H])
        c = f * c + i * g
        h = o * jnp.tanh(c)                               # [h_fwd | h_rev]

        # write directly into the concatenated layout (no concat later)
        h_ref[pl.ds(row_f, Bp), 0:H] = h[:, 0:H]          # forward @ time s
        h_ref[pl.ds(row_r, Bp), H:2 * H] = h[:, H:2 * H]  # reverse @ time T-1-s
        return h.astype(jnp.bfloat16), c

    init = (jnp.zeros((Bp, 2 * H), jnp.bfloat16),
            jnp.zeros((Bp, 2 * H), jnp.float32))
    jax.lax.fori_loop(0, T, step, init, unroll=True if T <= 16 else 4)

    # -------- p = relu(bilstm_out)
    p = jnp.maximum(h_ref[...], 0.0)                      # (T*Bp, 2H)

    # -------- BatchNorm1d(2H): one-pass masked batch statistics (train mode)
    if B < Bp:
        mask = mask_ref[...]                              # (T*Bp, 1)
        pm = p * mask
    else:
        mask = None
        pm = p
    count = float(T * B)
    s1 = jnp.sum(pm, axis=0, keepdims=True)               # (1, 2H)
    s2 = jnp.sum(pm * p, axis=0, keepdims=True)
    mean1 = s1 / count
    var1 = jnp.maximum(s2 / count - mean1 * mean1, 0.0)   # biased variance
    scale1 = g1_ref[...] * jax.lax.rsqrt(var1 + eps)
    shift1 = be1_ref[...] - mean1 * scale1
    p = p * scale1 + shift1

    # -------- fc(2H -> 1) as a VPU multiply + lane reduction (MXU N=1 is waste)
    q = jnp.sum(p * fcw_ref[...], axis=1, keepdims=True) + fcb_ref[...]  # (T*Bp,1)

    # -------- BatchNorm1d(1): one-pass masked batch statistics (train mode)
    qm = q * mask if mask is not None else q
    t1 = jnp.sum(qm, axis=0, keepdims=True)
    t2 = jnp.sum(qm * q, axis=0, keepdims=True)
    mean2 = t1 / count
    var2 = jnp.maximum(t2 / count - mean2 * mean2, 0.0)
    scale2 = g2_ref[...] * jax.lax.rsqrt(var2 + eps)
    shift2 = be2_ref[...] - mean2 * scale2
    q = q * scale2 + shift2

    # -------- N = sigmoid(q); stretched profile = (1 - profile**N) / N
    n = jax.nn.sigmoid(q)                                 # (T*Bp, 1), always > 0
    outn_ref[...] = n
    x_prof = x_ref[:, 0:F]                                # original profile, f32
    # profile**N = exp(N*log(profile)); profile==0 -> 0 (valid for N>0)
    outp_ref[...] = (1.0 - jnp.exp(n * jnp.log(x_prof))) / n


def _pack_bilstm(wih_f, whh_f, b_f, wih_r, whh_r, b_r):
    """Pack per-direction LSTM weights into fused block-diagonal matrices.

    Output gate-column layout: [i_f|i_r|f_f|f_r|g_f|g_r|o_f|o_r] (H each).
    """
    F = wih_f.shape[0]
    H = whh_f.shape[0]
    zF = jnp.zeros((F, H), jnp.float32)
    zH = jnp.zeros((H, H), jnp.float32)

    def gate(w, g):
        return w[:, g * H:(g + 1) * H]

    wih_cols, whh_cols, b_cols = [], [], []
    for g in range(4):                                    # PyTorch order i,f,g,o
        wih_cols += [jnp.concatenate([gate(wih_f, g), zF], axis=0),
                     jnp.concatenate([zF, gate(wih_r, g)], axis=0)]
        whh_cols += [jnp.concatenate([gate(whh_f, g), zH], axis=0),
                     jnp.concatenate([zH, gate(whh_r, g)], axis=0)]
        b_cols += [gate(b_f, g), gate(b_r, g)]
    w_ih = jnp.concatenate(wih_cols, axis=1)              # (2F, 8H)
    w_hh = jnp.concatenate(whh_cols, axis=1)              # (2H, 8H)
    bias = jnp.concatenate(b_cols, axis=1)                # (1, 8H)
    return w_ih, w_hh, bias


def stretchnet_forward(profile, params):
    """profile: (B, T, 20) float32 -> (stretched_profile (B,T,20), N (B,T,1))."""
    profile = profile.astype(jnp.float32)
    B, T, F = profile.shape
    H = params["whh_f"].shape[0]
    Bp = ((B + 7) // 8) * 8                               # pad batch to sublanes

    # ---- wrapper-side glue (layout only): time-major, batch padding, and the
    #      [x(t) | x(T-1-t)] concatenation that lets one row block of the
    #      x-projection feed both directions at the same loop step.
    x = jnp.transpose(profile, (1, 0, 2))                 # (T, B, F)
    if Bp != B:
        x = jnp.concatenate(
            [x, jnp.ones((T, Bp - B, F), jnp.float32)], axis=1)   # safe padding
        bmask = jnp.concatenate(
            [jnp.ones((T, B, 1), jnp.float32),
             jnp.zeros((T, Bp - B, 1), jnp.float32)], axis=1)
    else:
        bmask = jnp.ones((T, Bp, 1), jnp.float32)
    x_cat = jnp.concatenate([x, jnp.flip(x, axis=0)], axis=2)     # (T, Bp, 2F)
    x_cat = x_cat.reshape(T * Bp, 2 * F)
    bmask = bmask.reshape(T * Bp, 1)

    # ---- pack weights once; bf16 MXU operands, f32 accumulation in-kernel
    w_ih, w_hh, bias = _pack_bilstm(
        params["wih_f"], params["whh_f"], params["b_f"],
        params["wih_r"], params["whh_r"], params["b_r"])
    w_ih = w_ih.astype(jnp.bfloat16)
    w_hh = w_hh.astype(jnp.bfloat16)
    fcw_row = jnp.transpose(params["fc_w"])               # (1, 2H)

    # ---- explicit VMEM budget (scratch + operands), per-generation safe cap
    tokens = T * Bp
    f32b = 4
    vmem_need = (
        tokens * 2 * F * f32b                 # x_cat
        + tokens * (F + 2) * f32b             # outputs + mask
        + tokens * 8 * H * f32b               # xp scratch
        + tokens * 2 * H * f32b               # h scratch
        + (2 * F + 2 * H) * 8 * H * 2         # bf16 packed weights
        + 32 * H * f32b + 4096                # biases / bn params / misc
    )
    vmem_limit = int(min(max(2 * vmem_need, 16 * 1024 * 1024), 64 * 1024 * 1024))

    vmem = pl.BlockSpec(memory_space=pltpu.MemorySpace.VMEM)
    kernel = pl.pallas_call(
        functools.partial(stretchnet_kernel, seq_len=T, b_pad=Bp, b_real=B),
        out_shape=(
            jax.ShapeDtypeStruct((T * Bp, F), jnp.float32),
            jax.ShapeDtypeStruct((T * Bp, 1), jnp.float32),
        ),
        in_specs=[vmem] * 11,
        out_specs=(vmem, vmem),
        scratch_shapes=[
            pltpu.VMEM((T * Bp, 8 * H), jnp.float32),     # xp (both directions)
            pltpu.VMEM((T * Bp, 2 * H), jnp.float32),     # [h_fwd | h_rev]
        ],
        compiler_params=pltpu.CompilerParams(vmem_limit_bytes=vmem_limit),
    )
    out_p, out_n = kernel(
        x_cat, bmask, w_ih, w_hh, bias,
        fcw_row, params["fc_b"],
        params["g1"], params["be1"], params["g2"], params["be2"],
    )
    # back to batch-first, dropping the padded batch rows
    out_p = out_p.reshape(T, Bp, F)[:, :B, :].transpose(1, 0, 2)
    out_n = out_n.reshape(T, Bp, 1)[:, :B, :].transpose(1, 0, 2)
    return out_p, out_n


def make_params(key, feat=20, hidden=128):
    """Deterministic synthetic parameters with PyTorch-LSTM-style init scale."""
    keys = jax.random.split(key, 8)
    k = 1.0 / jnp.sqrt(jnp.float32(hidden))

    def u(kk, shape):
        return jax.random.uniform(kk, shape, jnp.float32, -k, k)

    return {
        # forward-direction LSTM (weights stored transposed: in_features x 4H);
        # b_ih + b_hh folded into a single bias.  Gate order i, f, g, o.
        "wih_f": u(keys[0], (feat, 4 * hidden)),
        "whh_f": u(keys[1], (hidden, 4 * hidden)),
        "b_f":   u(keys[2], (1, 4 * hidden)),
        # reverse-direction LSTM
        "wih_r": u(keys[3], (feat, 4 * hidden)),
        "whh_r": u(keys[4], (hidden, 4 * hidden)),
        "b_r":   u(keys[5], (1, 4 * hidden)),
        # fc: Linear(256 -> 1)
        "fc_w":  u(keys[6], (2 * hidden, 1)),
        "fc_b":  u(keys[7], (1, 1)),
        # BatchNorm affine params (PyTorch default init: weight=1, bias=0)
        "g1":  jnp.ones((1, 2 * hidden), jnp.float32),
        "be1": jnp.zeros((1, 2 * hidden), jnp.float32),
        "g2":  jnp.ones((1, 1), jnp.float32),
        "be2": jnp.zeros((1, 1), jnp.float32),
    }


if __name__ == "__main__":
    key = jax.random.PRNGKey(0)
    kp, kx = jax.random.split(key)

    B, T, F = 2, 8, 20           # batch=2, seq=8, profile features=20 (LSTM input)
    params = make_params(kp, feat=F, hidden=128)

    # strictly positive profile values (PSSM-style); zeros are also handled
    profile = jax.random.uniform(kx, (B, T, F), jnp.float32, 0.05, 1.0)

    out_profile, out_N = stretchnet_forward(profile, params)
    jax.block_until_ready((out_profile, out_N))

    assert out_profile.shape == (B, T, F)
    assert out_N.shape == (B, T, 1)
    print("KERNEL_OK")
</pallas_src>

<mosaic_0001>
module attributes {stable_mosaic.version = 11 : i64} {
  func.func @stretchnet_kernel(%arg0: memref<64x40xf32, #tpu.memory_space<vmem>>, %arg1: memref<64x1xf32, #tpu.memory_space<vmem>>, %arg2: memref<40x1024xbf16, #tpu.memory_space<vmem>>, %arg3: memref<256x1024xbf16, #tpu.memory_space<vmem>>, %arg4: memref<1x1024xf32, #tpu.memory_space<vmem>>, %arg5: memref<1x256xf32, #tpu.memory_space<vmem>>, %arg6: memref<1x1xf32, #tpu.memory_space<vmem>>, %arg7: memref<1x256xf32, #tpu.memory_space<vmem>>, %arg8: memref<1x256xf32, #tpu.memory_space<vmem>>, %arg9: memref<1x1xf32, #tpu.memory_space<vmem>>, %arg10: memref<1x1xf32, #tpu.memory_space<vmem>>, %arg11: memref<64x20xf32, #tpu.memory_space<vmem>>, %arg12: memref<64x1xf32, #tpu.memory_space<vmem>>, %arg13: memref<64x1024xf32, #tpu.memory_space<vmem>>, %arg14: memref<64x256xf32, #tpu.memory_space<vmem>>) attributes {dimension_semantics = [], scalar_prefetch = 0 : i64, scratch_operands = 2 : i64, tpu.core_type = #tpu.core_type<tc>} {
    %c0 = arith.constant 0 : index
    %c0_0 = arith.constant 0 : index
    %0 = vector.load %arg0[%c0, %c0_0] : memref<64x40xf32, #tpu.memory_space<vmem>>, vector<64x40xf32>
    %1 = arith.truncf %0 : vector<64x40xf32> to vector<64x40xbf16>
    %c0_1 = arith.constant 0 : index
    %c0_2 = arith.constant 0 : index
    %2 = vector.load %arg2[%c0_1, %c0_2] : memref<40x1024xbf16, #tpu.memory_space<vmem>>, vector<40x1024xbf16>
    %cst = arith.constant dense<0.000000e+00> : vector<64x1024xf32>
    %3 = tpu.matmul %1, %2, %cst {dimension_numbers = #tpu.dot_dimension_numbers<[1], [0], [0], [1], [0, 0, 1, 1], [], []>} : vector<64x40xbf16>, vector<40x1024xbf16>, vector<64x1024xf32> -> vector<64x1024xf32>
    %c0_3 = arith.constant 0 : index
    %c0_4 = arith.constant 0 : index
    %4 = vector.load %arg4[%c0_3, %c0_4] : memref<1x1024xf32, #tpu.memory_space<vmem>>, vector<1x1024xf32>
    %5 = vector.broadcast %4 : vector<1x1024xf32> to vector<64x1024xf32>
    %6 = arith.addf %3, %5 : vector<64x1024xf32>
    %c0_5 = arith.constant 0 : index
    %c0_6 = arith.constant 0 : index
    %7 = vector.load %arg13[%c0_5, %c0_6] : memref<64x1024xf32, #tpu.memory_space<vmem>>, vector<64x1024xf32>
    tpu.vector_store %arg13[%c0_5, %c0_6], %6 {strides = array<i32>} : memref<64x1024xf32, #tpu.memory_space<vmem>>, vector<64x1024xf32>,
    %c0_7 = arith.constant 0 : index
    %c0_8 = arith.constant 0 : index
    %8 = vector.load %arg3[%c0_7, %c0_8] : memref<256x1024xbf16, #tpu.memory_space<vmem>>, vector<256x1024xbf16>
    %cst_9 = arith.constant 0.000000e+00 : bf16
    %9 = vector.broadcast %cst_9 : bf16 to vector<8x256xbf16>
    %cst_10 = arith.constant 0.000000e+00 : f32
    %10 = vector.broadcast %cst_10 : f32 to vector<8x256xf32>
    %c0_i32 = arith.constant 0 : i32
    %c8_i32 = arith.constant 8 : i32
    %11 = arith.muli %c0_i32, %c8_i32 : i32
    %12 = tpu.assume_multiple %11, 8 : i32
    %c7_i32 = arith.constant 7 : i32
    %13 = arith.subi %c7_i32, %c0_i32 : i32
    %c8_i32_11 = arith.constant 8 : i32
    %14 = arith.muli %13, %c8_i32_11 : i32
    %15 = tpu.assume_multiple %14, 8 : i32
    %16 = arith.index_cast %12 : i32 to index
    %c0_12 = arith.constant 0 : index
    %17 = vector.load %arg13[%16, %c0_12] : memref<64x1024xf32, #tpu.memory_space<vmem>>, vector<8x1024xf32>
    %cst_13 = arith.constant dense<0.000000e+00> : vector<8x1024xf32>
    %18 = tpu.matmul %9, %8, %cst_13 {dimension_numbers = #tpu.dot_dimension_numbers<[1], [0], [0], [1], [0, 0, 1, 1], [], []>} : vector<8x256xbf16>, vector<256x1024xbf16>, vector<8x1024xf32> -> vector<8x1024xf32>
    %19 = arith.addf %17, %18 : vector<8x1024xf32>
    %20 = vector.extract_strided_slice %19 {offsets = [0, 0], sizes = [8, 256], strides = [1, 1]} : vector<8x1024xf32> to vector<8x256xf32>
    %21 = arith.negf %20 : vector<8x256xf32>
    %22 = math.exp %21 : vector<8x256xf32>
    %cst_14 = arith.constant 1.000000e+00 : f32
    %23 = vector.broadcast %cst_14 : f32 to vector<8x256xf32>
    %24 = arith.addf %23, %22 : vector<8x256xf32>
    %25 = arith.divf %23, %24 : vector<8x256xf32>
    %26 = vector.extract_strided_slice %19 {offsets = [0, 256], sizes = [8, 256], strides = [1, 1]} : vector<8x1024xf32> to vector<8x256xf32>
    %27 = arith.negf %26 : vector<8x256xf32>
    %28 = math.exp %27 : vector<8x256xf32>
    %cst_15 = arith.constant 1.000000e+00 : f32
    %29 = vector.broadcast %cst_15 : f32 to vector<8x256xf32>
    %30 = arith.addf %29, %28 : vector<8x256xf32>
    %31 = arith.divf %29, %30 : vector<8x256xf32>
    %32 = vector.extract_strided_slice %19 {offsets = [0, 512], sizes = [8, 256], strides = [1, 1]} : vector<8x1024xf32> to vector<8x256xf32>
    %33 = math.tanh %32 : vector<8x256xf32>
    %34 = vector.extract_strided_slice %19 {offsets = [0, 768], sizes = [8, 256], strides = [1, 1]} : vector<8x1024xf32> to vector<8x256xf32>
    %35 = arith.negf %34 : vector<8x256xf32>
    %36 = math.exp %35 : vector<8x256xf32>
    %cst_16 = arith.constant 1.000000e+00 : f32
    %37 = vector.broadcast %cst_16 : f32 to vector<8x256xf32>
    %38 = arith.addf %37, %36 : vector<8x256xf32>
    %39 = arith.divf %37, %38 : vector<8x256xf32>
    %40 = arith.mulf %31, %10 : vector<8x256xf32>
    %41 = arith.mulf %25, %33 : vector<8x256xf32>
    %42 = arith.addf %40, %41 : vector<8x256xf32>
    %43 = math.tanh %42 : vector<8x256xf32>
    %44 = arith.mulf %39, %43 : vector<8x256xf32>
    %45 = vector.extract_strided_slice %44 {offsets = [0, 0], sizes = [8, 128], strides = [1, 1]} : vector<8x256xf32> to vector<8x128xf32>
    %46 = arith.index_cast %12 : i32 to index
    %c0_17 = arith.constant 0 : index
    %47 = vector.load %arg14[%46, %c0_17] : memref<64x256xf32, #tpu.memory_space<vmem>>, vector<8x128xf32>
    tpu.vector_store %arg14[%46, %c0_17], %45 {strides = array<i32>} : memref<64x256xf32, #tpu.memory_space<vmem>>, vector<8x128xf32>,
    %48 = vector.extract_strided_slice %44 {offsets = [0, 128], sizes = [8, 128], strides = [1, 1]} : vector<8x256xf32> to vector<8x128xf32>
    %49 = arith.index_cast %15 : i32 to index
    %c128 = arith.constant 128 : index
    %50 = vector.load %arg14[%49, %c128] : memref<64x256xf32, #tpu.memory_space<vmem>>, vector<8x128xf32>
    tpu.vector_store %arg14[%49, %c128], %48 {strides = array<i32>} : memref<64x256xf32, #tpu.memory_space<vmem>>, vector<8x128xf32>,
    %51 = arith.truncf %44 : vector<8x256xf32> to vector<8x256xbf16>
    %c1_i32 = arith.constant 1 : i32
    %c8_i32_18 = arith.constant 8 : i32
    %52 = arith.muli %c1_i32, %c8_i32_18 : i32
    %53 = tpu.assume_multiple %52, 8 : i32
    %c7_i32_19 = arith.constant 7 : i32
    %54 = arith.subi %c7_i32_19, %c1_i32 : i32
    %c8_i32_20 = arith.constant 8 : i32
    %55 = arith.muli %54, %c8_i32_20 : i32
    %56 = tpu.assume_multiple %55, 8 : i32
    %57 = arith.index_cast %53 : i32 to index
    %c0_21 = arith.constant 0 : index
    %58 = vector.load %arg13[%57, %c0_21] : memref<64x1024xf32, #tpu.memory_space<vmem>>, vector<8x1024xf32>
    %cst_22 = arith.constant dense<0.000000e+00> : vector<8x1024xf32>
    %59 = tpu.matmul %51, %8, %cst_22 {dimension_numbers = #tpu.dot_dimension_numbers<[1], [0], [0], [1], [0, 0, 1, 1], [], []>} : vector<8x256xbf16>, vector<256x1024xbf16>, vector<8x1024xf32> -> vector<8x1024xf32>
    %60 = arith.addf %58, %59 : vector<8x1024xf32>
    %61 = vector.extract_strided_slice %60 {offsets = [0, 0], sizes = [8, 256], strides = [1, 1]} : vector<8x1024xf32> to vector<8x256xf32>
    %62 = arith.negf %61 : vector<8x256xf32>
    %63 = math.exp %62 : vector<8x256xf32>
    %cst_23 = arith.constant 1.000000e+00 : f32
    %64 = vector.broadcast %cst_23 : f32 to vector<8x256xf32>
    %65 = arith.addf %64, %63 : vector<8x256xf32>
    %66 = arith.divf %64, %65 : vector<8x256xf32>
    %67 = vector.extract_strided_slice %60 {offsets = [0, 256], sizes = [8, 256], strides = [1, 1]} : vector<8x1024xf32> to vector<8x256xf32>
    %68 = arith.negf %67 : vector<8x256xf32>
    %69 = math.exp %68 : vector<8x256xf32>
    %cst_24 = arith.constant 1.000000e+00 : f32
    %70 = vector.broadcast %cst_24 : f32 to vector<8x256xf32>
    %71 = arith.addf %70, %69 : vector<8x256xf32>
    %72 = arith.divf %70, %71 : vector<8x256xf32>
    %73 = vector.extract_strided_slice %60 {offsets = [0, 512], sizes = [8, 256], strides = [1, 1]} : vector<8x1024xf32> to vector<8x256xf32>
    %74 = math.tanh %73 : vector<8x256xf32>
    %75 = vector.extract_strided_slice %60 {offsets = [0, 768], sizes = [8, 256], strides = [1, 1]} : vector<8x1024xf32> to vector<8x256xf32>
    %76 = arith.negf %75 : vector<8x256xf32>
    %77 = math.exp %76 : vector<8x256xf32>
    %cst_25 = arith.constant 1.000000e+00 : f32
    %78 = vector.broadcast %cst_25 : f32 to vector<8x256xf32>
    %79 = arith.addf %78, %77 : vector<8x256xf32>
    %80 = arith.divf %78, %79 : vector<8x256xf32>
    %81 = arith.mulf %72, %42 : vector<8x256xf32>
    %82 = arith.mulf %66, %74 : vector<8x256xf32>
    %83 = arith.addf %81, %82 : vector<8x256xf32>
    %84 = math.tanh %83 : vector<8x256xf32>
    %85 = arith.mulf %80, %84 : vector<8x256xf32>
    %86 = vector.extract_strided_slice %85 {offsets = [0, 0], sizes = [8, 128], strides = [1, 1]} : vector<8x256xf32> to vector<8x128xf32>
    %87 = arith.index_cast %53 : i32 to index
    %c0_26 = arith.constant 0 : index
    %88 = vector.load %arg14[%87, %c0_26] : memref<64x256xf32, #tpu.memory_space<vmem>>, vector<8x128xf32>
    tpu.vector_store %arg14[%87, %c0_26], %86 {strides = array<i32>} : memref<64x256xf32, #tpu.memory_space<vmem>>, vector<8x128xf32>,
    %89 = vector.extract_strided_slice %85 {offsets = [0, 128], sizes = [8, 128], strides = [1, 1]} : vector<8x256xf32> to vector<8x128xf32>
    %90 = arith.index_cast %56 : i32 to index
    %c128_27 = arith.constant 128 : index
    %91 = vector.load %arg14[%90, %c128_27] : memref<64x256xf32, #tpu.memory_space<vmem>>, vector<8x128xf32>
    tpu.vector_store %arg14[%90, %c128_27], %89 {strides = array<i32>} : memref<64x256xf32, #tpu.memory_space<vmem>>, vector<8x128xf32>,
    %92 = arith.truncf %85 : vector<8x256xf32> to vector<8x256xbf16>
    %c2_i32 = arith.constant 2 : i32
    %c8_i32_28 = arith.constant 8 : i32
    %93 = arith.muli %c2_i32, %c8_i32_28 : i32
    %94 = tpu.assume_multiple %93, 8 : i32
    %c7_i32_29 = arith.constant 7 : i32
    %95 = arith.subi %c7_i32_29, %c2_i32 : i32
    %c8_i32_30 = arith.constant 8 : i32
    %96 = arith.muli %95, %c8_i32_30 : i32
    %97 = tpu.assume_multiple %96, 8 : i32
    %98 = arith.index_cast %94 : i32 to index
    %c0_31 = arith.constant 0 : index
    %99 = vector.load %arg13[%98, %c0_31] : memref<64x1024xf32, #tpu.memory_space<vmem>>, vector<8x1024xf32>
    %cst_32 = arith.constant dense<0.000000e+00> : vector<8x1024xf32>
    %100 = tpu.matmul %92, %8, %cst_32 {dimension_numbers = #tpu.dot_dimension_numbers<[1], [0], [0], [1], [0, 0, 1, 1], [], []>} : vector<8x256xbf16>, vector<256x1024xbf16>, vector<8x1024xf32> -> vector<8x1024xf32>
    %101 = arith.addf %99, %100 : vector<8x1024xf32>
    %102 = vector.extract_strided_slice %101 {offsets = [0, 0], sizes = [8, 256], strides = [1, 1]} : vector<8x1024xf32> to vector<8x256xf32>
    %103 = arith.negf %102 : vector<8x256xf32>
    %104 = math.exp %103 : vector<8x256xf32>
    %cst_33 = arith.constant 1.000000e+00 : f32
    %105 = vector.broadcast %cst_33 : f32 to vector<8x256xf32>
    %106 = arith.addf %105, %104 : vector<8x256xf32>
    %107 = arith.divf %105, %106 : vector<8x256xf32>
    %108 = vector.extract_strided_slice %101 {offsets = [0, 256], sizes = [8, 256], strides = [1, 1]} : vector<8x1024xf32> to vector<8x256xf32>
    %109 = arith.negf %108 : vector<8x256xf32>
    %110 = math.exp %109 : vector<8x256xf32>
    %cst_34 = arith.constant 1.000000e+00 : f32
    %111 = vector.broadcast %cst_34 : f32 to vector<8x256xf32>
    %112 = arith.addf %111, %110 : vector<8x256xf32>
    %113 = arith.divf %111, %112 : vector<8x256xf32>
    %114 = vector.extract_strided_slice %101 {offsets = [0, 512], sizes = [8, 256], strides = [1, 1]} : vector<8x1024xf32> to vector<8x256xf32>
    %115 = math.tanh %114 : vector<8x256xf32>
    %116 = vector.extract_strided_slice %101 {offsets = [0, 768], sizes = [8, 256], strides = [1, 1]} : vector<8x1024xf32> to vector<8x256xf32>
    %117 = arith.negf %116 : vector<8x256xf32>
    %118 = math.exp %117 : vector<8x256xf32>
    %cst_35 = arith.constant 1.000000e+00 : f32
    %119 = vector.broadcast %cst_35 : f32 to vector<8x256xf32>
    %120 = arith.addf %119, %118 : vector<8x256xf32>
    %121 = arith.divf %119, %120 : vector<8x256xf32>
    %122 = arith.mulf %113, %83 : vector<8x256xf32>
    %123 = arith.mulf %107, %115 : vector<8x256xf32>
    %124 = arith.addf %122, %123 : vector<8x256xf32>
    %125 = math.tanh %124 : vector<8x256xf32>
    %126 = arith.mulf %121, %125 : vector<8x256xf32>
    %127 = vector.extract_strided_slice %126 {offsets = [0, 0], sizes = [8, 128], strides = [1, 1]} : vector<8x256xf32> to vector<8x128xf32>
    %128 = arith.index_cast %94 : i32 to index
    %c0_36 = arith.constant 0 : index
    %129 = vector.load %arg14[%128, %c0_36] : memref<64x256xf32, #tpu.memory_space<vmem>>, vector<8x128xf32>
    tpu.vector_store %arg14[%128, %c0_36], %127 {strides = array<i32>} : memref<64x256xf32, #tpu.memory_space<vmem>>, vector<8x128xf32>,
    %130 = vector.extract_strided_slice %126 {offsets = [0, 128], sizes = [8, 128], strides = [1, 1]} : vector<8x256xf32> to vector<8x128xf32>
    %131 = arith.index_cast %97 : i32 to index
    %c128_37 = arith.constant 128 : index
    %132 = vector.load %arg14[%131, %c128_37] : memref<64x256xf32, #tpu.memory_space<vmem>>, vector<8x128xf32>
    tpu.vector_store %arg14[%131, %c128_37], %130 {strides = array<i32>} : memref<64x256xf32, #tpu.memory_space<vmem>>, vector<8x128xf32>,
    %133 = arith.truncf %126 : vector<8x256xf32> to vector<8x256xbf16>
    %c3_i32 = arith.constant 3 : i32
    %c8_i32_38 = arith.constant 8 : i32
    %134 = arith.muli %c3_i32, %c8_i32_38 : i32
    %135 = tpu.assume_multiple %134, 8 : i32
    %c7_i32_39 = arith.constant 7 : i32
    %136 = arith.subi %c7_i32_39, %c3_i32 : i32
    %c8_i32_40 = arith.constant 8 : i32
    %137 = arith.muli %136, %c8_i32_40 : i32
    %138 = tpu.assume_multiple %137, 8 : i32
    %139 = arith.index_cast %135 : i32 to index
    %c0_41 = arith.constant 0 : index
    %140 = vector.load %arg13[%139, %c0_41] : memref<64x1024xf32, #tpu.memory_space<vmem>>, vector<8x1024xf32>
    %cst_42 = arith.constant dense<0.000000e+00> : vector<8x1024xf32>
    %141 = tpu.matmul %133, %8, %cst_42 {dimension_numbers = #tpu.dot_dimension_numbers<[1], [0], [0], [1], [0, 0, 1, 1], [], []>} : vector<8x256xbf16>, vector<256x1024xbf16>, vector<8x1024xf32> -> vector<8x1024xf32>
    %142 = arith.addf %140, %141 : vector<8x1024xf32>
    %143 = vector.extract_strided_slice %142 {offsets = [0, 0], sizes = [8, 256], strides = [1, 1]} : vector<8x1024xf32> to vector<8x256xf32>
    %144 = arith.negf %143 : vector<8x256xf32>
    %145 = math.exp %144 : vector<8x256xf32>
    %cst_43 = arith.constant 1.000000e+00 : f32
    %146 = vector.broadcast %cst_43 : f32 to vector<8x256xf32>
    %147 = arith.addf %146, %145 : vector<8x256xf32>
    %148 = arith.divf %146, %147 : vector<8x256xf32>
    %149 = vector.extract_strided_slice %142 {offsets = [0, 256], sizes = [8, 256], strides = [1, 1]} : vector<8x1024xf32> to vector<8x256xf32>
    %150 = arith.negf %149 : vector<8x256xf32>
    %151 = math.exp %150 : vector<8x256xf32>
    %cst_44 = arith.constant 1.000000e+00 : f32
    %152 = vector.broadcast %cst_44 : f32 to vector<8x256xf32>
    %153 = arith.addf %152, %151 : vector<8x256xf32>
    %154 = arith.divf %152, %153 : vector<8x256xf32>
    %155 = vector.extract_strided_slice %142 {offsets = [0, 512], sizes = [8, 256], strides = [1, 1]} : vector<8x1024xf32> to vector<8x256xf32>
    %156 = math.tanh %155 : vector<8x256xf32>
    %157 = vector.extract_strided_slice %142 {offsets = [0, 768], sizes = [8, 256], strides = [1, 1]} : vector<8x1024xf32> to vector<8x256xf32>
    %158 = arith.negf %157 : vector<8x256xf32>
    %159 = math.exp %158 : vector<8x256xf32>
    %cst_45 = arith.constant 1.000000e+00 : f32
    %160 = vector.broadcast %cst_45 : f32 to vector<8x256xf32>
    %161 = arith.addf %160, %159 : vector<8x256xf32>
    %162 = arith.divf %160, %161 : vector<8x256xf32>
    %163 = arith.mulf %154, %124 : vector<8x256xf32>
    %164 = arith.mulf %148, %156 : vector<8x256xf32>
    %165 = arith.addf %163, %164 : vector<8x256xf32>
    %166 = math.tanh %165 : vector<8x256xf32>
    %167 = arith.mulf %162, %166 : vector<8x256xf32>
    %168 = vector.extract_strided_slice %167 {offsets = [0, 0], sizes = [8, 128], strides = [1, 1]} : vector<8x256xf32> to vector<8x128xf32>
    %169 = arith.index_cast %135 : i32 to index
    %c0_46 = arith.constant 0 : index
    %170 = vector.load %arg14[%169, %c0_46] : memref<64x256xf32, #tpu.memory_space<vmem>>, vector<8x128xf32>
    tpu.vector_store %arg14[%169, %c0_46], %168 {strides = array<i32>} : memref<64x256xf32, #tpu.memory_space<vmem>>, vector<8x128xf32>,
    %171 = vector.extract_strided_slice %167 {offsets = [0, 128], sizes = [8, 128], strides = [1, 1]} : vector<8x256xf32> to vector<8x128xf32>
    %172 = arith.index_cast %138 : i32 to index
    %c128_47 = arith.constant 128 : index
    %173 = vector.load %arg14[%172, %c128_47] : memref<64x256xf32, #tpu.memory_space<vmem>>, vector<8x128xf32>
    tpu.vector_store %arg14[%172, %c128_47], %171 {strides = array<i32>} : memref<64x256xf32, #tpu.memory_space<vmem>>, vector<8x128xf32>,
    %174 = arith.truncf %167 : vector<8x256xf32> to vector<8x256xbf16>
    %c4_i32 = arith.constant 4 : i32
    %c8_i32_48 = arith.constant 8 : i32
    %175 = arith.muli %c4_i32, %c8_i32_48 : i32
    %176 = tpu.assume_multiple %175, 8 : i32
    %c7_i32_49 = arith.constant 7 : i32
    %177 = arith.subi %c7_i32_49, %c4_i32 : i32
    %c8_i32_50 = arith.constant 8 : i32
    %178 = arith.muli %177, %c8_i32_50 : i32
    %179 = tpu.assume_multiple %178, 8 : i32
    %180 = arith.index_cast %176 : i32 to index
    %c0_51 = arith.constant 0 : index
    %181 = vector.load %arg13[%180, %c0_51] : memref<64x1024xf32, #tpu.memory_space<vmem>>, vector<8x1024xf32>
    %cst_52 = arith.constant dense<0.000000e+00> : vector<8x1024xf32>
    %182 = tpu.matmul %174, %8, %cst_52 {dimension_numbers = #tpu.dot_dimension_numbers<[1], [0], [0], [1], [0, 0, 1, 1], [], []>} : vector<8x256xbf16>, vector<256x1024xbf16>, vector<8x1024xf32> -> vector<8x1024xf32>
    %183 = arith.addf %181, %182 : vector<8x1024xf32>
    %184 = vector.extract_strided_slice %183 {offsets = [0, 0], sizes = [8, 256], strides = [1, 1]} : vector<8x1024xf32> to vector<8x256xf32>
    %185 = arith.negf %184 : vector<8x256xf32>
    %186 = math.exp %185 : vector<8x256xf32>
    %cst_53 = arith.constant 1.000000e+00 : f32
    %187 = vector.broadcast %cst_53 : f32 to vector<8x256xf32>
    %188 = arith.addf %187, %186 : vector<8x256xf32>
    %189 = arith.divf %187, %188 : vector<8x256xf32>
    %190 = vector.extract_strided_slice %183 {offsets = [0, 256], sizes = [8, 256], strides = [1, 1]} : vector<8x1024xf32> to vector<8x256xf32>
    %191 = arith.negf %190 : vector<8x256xf32>
    %192 = math.exp %191 : vector<8x256xf32>
    %cst_54 = arith.constant 1.000000e+00 : f32
    %193 = vector.broadcast %cst_54 : f32 to vector<8x256xf32>
    %194 = arith.addf %193, %192 : vector<8x256xf32>
    %195 = arith.divf %193, %194 : vector<8x256xf32>
    %196 = vector.extract_strided_slice %183 {offsets = [0, 512], sizes = [8, 256], strides = [1, 1]} : vector<8x1024xf32> to vector<8x256xf32>
    %197 = math.tanh %196 : vector<8x256xf32>
    %198 = vector.extract_strided_slice %183 {offsets = [0, 768], sizes = [8, 256], strides = [1, 1]} : vector<8x1024xf32> to vector<8x256xf32>
    %199 = arith.negf %198 : vector<8x256xf32>
    %200 = math.exp %199 : vector<8x256xf32>
    %cst_55 = arith.constant 1.000000e+00 : f32
    %201 = vector.broadcast %cst_55 : f32 to vector<8x256xf32>
    %202 = arith.addf %201, %200 : vector<8x256xf32>
    %203 = arith.divf %201, %202 : vector<8x256xf32>
    %204 = arith.mulf %195, %165 : vector<8x256xf32>
    %205 = arith.mulf %189, %197 : vector<8x256xf32>
    %206 = arith.addf %204, %205 : vector<8x256xf32>
    %207 = math.tanh %206 : vector<8x256xf32>
    %208 = arith.mulf %203, %207 : vector<8x256xf32>
    %209 = vector.extract_strided_slice %208 {offsets = [0, 0], sizes = [8, 128], strides = [1, 1]} : vector<8x256xf32> to vector<8x128xf32>
    %210 = arith.index_cast %176 : i32 to index
    %c0_56 = arith.constant 0 : index
    %211 = vector.load %arg14[%210, %c0_56] : memref<64x256xf32, #tpu.memory_space<vmem>>, vector<8x128xf32>
    tpu.vector_store %arg14[%210, %c0_56], %209 {strides = array<i32>} : memref<64x256xf32, #tpu.memory_space<vmem>>, vector<8x128xf32>,
    %212 = vector.extract_strided_slice %208 {offsets = [0, 128], sizes = [8, 128], strides = [1, 1]} : vector<8x256xf32> to vector<8x128xf32>
    %213 = arith.index_cast %179 : i32 to index
    %c128_57 = arith.constant 128 : index
    %214 = vector.load %arg14[%213, %c128_57] : memref<64x256xf32, #tpu.memory_space<vmem>>, vector<8x128xf32>
    tpu.vector_store %arg14[%213, %c128_57], %212 {strides = array<i32>} : memref<64x256xf32, #tpu.memory_space<vmem>>, vector<8x128xf32>,
    %215 = arith.truncf %208 : vector<8x256xf32> to vector<8x256xbf16>
    %c5_i32 = arith.constant 5 : i32
    %c8_i32_58 = arith.constant 8 : i32
    %216 = arith.muli %c5_i32, %c8_i32_58 : i32
    %217 = tpu.assume_multiple %216, 8 : i32
    %c7_i32_59 = arith.constant 7 : i32
    %218 = arith.subi %c7_i32_59, %c5_i32 : i32
    %c8_i32_60 = arith.constant 8 : i32
    %219 = arith.muli %218, %c8_i32_60 : i32
    %220 = tpu.assume_multiple %219, 8 : i32
    %221 = arith.index_cast %217 : i32 to index
    %c0_61 = arith.constant 0 : index
    %222 = vector.load %arg13[%221, %c0_61] : memref<64x1024xf32, #tpu.memory_space<vmem>>, vector<8x1024xf32>
    %cst_62 = arith.constant dense<0.000000e+00> : vector<8x1024xf32>
    %223 = tpu.matmul %215, %8, %cst_62 {dimension_numbers = #tpu.dot_dimension_numbers<[1], [0], [0], [1], [0, 0, 1, 1], [], []>} : vector<8x256xbf16>, vector<256x1024xbf16>, vector<8x1024xf32> -> vector<8x1024xf32>
    %224 = arith.addf %222, %223 : vector<8x1024xf32>
    %225 = vector.extract_strided_slice %224 {offsets = [0, 0], sizes = [8, 256], strides = [1, 1]} : vector<8x1024xf32> to vector<8x256xf32>
    %226 = arith.negf %225 : vector<8x256xf32>
    %227 = math.exp %226 : vector<8x256xf32>
    %cst_63 = arith.constant 1.000000e+00 : f32
    %228 = vector.broadcast %cst_63 : f32 to vector<8x256xf32>
    %229 = arith.addf %228, %227 : vector<8x256xf32>
    %230 = arith.divf %228, %229 : vector<8x256xf32>
    %231 = vector.extract_strided_slice %224 {offsets = [0, 256], sizes = [8, 256], strides = [1, 1]} : vector<8x1024xf32> to vector<8x256xf32>
    %232 = arith.negf %231 : vector<8x256xf32>
    %233 = math.exp %232 : vector<8x256xf32>
    %cst_64 = arith.constant 1.000000e+00 : f32
    %234 = vector.broadcast %cst_64 : f32 to vector<8x256xf32>
    %235 = arith.addf %234, %233 : vector<8x256xf32>
    %236 = arith.divf %234, %235 : vector<8x256xf32>
    %237 = vector.extract_strided_slice %224 {offsets = [0, 512], sizes = [8, 256], strides = [1, 1]} : vector<8x1024xf32> to vector<8x256xf32>
    %238 = math.tanh %237 : vector<8x256xf32>
    %239 = vector.extract_strided_slice %224 {offsets = [0, 768], sizes = [8, 256], strides = [1, 1]} : vector<8x1024xf32> to vector<8x256xf32>
    %240 = arith.negf %239 : vector<8x256xf32>
    %241 = math.exp %240 : vector<8x256xf32>
    %cst_65 = arith.constant 1.000000e+00 : f32
    %242 = vector.broadcast %cst_65 : f32 to vector<8x256xf32>
    %243 = arith.addf %242, %241 : vector<8x256xf32>
    %244 = arith.divf %242, %243 : vector<8x256xf32>
    %245 = arith.mulf %236, %206 : vector<8x256xf32>
    %246 = arith.mulf %230, %238 : vector<8x256xf32>
    %247 = arith.addf %245, %246 : vector<8x256xf32>
    %248 = math.tanh %247 : vector<8x256xf32>
    %249 = arith.mulf %244, %248 : vector<8x256xf32>
    %250 = vector.extract_strided_slice %249 {offsets = [0, 0], sizes = [8, 128], strides = [1, 1]} : vector<8x256xf32> to vector<8x128xf32>
    %251 = arith.index_cast %217 : i32 to index
    %c0_66 = arith.constant 0 : index
    %252 = vector.load %arg14[%251, %c0_66] : memref<64x256xf32, #tpu.memory_space<vmem>>, vector<8x128xf32>
    tpu.vector_store %arg14[%251, %c0_66], %250 {strides = array<i32>} : memref<64x256xf32, #tpu.memory_space<vmem>>, vector<8x128xf32>,
    %253 = vector.extract_strided_slice %249 {offsets = [0, 128], sizes = [8, 128], strides = [1, 1]} : vector<8x256xf32> to vector<8x128xf32>
    %254 = arith.index_cast %220 : i32 to index
    %c128_67 = arith.constant 128 : index
    %255 = vector.load %arg14[%254, %c128_67] : memref<64x256xf32, #tpu.memory_space<vmem>>, vector<8x128xf32>
    tpu.vector_store %arg14[%254, %c128_67], %253 {strides = array<i32>} : memref<64x256xf32, #tpu.memory_space<vmem>>, vector<8x128xf32>,
    %256 = arith.truncf %249 : vector<8x256xf32> to vector<8x256xbf16>
    %c6_i32 = arith.constant 6 : i32
    %c8_i32_68 = arith.constant 8 : i32
    %257 = arith.muli %c6_i32, %c8_i32_68 : i32
    %258 = tpu.assume_multiple %257, 8 : i32
    %c7_i32_69 = arith.constant 7 : i32
    %259 = arith.subi %c7_i32_69, %c6_i32 : i32
    %c8_i32_70 = arith.constant 8 : i32
    %260 = arith.muli %259, %c8_i32_70 : i32
    %261 = tpu.assume_multiple %260, 8 : i32
    %262 = arith.index_cast %258 : i32 to index
    %c0_71 = arith.constant 0 : index
    %263 = vector.load %arg13[%262, %c0_71] : memref<64x1024xf32, #tpu.memory_space<vmem>>, vector<8x1024xf32>
    %cst_72 = arith.constant dense<0.000000e+00> : vector<8x1024xf32>
    %264 = tpu.matmul %256, %8, %cst_72 {dimension_numbers = #tpu.dot_dimension_numbers<[1], [0], [0], [1], [0, 0, 1, 1], [], []>} : vector<8x256xbf16>, vector<256x1024xbf16>, vector<8x1024xf32> -> vector<8x1024xf32>
    %265 = arith.addf %263, %264 : vector<8x1024xf32>
    %266 = vector.extract_strided_slice %265 {offsets = [0, 0], sizes = [8, 256], strides = [1, 1]} : vector<8x1024xf32> to vector<8x256xf32>
    %267 = arith.negf %266 : vector<8x256xf32>
    %268 = math.exp %267 : vector<8x256xf32>
    %cst_73 = arith.constant 1.000000e+00 : f32
    %269 = vector.broadcast %cst_73 : f32 to vector<8x256xf32>
    %270 = arith.addf %269, %268 : vector<8x256xf32>
    %271 = arith.divf %269, %270 : vector<8x256xf32>
    %272 = vector.extract_strided_slice %265 {offsets = [0, 256], sizes = [8, 256], strides = [1, 1]} : vector<8x1024xf32> to vector<8x256xf32>
    %273 = arith.negf %272 : vector<8x256xf32>
    %274 = math.exp %273 : vector<8x256xf32>
    %cst_74 = arith.constant 1.000000e+00 : f32
    %275 = vector.broadcast %cst_74 : f32 to vector<8x256xf32>
    %276 = arith.addf %275, %274 : vector<8x256xf32>
    %277 = arith.divf %275, %276 : vector<8x256xf32>
    %278 = vector.extract_strided_slice %265 {offsets = [0, 512], sizes = [8, 256], strides = [1, 1]} : vector<8x1024xf32> to vector<8x256xf32>
    %279 = math.tanh %278 : vector<8x256xf32>
    %280 = vector.extract_strided_slice %265 {offsets = [0, 768], sizes = [8, 256], strides = [1, 1]} : vector<8x1024xf32> to vector<8x256xf32>
    %281 = arith.negf %280 : vector<8x256xf32>
    %282 = math.exp %281 : vector<8x256xf32>
    %cst_75 = arith.constant 1.000000e+00 : f32
    %283 = vector.broadcast %cst_75 : f32 to vector<8x256xf32>
    %284 = arith.addf %283, %282 : vector<8x256xf32>
    %285 = arith.divf %283, %284 : vector<8x256xf32>
    %286 = arith.mulf %277, %247 : vector<8x256xf32>
    %287 = arith.mulf %271, %279 : vector<8x256xf32>
    %288 = arith.addf %286, %287 : vector<8x256xf32>
    %289 = math.tanh %288 : vector<8x256xf32>
    %290 = arith.mulf %285, %289 : vector<8x256xf32>
    %291 = vector.extract_strided_slice %290 {offsets = [0, 0], sizes = [8, 128], strides = [1, 1]} : vector<8x256xf32> to vector<8x128xf32>
    %292 = arith.index_cast %258 : i32 to index
    %c0_76 = arith.constant 0 : index
    %293 = vector.load %arg14[%292, %c0_76] : memref<64x256xf32, #tpu.memory_space<vmem>>, vector<8x128xf32>
    tpu.vector_store %arg14[%292, %c0_76], %291 {strides = array<i32>} : memref<64x256xf32, #tpu.memory_space<vmem>>, vector<8x128xf32>,
    %294 = vector.extract_strided_slice %290 {offsets = [0, 128], sizes = [8, 128], strides = [1, 1]} : vector<8x256xf32> to vector<8x128xf32>
    %295 = arith.index_cast %261 : i32 to index
    %c128_77 = arith.constant 128 : index
    %296 = vector.load %arg14[%295, %c128_77] : memref<64x256xf32, #tpu.memory_space<vmem>>, vector<8x128xf32>
    tpu.vector_store %arg14[%295, %c128_77], %294 {strides = array<i32>} : memref<64x256xf32, #tpu.memory_space<vmem>>, vector<8x128xf32>,
    %297 = arith.truncf %290 : vector<8x256xf32> to vector<8x256xbf16>
    %c7_i32_78 = arith.constant 7 : i32
    %c8_i32_79 = arith.constant 8 : i32
    %298 = arith.muli %c7_i32_78, %c8_i32_79 : i32
    %299 = tpu.assume_multiple %298, 8 : i32
    %c7_i32_80 = arith.constant 7 : i32
    %300 = arith.subi %c7_i32_80, %c7_i32_78 : i32
    %c8_i32_81 = arith.constant 8 : i32
    %301 = arith.muli %300, %c8_i32_81 : i32
    %302 = tpu.assume_multiple %301, 8 : i32
    %303 = arith.index_cast %299 : i32 to index
    %c0_82 = arith.constant 0 : index
    %304 = vector.load %arg13[%303, %c0_82] : memref<64x1024xf32, #tpu.memory_space<vmem>>, vector<8x1024xf32>
    %cst_83 = arith.constant dense<0.000000e+00> : vector<8x1024xf32>
    %305 = tpu.matmul %297, %8, %cst_83 {dimension_numbers = #tpu.dot_dimension_numbers<[1], [0], [0], [1], [0, 0, 1, 1], [], []>} : vector<8x256xbf16>, vector<256x1024xbf16>, vector<8x1024xf32> -> vector<8x1024xf32>
    %306 = arith.addf %304, %305 : vector<8x1024xf32>
    %307 = vector.extract_strided_slice %306 {offsets = [0, 0], sizes = [8, 256], strides = [1, 1]} : vector<8x1024xf32> to vector<8x256xf32>
    %308 = arith.negf %307 : vector<8x256xf32>
    %309 = math.exp %308 : vector<8x256xf32>
    %cst_84 = arith.constant 1.000000e+00 : f32
    %310 = vector.broadcast %cst_84 : f32 to vector<8x256xf32>
    %311 = arith.addf %310, %309 : vector<8x256xf32>
    %312 = arith.divf %310, %311 : vector<8x256xf32>
    %313 = vector.extract_strided_slice %306 {offsets = [0, 256], sizes = [8, 256], strides = [1, 1]} : vector<8x1024xf32> to vector<8x256xf32>
    %314 = arith.negf %313 : vector<8x256xf32>
    %315 = math.exp %314 : vector<8x256xf32>
    %cst_85 = arith.constant 1.000000e+00 : f32
    %316 = vector.broadcast %cst_85 : f32 to vector<8x256xf32>
    %317 = arith.addf %316, %315 : vector<8x256xf32>
    %318 = arith.divf %316, %317 : vector<8x256xf32>
    %319 = vector.extract_strided_slice %306 {offsets = [0, 512], sizes = [8, 256], strides = [1, 1]} : vector<8x1024xf32> to vector<8x256xf32>
    %320 = math.tanh %319 : vector<8x256xf32>
    %321 = vector.extract_strided_slice %306 {offsets = [0, 768], sizes = [8, 256], strides = [1, 1]} : vector<8x1024xf32> to vector<8x256xf32>
    %322 = arith.negf %321 : vector<8x256xf32>
    %323 = math.exp %322 : vector<8x256xf32>
    %cst_86 = arith.constant 1.000000e+00 : f32
    %324 = vector.broadcast %cst_86 : f32 to vector<8x256xf32>
    %325 = arith.addf %324, %323 : vector<8x256xf32>
    %326 = arith.divf %324, %325 : vector<8x256xf32>
    %327 = arith.mulf %318, %288 : vector<8x256xf32>
    %328 = arith.mulf %312, %320 : vector<8x256xf32>
    %329 = arith.addf %327, %328 : vector<8x256xf32>
    %330 = math.tanh %329 : vector<8x256xf32>
    %331 = arith.mulf %326, %330 : vector<8x256xf32>
    %332 = vector.extract_strided_slice %331 {offsets = [0, 0], sizes = [8, 128], strides = [1, 1]} : vector<8x256xf32> to vector<8x128xf32>
    %333 = arith.index_cast %299 : i32 to index
    %c0_87 = arith.constant 0 : index
    %334 = vector.load %arg14[%333, %c0_87] : memref<64x256xf32, #tpu.memory_space<vmem>>, vector<8x128xf32>
    tpu.vector_store %arg14[%333, %c0_87], %332 {strides = array<i32>} : memref<64x256xf32, #tpu.memory_space<vmem>>, vector<8x128xf32>,
    %335 = vector.extract_strided_slice %331 {offsets = [0, 128], sizes = [8, 128], strides = [1, 1]} : vector<8x256xf32> to vector<8x128xf32>
    %336 = arith.index_cast %302 : i32 to index
    %c128_88 = arith.constant 128 : index
    %337 = vector.load %arg14[%336, %c128_88] : memref<64x256xf32, #tpu.memory_space<vmem>>, vector<8x128xf32>
    tpu.vector_store %arg14[%336, %c128_88], %335 {strides = array<i32>} : memref<64x256xf32, #tpu.memory_space<vmem>>, vector<8x128xf32>,
    %338 = arith.truncf %331 : vector<8x256xf32> to vector<8x256xbf16>
    %c8_i32_89 = arith.constant 8 : i32
    %c0_90 = arith.constant 0 : index
    %c0_91 = arith.constant 0 : index
    %339 = vector.load %arg14[%c0_90, %c0_91] : memref<64x256xf32, #tpu.memory_space<vmem>>, vector<64x256xf32>
    %cst_92 = arith.constant 0.000000e+00 : f32
    %340 = vector.broadcast %cst_92 : f32 to vector<64x256xf32>
    %341 = arith.maximumf %339, %340 : vector<64x256xf32>
    %c0_93 = arith.constant 0 : index
    %c0_94 = arith.constant 0 : index
    %342 = vector.load %arg1[%c0_93, %c0_94] : memref<64x1xf32, #tpu.memory_space<vmem>>, vector<64x1xf32>
    %343 = vector.broadcast %342 : vector<64x1xf32> to vector<64x256xf32>
    %344 = arith.mulf %341, %343 : vector<64x256xf32>
    %cst_95 = arith.constant dense<0.000000e+00> : vector<256xf32>
    %345 = vector.multi_reduction <add>, %344, %cst_95 [0] : vector<64x256xf32> to vector<256xf32>
    %346 = vector.shape_cast %345 : vector<256xf32> to vector<1x256xf32>
    %347 = arith.mulf %344, %341 : vector<64x256xf32>
    %cst_96 = arith.constant dense<0.000000e+00> : vector<256xf32>
    %348 = vector.multi_reduction <add>, %347, %cst_96 [0] : vector<64x256xf32> to vector<256xf32>
    %349 = vector.shape_cast %348 : vector<256xf32> to vector<1x256xf32>
    %cst_97 = arith.constant 1.600000e+01 : f32
    %350 = vector.broadcast %cst_97 : f32 to vector<1x256xf32>
    %351 = arith.divf %346, %350 : vector<1x256xf32>
    %cst_98 = arith.constant 1.600000e+01 : f32
    %352 = vector.broadcast %cst_98 : f32 to vector<1x256xf32>
    %353 = arith.divf %349, %352 : vector<1x256xf32>
    %354 = arith.mulf %351, %351 : vector<1x256xf32>
    %355 = arith.subf %353, %354 : vector<1x256xf32>
    %cst_99 = arith.constant 0.000000e+00 : f32
    %356 = vector.broadcast %cst_99 : f32 to vector<1x256xf32>
    %357 = arith.maximumf %355, %356 : vector<1x256xf32>
    %c0_100 = arith.constant 0 : index
    %c0_101 = arith.constant 0 : index
    %358 = vector.load %arg7[%c0_100, %c0_101] : memref<1x256xf32, #tpu.memory_space<vmem>>, vector<1x256xf32>
    %cst_102 = arith.constant 9.99999974E-6 : f32
    %359 = vector.broadcast %cst_102 : f32 to vector<1x256xf32>
    %360 = arith.addf %357, %359 : vector<1x256xf32>
    %361 = math.rsqrt %360 : vector<1x256xf32>
    %362 = arith.mulf %358, %361 : vector<1x256xf32>
    %c0_103 = arith.constant 0 : index
    %c0_104 = arith.constant 0 : index
    %363 = vector.load %arg8[%c0_103, %c0_104] : memref<1x256xf32, #tpu.memory_space<vmem>>, vector<1x256xf32>
    %364 = arith.mulf %351, %362 : vector<1x256xf32>
    %365 = arith.subf %363, %364 : vector<1x256xf32>
    %366 = vector.broadcast %362 : vector<1x256xf32> to vector<64x256xf32>
    %367 = arith.mulf %341, %366 : vector<64x256xf32>
    %368 = vector.broadcast %365 : vector<1x256xf32> to vector<64x256xf32>
    %369 = arith.addf %367, %368 : vector<64x256xf32>
    %c0_105 = arith.constant 0 : index
    %c0_106 = arith.constant 0 : index
    %370 = vector.load %arg5[%c0_105, %c0_106] : memref<1x256xf32, #tpu.memory_space<vmem>>, vector<1x256xf32>
    %371 = vector.broadcast %370 : vector<1x256xf32> to vector<64x256xf32>
    %372 = arith.mulf %369, %371 : vector<64x256xf32>
    %cst_107 = arith.constant dense<0.000000e+00> : vector<64xf32>
    %373 = vector.multi_reduction <add>, %372, %cst_107 [1] : vector<64x256xf32> to vector<64xf32>
    %374 = vector.shape_cast %373 : vector<64xf32> to vector<64x1xf32>
    %c0_108 = arith.constant 0 : index
    %c0_109 = arith.constant 0 : index
    %375 = vector.load %arg6[%c0_108, %c0_109] : memref<1x1xf32, #tpu.memory_space<vmem>>, vector<1x1xf32>
    %376 = vector.broadcast %375 : vector<1x1xf32> to vector<64x1xf32>
    %377 = arith.addf %374, %376 : vector<64x1xf32>
    %378 = arith.mulf %377, %342 : vector<64x1xf32>
    %cst_110 = arith.constant dense<0.000000e+00> : vector<1xf32>
    %379 = vector.multi_reduction <add>, %378, %cst_110 [0] : vector<64x1xf32> to vector<1xf32>
    %380 = vector.shape_cast %379 : vector<1xf32> to vector<1x1xf32>
    %381 = arith.mulf %378, %377 : vector<64x1xf32>
    %cst_111 = arith.constant dense<0.000000e+00> : vector<1xf32>
    %382 = vector.multi_reduction <add>, %381, %cst_111 [0] : vector<64x1xf32> to vector<1xf32>
    %383 = vector.shape_cast %382 : vector<1xf32> to vector<1x1xf32>
    %cst_112 = arith.constant 1.600000e+01 : f32
    %384 = vector.broadcast %cst_112 : f32 to vector<1x1xf32>
    %385 = arith.divf %380, %384 : vector<1x1xf32>
    %cst_113 = arith.constant 1.600000e+01 : f32
    %386 = vector.broadcast %cst_113 : f32 to vector<1x1xf32>
    %387 = arith.divf %383, %386 : vector<1x1xf32>
    %388 = arith.mulf %385, %385 : vector<1x1xf32>
    %389 = arith.subf %387, %388 : vector<1x1xf32>
    %cst_114 = arith.constant 0.000000e+00 : f32
    %390 = vector.broadcast %cst_114 : f32 to vector<1x1xf32>
    %391 = arith.maximumf %389, %390 : vector<1x1xf32>
    %c0_115 = arith.constant 0 : index
    %c0_116 = arith.constant 0 : index
    %392 = vector.load %arg9[%c0_115, %c0_116] : memref<1x1xf32, #tpu.memory_space<vmem>>, vector<1x1xf32>
    %cst_117 = arith.constant 9.99999974E-6 : f32
    %393 = vector.broadcast %cst_117 : f32 to vector<1x1xf32>
    %394 = arith.addf %391, %393 : vector<1x1xf32>
    %395 = math.rsqrt %394 : vector<1x1xf32>
    %396 = arith.mulf %392, %395 : vector<1x1xf32>
    %c0_118 = arith.constant 0 : index
    %c0_119 = arith.constant 0 : index
    %397 = vector.load %arg10[%c0_118, %c0_119] : memref<1x1xf32, #tpu.memory_space<vmem>>, vector<1x1xf32>
    %398 = arith.mulf %385, %396 : vector<1x1xf32>
    %399 = arith.subf %397, %398 : vector<1x1xf32>
    %400 = vector.broadcast %396 : vector<1x1xf32> to vector<64x1xf32>
    %401 = arith.mulf %377, %400 : vector<64x1xf32>
    %402 = vector.broadcast %399 : vector<1x1xf32> to vector<64x1xf32>
    %403 = arith.addf %401, %402 : vector<64x1xf32>
    %404 = arith.negf %403 : vector<64x1xf32>
    %405 = math.exp %404 : vector<64x1xf32>
    %cst_120 = arith.constant 1.000000e+00 : f32
    %406 = vector.broadcast %cst_120 : f32 to vector<64x1xf32>
    %407 = arith.addf %406, %405 : vector<64x1xf32>
    %408 = arith.divf %406, %407 : vector<64x1xf32>
    %c0_121 = arith.constant 0 : index
    %c0_122 = arith.constant 0 : index
    %409 = vector.load %arg12[%c0_121, %c0_122] : memref<64x1xf32, #tpu.memory_space<vmem>>, vector<64x1xf32>
    tpu.vector_store %arg12[%c0_121, %c0_122], %408 {strides = array<i32>} : memref<64x1xf32, #tpu.memory_space<vmem>>, vector<64x1xf32>,
    %c0_123 = arith.constant 0 : index
    %c0_124 = arith.constant 0 : index
    %410 = vector.load %arg0[%c0_123, %c0_124] : memref<64x40xf32, #tpu.memory_space<vmem>>, vector<64x20xf32>
    %411 = math.log %410 : vector<64x20xf32>
    %412 = vector.broadcast %408 : vector<64x1xf32> to vector<64x20xf32>
    %413 = arith.mulf %412, %411 : vector<64x20xf32>
    %414 = math.exp %413 : vector<64x20xf32>
    %cst_125 = arith.constant 1.000000e+00 : f32
    %415 = vector.broadcast %cst_125 : f32 to vector<64x20xf32>
    %416 = arith.subf %415, %414 : vector<64x20xf32>
    %417 = vector.broadcast %408 : vector<64x1xf32> to vector<64x20xf32>
    %418 = arith.divf %416, %417 : vector<64x20xf32>
    %c0_126 = arith.constant 0 : index
    %c0_127 = arith.constant 0 : index
    %419 = vector.load %arg11[%c0_126, %c0_127] : memref<64x20xf32, #tpu.memory_space<vmem>>, vector<64x20xf32>
    tpu.vector_store %arg11[%c0_126, %c0_127], %418 {strides = array<i32>} : memref<64x20xf32, #tpu.memory_space<vmem>>, vector<64x20xf32>,
    return
  }
}

</mosaic_0001>

<bundles_post_ra>
// kernel: tpu_custom_call.1
= control target key start
LH: loop header
LB: loop body
LE: loop exit
PB: predicated region body
PF: predicated region fallthrough
CT: control target
= control target key end

     0   :  { %s6849_s0 = inlined_call_operand.vmem [shape: f32[64,40], index: 0, kind: input, shape index: {}]   ;;  %s6850_s1 = inlined_call_operand.vmem [shape: f32[64,1], index: 1, kind: input, shape index: {}]   ;;  %s6851_s2 = inlined_call_operand.vmem [shape: bf16[40,1024], index: 2, kind: input, shape index: {}]   ;;  %s6852_s3 = inlined_call_operand.hbm [shape: bf16[256,1024], index: 3, kind: input, shape index: {}]   ;;  %s6853_s4 = inlined_call_operand.vmem [shape: f32[1,1024], index: 4, kind: input, shape index: {}]   ;;  %s6854_s5 = inlined_call_operand.vmem [shape: f32[1,256], index: 5, kind: input, shape index: {}]   ;;  %s6855_s6 = inlined_call_operand.<no memory space> [shape: f32[1,1], index: 6, kind: input, shape index: {}]   ;;  %s6856_s7 = inlined_call_operand.vmem [shape: f32[1,256], index: 7, kind: input, shape index: {}]   ;;  %s6857_s8 = inlined_call_operand.vmem [shape: f32[1,256], index: 8, kind: input, shape index: {}]   ;;  %s6858_s11 = inlined_call_operand.vmem [shape: f32[64,20], index: 11, kind: output, shape index: {0}]   ;;  %s6859_s12 = inlined_call_operand.vmem [shape: f32[64,1], index: 12, kind: output, shape index: {1}]   ;;  %s6860_s9 = inlined_call_operand.<no memory space> [shape: f32[1,1], index: 9, kind: input, shape index: {}]   ;;  %s6861_s10 = inlined_call_operand.<no memory space> [shape: f32[1,1], index: 10, kind: input, shape index: {}]  }
   0x1   :  { %v18_v0 = vstv %s6855_s6  ;;  %v20_v1 = vstv %s6860_s9  ;;  %v22_v2 = vstv %s6861_s10 }
   0x2   :  { %19 = vst [vmem:[#allocation4] sm:$0x1] %v18_v0  ;;  %21 = vst [vmem:[#allocation5] sm:$0x1] %v20_v1 }
   0x3   :  { %23 = vst [vmem:[#allocation6] sm:$0x1] %v22_v2 }
   0x4   :  { %24 = vsyncpa [#allocation8], 0  ;;  %s4556_s27 = smov [#allocation7]  }
   0x5   :  { %s36_s28 = sshll.u32 %s4556_s27, 4  ;;  %s37_s28 = int_to_ptr.vmem [resolvable:$true] %s36_s28 }
   0x6   :  { %s4542_s29 = scalar_lea.vmem %s37_s28, 16384  ;;  %p4547_p1 = scmp.lt.s32.totalorder %s37_s28, %s37_s28 }
   0x7   :  { %p4543_p0 = scmp.ne.s32.totalorder %s37_s28, %s4542_s29  ;;  %p4548_p2 = scmp.lt.s32.totalorder %s4542_s29, %s4542_s29 }
   0x9   :  { %p4549_p3 = por %p4548_p2, %p4547_p1 }
   0xb   :  { %p4550_p4 = pnand %p4549_p3, %p4543_p0 }
   0xd   :  { %4553 = shalt.err (!%p4550_p4)
}
   0xe   :  { %s4557_s6 = smov 512   ;;  %s4558_s9 = smov 32  }
   0xf   :  { %42 = dma.hbm_to_vmem [thread:$0]  %s6852_s3, 16384, %s37_s28, [#allocation8], %s4557_s6, %s4557_s6, %s4558_s9  }
  0x10   :  { %4554 = dma.done.wait [#allocation8], 16384  }
  0x11   :  { %4555 = vsyncadd [#allocation8], 4294950912  ;;  %v6862_v3 = vmov 0   ;;  %v89_v4 = vld [vmem:[%s6851_s2 + $0x80] sm:$0xff]  ;;  %vm248_vm0 = vcmask 1043456   ;;  %v90_v5 = vld [vmem:[%s6851_s2 + $0x88] sm:$0xff] }
  0x12   :  { %305 = vmatprep.mubr.bf16.mxu0 %v6862_v3  ;;  %378 = vmatprep.mubr.bf16.mxu1 %v6862_v3  ;;  %v81_v6 = vld [vmem:[%s6851_s2 + $0x40] sm:$0xff]  ;;  %v3957_v7 = vcombine.high %v89_v4, %v89_v4  ;;  %v3959_v8 = vcombine.high %v90_v5, %v90_v5  ;;  %v3956_v9 = vcombine.low %v89_v4, %v89_v4  ;;  %v82_v12 = vld [vmem:[%s6851_s2 + $0x48] sm:$0xff]  ;;  %v91_v26 = vld [vmem:[%s6851_s2 + $0x90] sm:$0xff]  ;;  %vm235_vm1 = vcmask 326656  }
  0x13   :  { %4175 = vset.pattern.permute.xlu1 %v6862_v3  ;;  %4174 = vset.pattern.permute.xlu0 %v6862_v3  ;;  %v3958_v10 = vcombine.low %v90_v5, %v90_v5  ;;  %v85_v11 = vld [vmem:[%s6851_s2 + $0x60] sm:$0xff]  ;;  %v86_v13 = vld [vmem:[%s6851_s2 + $0x68] sm:$0xff]  ;;  %v92_v27 = vld [vmem:[%s6851_s2 + $0x98] sm:$0xff]  ;;  %v3961_v32 = vcombine.high %v91_v26, %v91_v26  ;;  %v3960_v34 = vcombine.low %v91_v26, %v91_v26  ;;  %vm3649_vm2 = vcmask 7168  }
  0x14   :  { %v3949_v14 = vcombine.high %v81_v6, %v85_v11  ;;  %v3951_v15 = vcombine.high %v82_v12, %v86_v13  ;;  %v73_v16 = vld [vmem:[%s6851_s2] sm:$0xff]  ;;  %v74_v18 = vld [vmem:[%s6851_s2 + $0x8] sm:$0xff]  ;;  %3964 = vmatprep.subr.msk.bf16.mxu0 %vm248_vm0, %v3957_v7  ;;  %3969 = vmatprep.subr.msk.bf16.mxu1 %vm248_vm0, %v3959_v8  ;;  %v250_v19 = vsel %vm248_vm0, %v3956_v9, 0  ;;  %v3948_v22 = vcombine.low %v81_v6, %v85_v11  ;;  %v83_v36 = vld [vmem:[%s6851_s2 + $0x50] sm:$0xff] }
  0x15   :  { %v77_v17 = vld [vmem:[%s6851_s2 + $0x20] sm:$0xff]  ;;  %v256_v20 = vsel %vm248_vm0, %v3958_v10, 0  ;;  %v78_v21 = vld [vmem:[%s6851_s2 + $0x28] sm:$0xff]  ;;  %284 = vmatpush1.bf16.msra.mxu0 %v250_v19  ;;  %v3950_v23 = vcombine.low %v82_v12, %v86_v13  ;;  %v3963_v33 = vcombine.high %v92_v27, %v92_v27  ;;  %v3962_v35 = vcombine.low %v92_v27, %v92_v27  ;;  %v87_v38 = vld [vmem:[%s6851_s2 + $0x70] sm:$0xff] }
  0x16   :  { %357 = vmatpush1.bf16.msra.mxu1 %v256_v20  ;;  %285 = vmatprep.subr.bf16.mxu0 %v3949_v14  ;;  %v3941_v24 = vcombine.high %v73_v16, %v77_v17  ;;  %v3943_v25 = vcombine.high %v74_v18, %v78_v21  ;;  %v3940_v28 = vcombine.low %v73_v16, %v77_v17  ;;  %v61_v30 = vld [vmem:[%s6849_s0] sm:$0xff]  ;;  %v62_v31 = vld [vmem:[%s6849_s0 + $0x8] sm:$0xff]  ;;  %v84_v39 = vld [vmem:[%s6851_s2 + $0x58] sm:$0xff]  ;;  %v262_v41 = vsel %vm248_vm0, %v3960_v34, 0 }
  0x17   :  { %358 = vmatprep.subr.bf16.mxu1 %v3951_v15  ;;  %v3942_v29 = vcombine.low %v74_v18, %v78_v21  ;;  %v4691_v37 = vpack.c.bf16 %v62_v31, %v61_v30  ;;  %v88_v40 = vld [vmem:[%s6851_s2 + $0x78] sm:$0xff]  ;;  %v268_v42 = vsel %vm248_vm0, %v3962_v35, 0  ;;  %v75_v43 = vld [vmem:[%s6851_s2 + $0x10] sm:$0xff]  ;;  %v3953_v44 = vcombine.high %v83_v36, %v87_v38  ;;  %v685_v55 = vld [vmem:[#allocation7 + $0x1c0] sm:$0xff] }
  0x18   :  { %v3955_v45 = vcombine.high %v84_v39, %v88_v40  ;;  %v79_v46 = vld [vmem:[%s6851_s2 + $0x30] sm:$0xff]  ;;  %v76_v47 = vld [vmem:[%s6851_s2 + $0x18] sm:$0xff]  ;;  %v3952_v51 = vcombine.low %v83_v36, %v87_v38  ;;  %v3954_v52 = vcombine.low %v84_v39, %v88_v40  ;;  %v689_v57 = vld [vmem:[#allocation7 + $0x1e0] sm:$0xff]  ;;  %vm3908_vm3 = vcmask 162816  }
  0x19   :  { %286 = vmatpush1.bf16.msra.mxu0 %v3948_v22  ;;  %v80_v48 = vld [vmem:[%s6851_s2 + $0x38] sm:$0xff]  ;;  %v63_v49 = vld [vmem:[%s6849_s0 + $0x10] sm:$0xff]  ;;  %v3945_v53 = vcombine.high %v75_v43, %v79_v46  ;;  %v3944_v60 = vcombine.low %v75_v43, %v79_v46  ;;  %v4732_v62 = vcombine.high %v685_v55, %v689_v57  ;;  %v65_v0 = vld [vmem:[%s6849_s0 + $0x20] sm:$0xff]  ;;  %v4772_v11 = vcombine.low %v685_v55, %v689_v57 }
  0x1a   :  { %359 = vmatpush1.bf16.msra.mxu1 %v3950_v23  ;;  %287 = vmatprep.subr.bf16.mxu0 %v3941_v24  ;;  %v64_v50 = vld [vmem:[%s6849_s0 + $0x18] sm:$0xff]  ;;  %v3947_v54 = vcombine.high %v76_v47, %v80_v48  ;;  %v686_v58 = vld [vmem:[#allocation7 + $0x1c8] sm:$0xff]  ;;  %v3946_v61 = vcombine.low %v76_v47, %v80_v48  ;;  %v677_v7 = vld [vmem:[#allocation7 + $0x180] sm:$0xff] }
  0x1b   :  { %360 = vmatprep.subr.bf16.mxu1 %v3943_v25  ;;  %v4730_v56 = vpack.c.bf16 %v64_v50, %v63_v49  ;;  %v690_v59 = vld [vmem:[#allocation7 + $0x1e8] sm:$0xff]  ;;  %7146 = vst [vmem:[#allocation10_spill] sm:$0xff] %v4732_v62  ;;  %v68_v5 = vld [vmem:[%s6849_s0 + $0x38] sm:$0xff]  ;;  %v681_v8 = vld [vmem:[#allocation7 + $0x1a0] sm:$0xff] }
  0x1c   :  { %v4734_v63 = vcombine.high %v686_v58, %v690_v59  ;;  %v66_v1 = vld [vmem:[%s6849_s0 + $0x28] sm:$0xff]  ;;  %v67_v4 = vld [vmem:[%s6849_s0 + $0x30] sm:$0xff]  ;;  %7148 = vst [vmem:[#allocation12_spill] sm:$0xff] %v4772_v11  ;;  %v4774_v12 = vcombine.low %v686_v58, %v690_v59  ;;  %v4776_v13 = vcombine.high %v677_v7, %v681_v8  ;;  %v4786_v19 = vcombine.low %v677_v7, %v681_v8 }
  0x1d   :  { %288 = vmatpush1.bf16.msra.mxu0 %v3940_v28  ;;  %v4750_v2 = vpack.c.bf16 %v66_v1, %v65_v0  ;;  %v4764_v6 = vpack.c.bf16 %v68_v5, %v67_v4  ;;  %v678_v9 = vld [vmem:[#allocation7 + $0x188] sm:$0xff]  ;;  %v669_v15 = vld [vmem:[#allocation7 + $0x140] sm:$0xff] }
  0x1e   :  { %361 = vmatpush1.bf16.msra.mxu1 %v3942_v29  ;;  %3974 = vmatprep.subr.msk.bf16.mxu0 %vm248_vm0, %v3961_v32  ;;  %7147 = vst [vmem:[#allocation11_spill] sm:$0xff] %v4734_v63  ;;  %v682_v10 = vld [vmem:[#allocation7 + $0x1a8] sm:$0xff]  ;;  %7149 = vst [vmem:[#allocation13_spill] sm:$0xff] %v4774_v12  ;;  %v673_v16 = vld [vmem:[#allocation7 + $0x160] sm:$0xff] }
  0x1f   :  { %3979 = vmatprep.subr.msk.bf16.mxu1 %vm248_vm0, %v3963_v33  ;;  %7150 = vst [vmem:[#allocation14_spill] sm:$0xff] %v4776_v13  ;;  %v4778_v14 = vcombine.high %v678_v9, %v682_v10  ;;  %v670_v17 = vld [vmem:[#allocation7 + $0x148] sm:$0xff]  ;;  %7152 = vst [vmem:[#allocation16_spill] sm:$0xff] %v4786_v19  ;;  %v4788_v20 = vcombine.low %v678_v9, %v682_v10  ;;  %v4792_v21 = vcombine.high %v669_v15, %v673_v16  ;;  %v661_v23 = vld [vmem:[#allocation7 + $0x100] sm:$0xff] }
  0x20   :  { %3965 = vmatmul.mubr.msk.bf16.vlgmr.msra.gmra.mxu0 %vm235_vm1, %v4691_v37  ;;  %v674_v18 = vld [vmem:[#allocation7 + $0x168] sm:$0xff]  ;;  %v665_v24 = vld [vmem:[#allocation7 + $0x120] sm:$0xff]  ;;  %v4800_v27 = vcombine.low %v669_v15, %v673_v16 }
  0x21   :  { %3970 = vmatmul.mubr.msk.bf16.vlgmr.msra.gmra.mxu1 %vm235_vm1, %v4691_v37  ;;  %430 = vmatpush1.bf16.msra.mxu0 %v262_v41  ;;  %7151 = vst [vmem:[#allocation15_spill] sm:$0xff] %v4778_v14  ;;  %7153 = vst [vmem:[#allocation17_spill] sm:$0xff] %v4788_v20  ;;  %v4794_v22 = vcombine.high %v670_v17, %v674_v18  ;;  %v662_v25 = vld [vmem:[#allocation7 + $0x108] sm:$0xff]  ;;  %v4802_v28 = vcombine.low %v670_v17, %v674_v18  ;;  %v653_v31 = vld [vmem:[#allocation7 + $0xc0] sm:$0xff] }
  0x22   :  { %503 = vmatpush1.bf16.msra.mxu1 %v268_v42  ;;  %315 = vmatprep.mubr.bf16.mxu0 %v6862_v3  ;;  %7154 = vst [vmem:[#allocation18_spill] sm:$0xff] %v4792_v21  ;;  %v666_v26 = vld [vmem:[#allocation7 + $0x128] sm:$0xff]  ;;  %7156 = vst [vmem:[#allocation20_spill] sm:$0xff] %v4800_v27  ;;  %v4806_v29 = vcombine.high %v661_v23, %v665_v24  ;;  %v657_v32 = vld [vmem:[#allocation7 + $0xe0] sm:$0xff]  ;;  %v4816_v35 = vcombine.low %v661_v23, %v665_v24 }
  0x23   :  { %388 = vmatprep.mubr.bf16.mxu1 %v6862_v3  ;;  %431 = vmatprep.subr.bf16.mxu0 %v3953_v44  ;;  %7155 = vst [vmem:[#allocation19_spill] sm:$0xff] %v4794_v22  ;;  %7157 = vst [vmem:[#allocation21_spill] sm:$0xff] %v4802_v28  ;;  %v4808_v30 = vcombine.high %v662_v25, %v666_v26  ;;  %v654_v33 = vld [vmem:[#allocation7 + $0xc8] sm:$0xff]  ;;  %v4818_v36 = vcombine.low %v662_v25, %v666_v26  ;;  %v645_v39 = vld [vmem:[#allocation7 + $0x80] sm:$0xff] }
  0x24   :  { %504 = vmatprep.subr.bf16.mxu1 %v3955_v45  ;;  %7158 = vst [vmem:[#allocation22_spill] sm:$0xff] %v4806_v29  ;;  %v658_v34 = vld [vmem:[#allocation7 + $0xe8] sm:$0xff]  ;;  %7160 = vst [vmem:[#allocation24_spill] sm:$0xff] %v4816_v35  ;;  %v649_v40 = vld [vmem:[#allocation7 + $0xa0] sm:$0xff]  ;;  %v4830_v43 = vcombine.low %v653_v31, %v657_v32 }
  0x25   :  { %432 = vmatpush1.bf16.msra.mxu0 %v3952_v51  ;;  %7159 = vst [vmem:[#allocation23_spill] sm:$0xff] %v4808_v30  ;;  %7161 = vst [vmem:[#allocation25_spill] sm:$0xff] %v4818_v36  ;;  %v4824_v38 = vcombine.high %v654_v33, %v658_v34  ;;  %v646_v41 = vld [vmem:[#allocation7 + $0x88] sm:$0xff]  ;;  %v4832_v44 = vcombine.low %v654_v33, %v658_v34  ;;  %v4836_v45 = vcombine.high %v645_v39, %v649_v40  ;;  %v637_v47 = vld [vmem:[#allocation7 + $0x40] sm:$0xff] }
  0x26   :  { %505 = vmatpush1.bf16.msra.mxu1 %v3954_v52  ;;  %433 = vmatprep.subr.bf16.mxu0 %v3945_v53  ;;  %v650_v42 = vld [vmem:[#allocation7 + $0xa8] sm:$0xff]  ;;  %7164 = vst [vmem:[#allocation28_spill] sm:$0xff] %v4830_v43  ;;  %v641_v48 = vld [vmem:[#allocation7 + $0x60] sm:$0xff]  ;;  %v4846_v51 = vcombine.low %v645_v39, %v649_v40 }
  0x27   :  { %506 = vmatprep.subr.bf16.mxu1 %v3947_v54  ;;  %7163 = vst [vmem:[#allocation27_spill] sm:$0xff] %v4824_v38  ;;  %7165 = vst [vmem:[#allocation29_spill] sm:$0xff] %v4832_v44  ;;  %v4838_v46 = vcombine.high %v646_v41, %v650_v42  ;;  %v638_v49 = vld [vmem:[#allocation7 + $0x48] sm:$0xff]  ;;  %v4848_v52 = vcombine.low %v646_v41, %v650_v42  ;;  %v4852_v53 = vcombine.high %v637_v47, %v641_v48  ;;  %v629_v55 = vld [vmem:[#allocation7] sm:$0xff] }
  0x28   :  { %3966 = vmatmul.mubr.msk.bf16.gmra.mxu0 %vm235_vm1, %v4730_v56  ;;  %7166 = vst [vmem:[#allocation30_spill] sm:$0xff] %v4836_v45  ;;  %v642_v50 = vld [vmem:[#allocation7 + $0x68] sm:$0xff]  ;;  %7168 = vst [vmem:[#allocation32_spill] sm:$0xff] %v4846_v51  ;;  %v4860_v59 = vcombine.low %v637_v47, %v641_v48  ;;  %v749_v1 = vld [vmem:[#allocation7 + $0x3c0] sm:$0xff] }
  0x29   :  { %3971 = vmatmul.mubr.msk.bf16.gmra.mxu1 %vm235_vm1, %v4730_v56  ;;  %325 = vmatprep.mubr.bf16.mxu0 %v6862_v3  ;;  %7167 = vst [vmem:[#allocation31_spill] sm:$0xff] %v4838_v46  ;;  %7169 = vst [vmem:[#allocation33_spill] sm:$0xff] %v4848_v52  ;;  %v4854_v54 = vcombine.high %v638_v49, %v642_v50  ;;  %v630_v57 = vld [vmem:[#allocation7 + $0x8] sm:$0xff]  ;;  %v741_v15 = vld [vmem:[#allocation7 + $0x380] sm:$0xff] }
  0x2a   :  { %398 = vmatprep.mubr.bf16.mxu1 %v6862_v3  ;;  %434 = vmatpush1.bf16.msra.mxu0 %v3944_v60  ;;  %7170 = vst [vmem:[#allocation34_spill] sm:$0xff] %v4852_v53  ;;  %v634_v58 = vld [vmem:[#allocation7 + $0x28] sm:$0xff]  ;;  %7172 = vst [vmem:[#allocation36_spill] sm:$0xff] %v4860_v59  ;;  %v4862_v60 = vcombine.low %v638_v49, %v642_v50  ;;  %v745_v16 = vld [vmem:[#allocation7 + $0x3a0] sm:$0xff] }
  0x2b   :  { %507 = vmatpush1.bf16.msra.mxu1 %v3946_v61  ;;  %1408 = vmatprep.subr.bf16.mxu0 %v4732_v62  ;;  %7171 = vst [vmem:[#allocation35_spill] sm:$0xff] %v4854_v54  ;;  %v4868_v0 = vcombine.high %v630_v57, %v634_v58  ;;  %v750_v4 = vld [vmem:[#allocation7 + $0x3c8] sm:$0xff]  ;;  %v4878_v8 = vcombine.low %v630_v57, %v634_v58  ;;  %v733_v26 = vld [vmem:[#allocation7 + $0x340] sm:$0xff] }
  0x2c   :  { %1449 = vmatprep.subr.bf16.mxu1 %v4734_v63  ;;  %7173 = vst [vmem:[#allocation37_spill] sm:$0xff] %v4862_v60  ;;  %v754_v5 = vld [vmem:[#allocation7 + $0x3e8] sm:$0xff]  ;;  %v4896_v24 = vcombine.high %v741_v15, %v745_v16  ;;  %v4902_v34 = vcombine.low %v741_v15, %v745_v16  ;;  %v725_v42 = vld [vmem:[#allocation7 + $0x300] sm:$0xff] }
  0x2d   :  { %7175 = vst [vmem:[#allocation39_spill] sm:$0xff] %v4868_v0  ;;  %7177 = vst [vmem:[#allocation41_spill] sm:$0xff] %v4878_v8  ;;  %v4884_v10 = vcombine.high %v750_v4, %v754_v5  ;;  %v742_v17 = vld [vmem:[#allocation7 + $0x388] sm:$0xff]  ;;  %v4892_v23 = vcombine.low %v750_v4, %v754_v5  ;;  %v729_v47 = vld [vmem:[#allocation7 + $0x320] sm:$0xff] }
  0x2e   :  { %7182 = vst [vmem:[#allocation46_spill] sm:$0xff] %v4896_v24  ;;  %v738_v33 = vld [vmem:[#allocation7 + $0x368] sm:$0xff]  ;;  %7184 = vst [vmem:[#allocation48_spill] sm:$0xff] %v4902_v34  ;;  %v717_v58 = vld [vmem:[#allocation7 + $0x2c0] sm:$0xff]  ;;  %v4926_v5 = vcombine.low %v725_v42, %v729_v47 }
  0x2f   :  { %7179 = vst [vmem:[#allocation43_spill] sm:$0xff] %v4884_v10  ;;  %7181 = vst [vmem:[#allocation45_spill] sm:$0xff] %v4892_v23  ;;  %v726_v48 = vld [vmem:[#allocation7 + $0x308] sm:$0xff] }
  0x30   :  { %3967 = vmatmul.mubr.msk.bf16.gmra.mxu0 %vm235_vm1, %v4750_v2  ;;  %v730_v49 = vld [vmem:[#allocation7 + $0x328] sm:$0xff]  ;;  %7192 = vst [vmem:[#allocation56_spill] sm:$0xff] %v4926_v5 }
  0x31   :  { %3972 = vmatmul.mubr.msk.bf16.gmra.mxu1 %vm235_vm1, %v4750_v2  ;;  %335 = vmatprep.mubr.bf16.mxu0 %v6862_v3  ;;  %v4922_v57 = vcombine.high %v726_v48, %v730_v49  ;;  %v722_v4 = vld [vmem:[#allocation7 + $0x2e8] sm:$0xff]  ;;  %v4928_v15 = vcombine.low %v726_v48, %v730_v49  ;;  %v701_v49 = vld [vmem:[#allocation7 + $0x240] sm:$0xff] }
  0x32   :  { %408 = vmatprep.mubr.bf16.mxu1 %v6862_v3 }
  0x33   :  { %7191 = vst [vmem:[#allocation55_spill] sm:$0xff] %v4922_v57  ;;  %7193 = vst [vmem:[#allocation57_spill] sm:$0xff] %v4928_v15 }
  0x38   :  { %3968 = vmatmul.mubr.msk.bf16.gmra.mxu0 %vm235_vm1, %v4764_v6 }
  0x39   :  { %3973 = vmatmul.mubr.msk.bf16.gmra.mxu1 %vm235_vm1, %v4764_v6  ;;  %451 = vmatprep.mubr.bf16.mxu0 %v6862_v3 }
  0x3a   :  { %524 = vmatprep.mubr.bf16.mxu1 %v6862_v3 }
  0x40   :  { %3975 = vmatmul.mubr.msk.bf16.vlgmr.msra.gmra.mxu0 %vm235_vm1, %v4691_v37 }
  0x41   :  { %3980 = vmatmul.mubr.msk.bf16.vlgmr.msra.gmra.mxu1 %vm235_vm1, %v4691_v37  ;;  %1409 = vmatpush1.bf16.msra.mxu0 %v4772_v11  ;;  %v4822_v37 = vcombine.high %v653_v31, %v657_v32  ;;  %v737_v31 = vld [vmem:[#allocation7 + $0x360] sm:$0xff]  ;;  %v734_v32 = vld [vmem:[#allocation7 + $0x348] sm:$0xff] }
  0x42   :  { %1450 = vmatpush1.bf16.msra.mxu1 %v4774_v12  ;;  %1410 = vmatprep.subr.bf16.mxu0 %v4776_v13  ;;  %v4908_v40 = vcombine.high %v733_v26, %v737_v31  ;;  %v4910_v41 = vcombine.high %v734_v32, %v738_v33  ;;  %v4914_v50 = vcombine.low %v733_v26, %v737_v31  ;;  %v713_v26 = vld [vmem:[#allocation7 + $0x2a0] sm:$0xff]  ;;  %v710_v31 = vld [vmem:[#allocation7 + $0x288] sm:$0xff] }
  0x43   :  { %1451 = vmatprep.subr.bf16.mxu1 %v4778_v14  ;;  %461 = vmatprep.mubr.bf16.mxu0 %v6862_v3  ;;  %7162 = vst [vmem:[#allocation26_spill] sm:$0xff] %v4822_v37 }
  0x44   :  { %534 = vmatprep.mubr.bf16.mxu1 %v6862_v3  ;;  %7186 = vst [vmem:[#allocation50_spill] sm:$0xff] %v4908_v40  ;;  %7187 = vst [vmem:[#allocation51_spill] sm:$0xff] %v4910_v41 }
  0x45   :  { %1411 = vmatpush1.bf16.msra.mxu0 %v4786_v19  ;;  %7188 = vst [vmem:[#allocation52_spill] sm:$0xff] %v4914_v50 }
  0x46   :  { %1452 = vmatpush1.bf16.msra.mxu1 %v4788_v20  ;;  %1412 = vmatprep.subr.bf16.mxu0 %v4792_v21 }
  0x47   :  { %1453 = vmatprep.subr.bf16.mxu1 %v4794_v22 }
  0x48   :  { %3976 = vmatmul.mubr.msk.bf16.gmra.mxu0 %vm235_vm1, %v4730_v56 }
  0x49   :  { %3981 = vmatmul.mubr.msk.bf16.gmra.mxu1 %vm235_vm1, %v4730_v56  ;;  %1413 = vmatpush1.bf16.msra.mxu0 %v4800_v27  ;;  %v633_v56 = vld [vmem:[#allocation7 + $0x20] sm:$0xff] }
  0x4a   :  { %1454 = vmatpush1.bf16.msra.mxu1 %v4802_v28  ;;  %1414 = vmatprep.subr.bf16.mxu0 %v4806_v29  ;;  %v4866_v61 = vcombine.high %v629_v55, %v633_v56  ;;  %v4876_v7 = vcombine.low %v629_v55, %v633_v56  ;;  %v4916_v55 = vcombine.low %v734_v32, %v738_v33  ;;  %v714_v32 = vld [vmem:[#allocation7 + $0x2a8] sm:$0xff] }
  0x4b   :  { %1455 = vmatprep.subr.bf16.mxu1 %v4808_v30  ;;  %471 = vmatprep.mubr.bf16.mxu0 %v6862_v3  ;;  %v4920_v56 = vcombine.high %v725_v42, %v729_v47  ;;  %v4946_v48 = vcombine.high %v710_v31, %v714_v32 }
  0x4c   :  { %544 = vmatprep.mubr.bf16.mxu1 %v6862_v3  ;;  %7174 = vst [vmem:[#allocation38_spill] sm:$0xff] %v4866_v61  ;;  %7176 = vst [vmem:[#allocation40_spill] sm:$0xff] %v4876_v7 }
  0x4d   :  { %1415 = vmatpush1.bf16.msra.mxu0 %v4816_v35  ;;  %7189 = vst [vmem:[#allocation53_spill] sm:$0xff] %v4916_v55  ;;  %7190 = vst [vmem:[#allocation54_spill] sm:$0xff] %v4920_v56 }
  0x4e   :  { %1456 = vmatpush1.bf16.msra.mxu1 %v4818_v36  ;;  %1416 = vmatprep.subr.bf16.mxu0 %v4822_v37  ;;  %7199 = vst [vmem:[#allocation63_spill] sm:$0xff] %v4946_v48 }
  0x4f   :  { %1457 = vmatprep.subr.bf16.mxu1 %v4824_v38 }
  0x50   :  { %3977 = vmatmul.mubr.msk.bf16.gmra.mxu0 %vm235_vm1, %v4750_v2 }
  0x51   :  { %3982 = vmatmul.mubr.msk.bf16.gmra.mxu1 %vm235_vm1, %v4750_v2  ;;  %1417 = vmatpush1.bf16.msra.mxu0 %v4830_v43  ;;  %v753_v2 = vld [vmem:[#allocation7 + $0x3e0] sm:$0xff] }
  0x52   :  { %1458 = vmatpush1.bf16.msra.mxu1 %v4832_v44  ;;  %1418 = vmatprep.subr.bf16.mxu0 %v4836_v45  ;;  %v4882_v9 = vcombine.high %v749_v1, %v753_v2  ;;  %v4890_v18 = vcombine.low %v749_v1, %v753_v2  ;;  %v721_v1 = vld [vmem:[#allocation7 + $0x2e0] sm:$0xff]  ;;  %v718_v2 = vld [vmem:[#allocation7 + $0x2c8] sm:$0xff] }
  0x53   :  { %1459 = vmatprep.subr.bf16.mxu1 %v4838_v46  ;;  %481 = vmatprep.mubr.bf16.mxu0 %v6862_v3  ;;  %v4932_v16 = vcombine.high %v717_v58, %v721_v1  ;;  %v4938_v33 = vcombine.low %v717_v58, %v721_v1  ;;  %v4940_v42 = vcombine.low %v718_v2, %v722_v4 }
  0x54   :  { %554 = vmatprep.mubr.bf16.mxu1 %v6862_v3  ;;  %7178 = vst [vmem:[#allocation42_spill] sm:$0xff] %v4882_v9  ;;  %7180 = vst [vmem:[#allocation44_spill] sm:$0xff] %v4890_v18  ;;  %v4952_v1 = vcombine.low %v710_v31, %v714_v32 }
  0x55   :  { %1419 = vmatpush1.bf16.msra.mxu0 %v4846_v51  ;;  %7194 = vst [vmem:[#allocation58_spill] sm:$0xff] %v4932_v16  ;;  %7196 = vst [vmem:[#allocation60_spill] sm:$0xff] %v4938_v33 }
  0x56   :  { %1460 = vmatpush1.bf16.msra.mxu1 %v4848_v52  ;;  %1420 = vmatprep.subr.bf16.mxu0 %v4852_v53  ;;  %7197 = vst [vmem:[#allocation61_spill] sm:$0xff] %v4940_v42  ;;  %7201 = vst [vmem:[#allocation65_spill] sm:$0xff] %v4952_v1 }
  0x57   :  { %1461 = vmatprep.subr.bf16.mxu1 %v4854_v54 }
  0x58   :  { %3978 = vmatmul.mubr.msk.bf16.gmra.mxu0 %vm235_vm1, %v4764_v6 }
  0x59   :  { %3983 = vmatmul.mubr.msk.bf16.gmra.mxu1 %vm235_vm1, %v4764_v6  ;;  %1421 = vmatpush1.bf16.msra.mxu0 %v4860_v59  ;;  %v746_v6 = vld [vmem:[#allocation7 + $0x3a8] sm:$0xff] }
  0x5a   :  { %1462 = vmatpush1.bf16.msra.mxu1 %v4862_v60  ;;  %1422 = vmatprep.subr.bf16.mxu0 %v4866_v61  ;;  %v4898_v25 = vcombine.high %v742_v17, %v746_v6  ;;  %v4904_v39 = vcombine.low %v742_v17, %v746_v6  ;;  %v4934_v17 = vcombine.high %v718_v2, %v722_v4  ;;  %v709_v6 = vld [vmem:[#allocation7 + $0x280] sm:$0xff] }
  0x5b   :  { %1463 = vmatprep.subr.bf16.mxu1 %v4868_v0  ;;  %1440 = vmatprep.mubr.bf16.mxu0 %v6862_v3  ;;  %v4944_v47 = vcombine.high %v709_v6, %v713_v26  ;;  %v4950_v58 = vcombine.low %v709_v6, %v713_v26 }
  0x5c   :  { %1481 = vmatprep.mubr.bf16.mxu1 %v6862_v3  ;;  %7183 = vst [vmem:[#allocation47_spill] sm:$0xff] %v4898_v25  ;;  %7185 = vst [vmem:[#allocation49_spill] sm:$0xff] %v4904_v39  ;;  %v705_v3 = vld [vmem:[#allocation7 + $0x260] sm:$0xff] }
  0x5d   :  { %1423 = vmatpush1.bf16.msra.mxu0 %v4876_v7  ;;  %7195 = vst [vmem:[#allocation59_spill] sm:$0xff] %v4934_v17  ;;  %7198 = vst [vmem:[#allocation62_spill] sm:$0xff] %v4944_v47  ;;  %v4956_v2 = vcombine.high %v701_v49, %v705_v3  ;;  %v4962_v6 = vcombine.low %v701_v49, %v705_v3 }
  0x5e   :  { %1464 = vmatpush1.bf16.msra.mxu1 %v4878_v8  ;;  %1424 = vmatprep.subr.bf16.mxu0 %v4882_v9  ;;  %7200 = vst [vmem:[#allocation64_spill] sm:$0xff] %v4950_v58 }
  0x5f   :  { %1465 = vmatprep.subr.bf16.mxu1 %v4884_v10  ;;  %7202 = vst [vmem:[#allocation66_spill] sm:$0xff] %v4956_v2  ;;  %7204 = vst [vmem:[#allocation68_spill] sm:$0xff] %v4962_v6 }
  0x61   :  { %1425 = vmatpush2.bf16.msra.mxu0 %v4890_v18 }
  0x62   :  { %1466 = vmatpush2.bf16.msra.mxu1 %v4892_v23  ;;  %1426 = vmatprep.subr.bf16.mxu0 %v4896_v24 }
  0x63   :  { %1467 = vmatprep.subr.bf16.mxu1 %v4898_v25 }
  0x65   :  { %1427 = vmatpush2.bf16.msra.mxu0 %v4902_v34 }
  0x66   :  { %1468 = vmatpush2.bf16.msra.mxu1 %v4904_v39  ;;  %1428 = vmatprep.subr.bf16.mxu0 %v4908_v40 }
  0x67   :  { %1469 = vmatprep.subr.bf16.mxu1 %v4910_v41 }
  0x69   :  { %1429 = vmatpush2.bf16.msra.mxu0 %v4914_v50 }
  0x6a   :  { %1470 = vmatpush2.bf16.msra.mxu1 %v4916_v55  ;;  %1430 = vmatprep.subr.bf16.mxu0 %v4920_v56  ;;  %v706_v56 = vld [vmem:[#allocation7 + $0x268] sm:$0xff]  ;;  %v7216_v55 = vmov 0  }
  0x6b   :  { %1471 = vmatprep.subr.bf16.mxu1 %v4922_v57  ;;  %v702_v57 = vld [vmem:[#allocation7 + $0x248] sm:$0xff] }
  0x6c   :  { %v4958_v4 = vcombine.high %v702_v57, %v706_v56  ;;  %v4964_v26 = vcombine.low %v702_v57, %v706_v56 }
  0x6d   :  { %1431 = vmatpush2.bf16.msra.mxu0 %v4926_v5  ;;  %v698_v5 = vld [vmem:[#allocation7 + $0x228] sm:$0xff] }
  0x6e   :  { %1472 = vmatpush2.bf16.msra.mxu1 %v4928_v15  ;;  %1432 = vmatprep.subr.bf16.mxu0 %v4932_v16  ;;  %7203 = vst [vmem:[#allocation67_spill] sm:$0xff] %v4958_v4  ;;  %v697_v16 = vld [vmem:[#allocation7 + $0x220] sm:$0xff]  ;;  %v694_v15 = vld [vmem:[#allocation7 + $0x208] sm:$0xff]  ;;  %7205 = vst [vmem:[#allocation69_spill] sm:$0xff] %v4964_v26 }
  0x6f   :  { %1473 = vmatprep.subr.bf16.mxu1 %v4934_v17  ;;  %v693_v17 = vld [vmem:[#allocation7 + $0x200] sm:$0xff]  ;;  %v4970_v32 = vcombine.high %v694_v15, %v698_v5  ;;  %v4976_v56 = vcombine.low %v694_v15, %v698_v5 }
  0x70   :  { %v4968_v31 = vcombine.high %v693_v17, %v697_v16  ;;  %v4974_v3 = vcombine.low %v693_v17, %v697_v16 }
  0x71   :  { %1433 = vmatpush2.bf16.msra.mxu0 %v4938_v33  ;;  %7207 = vst [vmem:[#allocation71_spill] sm:$0xff] %v4970_v32  ;;  %v692_v33 = vld [vmem:[#allocation7 + $0x1f8] sm:$0xff]  ;;  %7209 = vst [vmem:[#allocation73_spill] sm:$0xff] %v4976_v56 }
  0x72   :  { %1474 = vmatpush2.bf16.msra.mxu1 %v4940_v42  ;;  %1434 = vmatprep.subr.bf16.mxu0 %v4944_v47  ;;  %7206 = vst [vmem:[#allocation70_spill] sm:$0xff] %v4968_v31  ;;  %v691_v47 = vld [vmem:[#allocation7 + $0x1f0] sm:$0xff]  ;;  %v688_v42 = vld [vmem:[#allocation7 + $0x1d8] sm:$0xff]  ;;  %7208 = vst [vmem:[#allocation72_spill] sm:$0xff] %v4974_v3 }
  0x73   :  { %1475 = vmatprep.subr.bf16.mxu1 %v4946_v48  ;;  %v687_v48 = vld [vmem:[#allocation7 + $0x1d0] sm:$0xff]  ;;  %v4982_v49 = vcombine.high %v688_v42, %v692_v33  ;;  %v4988_v5 = vcombine.low %v688_v42, %v692_v33 }
  0x74   :  { %v4980_v57 = vcombine.high %v687_v48, %v691_v47  ;;  %v4986_v16 = vcombine.low %v687_v48, %v691_v47 }
  0x75   :  { %1435 = vmatpush2.bf16.msra.mxu0 %v4950_v58  ;;  %7211 = vst [vmem:[#allocation75_spill] sm:$0xff] %v4982_v49  ;;  %v684_v58 = vld [vmem:[#allocation7 + $0x1b8] sm:$0xff]  ;;  %7213 = vst [vmem:[#allocation77_spill] sm:$0xff] %v4988_v5 }
  0x76   :  { %1476 = vmatpush2.bf16.msra.mxu1 %v4952_v1  ;;  %1436 = vmatprep.subr.bf16.mxu0 %v4956_v2  ;;  %7210 = vst [vmem:[#allocation74_spill] sm:$0xff] %v4980_v57  ;;  %v683_v2 = vld [vmem:[#allocation7 + $0x1b0] sm:$0xff]  ;;  %v680_v1 = vld [vmem:[#allocation7 + $0x198] sm:$0xff]  ;;  %7212 = vst [vmem:[#allocation76_spill] sm:$0xff] %v4986_v16 }
  0x77   :  { %1477 = vmatprep.subr.bf16.mxu1 %v4958_v4  ;;  %v679_v4 = vld [vmem:[#allocation7 + $0x190] sm:$0xff]  ;;  %v4994_v17 = vcombine.high %v680_v1, %v684_v58  ;;  %v5002_v42 = vcombine.low %v680_v1, %v684_v58 }
  0x78   :  { %v4992_v15 = vcombine.high %v679_v4, %v683_v2  ;;  %v5000_v33 = vcombine.low %v679_v4, %v683_v2 }
  0x79   :  { %1437 = vmatpush2.bf16.msra.mxu0 %v4962_v6  ;;  %7215 = vst [vmem:[#allocation79_spill] sm:$0xff] %v4994_v17  ;;  %v676_v6 = vld [vmem:[#allocation7 + $0x178] sm:$0xff]  ;;  %7218 = vst [vmem:[#allocation81_spill] sm:$0xff] %v5002_v42 }
  0x7a   :  { %1478 = vmatpush2.bf16.msra.mxu1 %v4964_v26  ;;  %1438 = vmatprep.subr.bf16.mxu0 %v4968_v31  ;;  %7214 = vst [vmem:[#allocation78_spill] sm:$0xff] %v4992_v15  ;;  %v675_v31 = vld [vmem:[#allocation7 + $0x170] sm:$0xff]  ;;  %v672_v26 = vld [vmem:[#allocation7 + $0x158] sm:$0xff]  ;;  %7217 = vst [vmem:[#allocation80_spill] sm:$0xff] %v5000_v33 }
  0x7b   :  { %1479 = vmatprep.subr.bf16.mxu1 %v4970_v32  ;;  %v671_v32 = vld [vmem:[#allocation7 + $0x150] sm:$0xff]  ;;  %v5008_v48 = vcombine.high %v672_v26, %v676_v6  ;;  %v5016_v1 = vcombine.low %v672_v26, %v676_v6 }
  0x7c   :  { %v5006_v47 = vcombine.high %v671_v32, %v675_v31  ;;  %v5014_v58 = vcombine.low %v671_v32, %v675_v31  ;;  %v3334_v31 = vld [vmem:[%s6850_s1 + $0x18] sm:$0xff] }
  0x7d   :  { %1439 = vmatpush2.bf16.msra.mxu0 %v4974_v3  ;;  %7220 = vst [vmem:[#allocation83_spill] sm:$0xff] %v5008_v48  ;;  %v668_v3 = vld [vmem:[#allocation7 + $0x138] sm:$0xff]  ;;  %7222 = vst [vmem:[#allocation85_spill] sm:$0xff] %v5016_v1 }
  0x7e   :  { %1480 = vmatpush2.bf16.msra.mxu1 %v4976_v56  ;;  %1490 = vmatprep.subr.bf16.mxu0 %v4980_v57  ;;  %7219 = vst [vmem:[#allocation82_spill] sm:$0xff] %v5006_v47  ;;  %v667_v57 = vld [vmem:[#allocation7 + $0x130] sm:$0xff]  ;;  %v664_v56 = vld [vmem:[#allocation7 + $0x118] sm:$0xff]  ;;  %7221 = vst [vmem:[#allocation84_spill] sm:$0xff] %v5014_v58 }
  0x7f   :  { %1531 = vmatprep.subr.bf16.mxu1 %v4982_v49  ;;  %v663_v49 = vld [vmem:[#allocation7 + $0x110] sm:$0xff]  ;;  %v5022_v4 = vcombine.high %v664_v56, %v668_v3  ;;  %v5031_v26 = vcombine.low %v664_v56, %v668_v3 }
  0x80   :  { %1441 = vmatmul.mubr.bf16.vlgmr.msra.gmra.mxu0 %v7216_v55  ;;  %v5020_v2 = vcombine.high %v663_v49, %v667_v57  ;;  %v5029_v6 = vcombine.low %v663_v49, %v667_v57  ;;  %v3336_v57 = vld [vmem:[%s6850_s1 + $0x28] sm:$0xff] }
  0x81   :  { %1482 = vmatmul.mubr.bf16.vlgmr.msra.gmra.mxu1 %v7216_v55  ;;  %1491 = vmatpush1.bf16.msra.mxu0 %v4986_v16  ;;  %7224 = vst [vmem:[#allocation87_spill] sm:$0xff] %v5022_v4  ;;  %v660_v16 = vld [vmem:[#allocation7 + $0xf8] sm:$0xff]  ;;  %7226 = vst [vmem:[#allocation89_spill] sm:$0xff] %v5031_v26 }
  0x82   :  { %1532 = vmatpush1.bf16.msra.mxu1 %v4988_v5  ;;  %1492 = vmatprep.subr.bf16.mxu0 %v4992_v15  ;;  %7223 = vst [vmem:[#allocation86_spill] sm:$0xff] %v5020_v2  ;;  %v659_v15 = vld [vmem:[#allocation7 + $0xf0] sm:$0xff]  ;;  %v656_v5 = vld [vmem:[#allocation7 + $0xd8] sm:$0xff]  ;;  %7225 = vst [vmem:[#allocation88_spill] sm:$0xff] %v5029_v6 }
  0x83   :  { %1533 = vmatprep.subr.bf16.mxu1 %v4994_v17  ;;  %1522 = vmatprep.mubr.bf16.mxu0 %v7216_v55  ;;  %v655_v17 = vld [vmem:[#allocation7 + $0xd0] sm:$0xff]  ;;  %v5046_v56 = vcombine.low %v656_v5, %v660_v16 }
  0x84   :  { %1563 = vmatprep.mubr.bf16.mxu1 %v7216_v55  ;;  %v5038_v32 = vcombine.high %v655_v17, %v659_v15  ;;  %v5044_v3 = vcombine.low %v655_v17, %v659_v15  ;;  %v3338_v17 = vld [vmem:[%s6850_s1 + $0x38] sm:$0xff] }
  0x85   :  { %1493 = vmatpush1.bf16.msra.mxu0 %v5000_v33  ;;  %7230 = vst [vmem:[#allocation93_spill] sm:$0xff] %v5046_v56  ;;  %v752_v33 = vld [vmem:[#allocation7 + $0x3d8] sm:$0xff] }
  0x86   :  { %1534 = vmatpush1.bf16.msra.mxu1 %v5002_v42  ;;  %1494 = vmatprep.subr.bf16.mxu0 %v5006_v47  ;;  %v3333_v42 = vld [vmem:[%s6850_s1 + $0x10] sm:$0xff]  ;;  %7227 = vst [vmem:[#allocation90_spill] sm:$0xff] %v5038_v32  ;;  %v648_v47 = vld [vmem:[#allocation7 + $0x98] sm:$0xff]  ;;  %7229 = vst [vmem:[#allocation92_spill] sm:$0xff] %v5044_v3 }
  0x87   :  { %1535 = vmatprep.subr.bf16.mxu1 %v5008_v48  ;;  %3351 = vperm.xlu1 %4175, %v3333_v42   ;;  %v5040_v48 = vcombine.high %v656_v5, %v660_v16  ;;  %v647_v42 = vld [vmem:[#allocation7 + $0x90] sm:$0xff]  ;;  %v3331_v16 = vld [vmem:[%s6850_s1] sm:$0xff] }
  0x88   :  { %3341 = vperm.xlu0 %4174, %v3331_v16   ;;  %v631_v16 = vld [vmem:[#allocation7 + $0x10] sm:$0xff] }
  0x89   :  { %1495 = vmatpush1.bf16.msra.mxu0 %v5014_v58  ;;  %7228 = vst [vmem:[#allocation91_spill] sm:$0xff] %v5040_v48  ;;  %v651_v58 = vld [vmem:[#allocation7 + $0xb0] sm:$0xff] }
  0x8a   :  { %1536 = vmatpush1.bf16.msra.mxu1 %v5016_v1  ;;  %1496 = vmatprep.subr.bf16.mxu0 %v5020_v2  ;;  %v652_v1 = vld [vmem:[#allocation7 + $0xb8] sm:$0xff]  ;;  %v5053_v49 = vcombine.high %v647_v42, %v651_v58  ;;  %v5062_v5 = vcombine.low %v647_v42, %v651_v58 }
  0x8b   :  { %1537 = vmatprep.subr.bf16.mxu1 %v5022_v4  ;;  %3356 = vperm.xlu1 %4175, %v3334_v31   ;;  %v5055_v4 = vcombine.high %v648_v47, %v652_v1  ;;  %v639_v31 = vld [vmem:[#allocation7 + $0x50] sm:$0xff]  ;;  %v640_v2 = vld [vmem:[#allocation7 + $0x58] sm:$0xff]  ;;  %v5064_v15 = vcombine.low %v648_v47, %v652_v1 }
  0x8c   :  { %7231 = vst [vmem:[#allocation94_spill] sm:$0xff] %v5053_v49  ;;  %7233 = vst [vmem:[#allocation96_spill] sm:$0xff] %v5062_v5 }
  0x8d   :  { %1497 = vmatpush1.bf16.msra.mxu0 %v5029_v6  ;;  %7232 = vst [vmem:[#allocation95_spill] sm:$0xff] %v5055_v4  ;;  %v643_v6 = vld [vmem:[#allocation7 + $0x70] sm:$0xff]  ;;  %7234 = vst [vmem:[#allocation97_spill] sm:$0xff] %v5064_v15 }
  0x8e   :  { %1538 = vmatpush1.bf16.msra.mxu1 %v5031_v26  ;;  %1498 = vmatprep.subr.bf16.mxu0 %v5038_v32  ;;  %v644_v26 = vld [vmem:[#allocation7 + $0x78] sm:$0xff]  ;;  %v5077_v47 = vcombine.low %v639_v31, %v643_v6 }
  0x8f   :  { %1539 = vmatprep.subr.bf16.mxu1 %v5040_v48  ;;  %3366 = vperm.xlu1 %4175, %v3336_v57   ;;  %v5071_v48 = vcombine.high %v639_v31, %v643_v6  ;;  %v5073_v57 = vcombine.high %v640_v2, %v644_v26  ;;  %v632_v32 = vld [vmem:[#allocation7 + $0x18] sm:$0xff]  ;;  %v5079_v58 = vcombine.low %v640_v2, %v644_v26 }
  0x90   :  { %7237 = vst [vmem:[#allocation100_spill] sm:$0xff] %v5077_v47 }
  0x91   :  { %1499 = vmatpush1.bf16.msra.mxu0 %v5044_v3  ;;  %7235 = vst [vmem:[#allocation98_spill] sm:$0xff] %v5071_v48  ;;  %7236 = vst [vmem:[#allocation99_spill] sm:$0xff] %v5073_v57  ;;  %v635_v3 = vld [vmem:[#allocation7 + $0x30] sm:$0xff] }
  0x92   :  { %1540 = vmatpush1.bf16.msra.mxu1 %v5046_v56  ;;  %1500 = vmatprep.subr.bf16.mxu0 %v5053_v49  ;;  %v636_v56 = vld [vmem:[#allocation7 + $0x38] sm:$0xff]  ;;  %7238 = vst [vmem:[#allocation101_spill] sm:$0xff] %v5079_v58  ;;  %v5083_v1 = vcombine.high %v631_v16, %v635_v3  ;;  %v755_v49 = vld [vmem:[#allocation7 + $0x3f0] sm:$0xff]  ;;  %v5089_v6 = vcombine.low %v631_v16, %v635_v3 }
  0x93   :  { %1541 = vmatprep.subr.bf16.mxu1 %v5055_v4  ;;  %3376 = vperm.xlu1 %4175, %v3338_v17   ;;  %v5085_v42 = vcombine.high %v632_v32, %v636_v56  ;;  %v751_v4 = vld [vmem:[#allocation7 + $0x3d0] sm:$0xff]  ;;  %v756_v17 = vld [vmem:[#allocation7 + $0x3f8] sm:$0xff]  ;;  %v5091_v2 = vcombine.low %v632_v32, %v636_v56 }
  0x94   :  { %7239 = vst [vmem:[#allocation102_spill] sm:$0xff] %v5083_v1  ;;  %7241 = vst [vmem:[#allocation104_spill] sm:$0xff] %v5089_v6  ;;  %v5095_v26 = vcombine.high %v751_v4, %v755_v49  ;;  %v5097_v31 = vcombine.high %v752_v33, %v756_v17  ;;  %v5101_v3 = vcombine.low %v751_v4, %v755_v49 }
  0x95   :  { %1501 = vmatpush1.bf16.msra.mxu0 %v5062_v5  ;;  %7240 = vst [vmem:[#allocation103_spill] sm:$0xff] %v5085_v42  ;;  %7242 = vst [vmem:[#allocation105_spill] sm:$0xff] %v5091_v2  ;;  %v748_v5 = vld [vmem:[#allocation7 + $0x3b8] sm:$0xff]  ;;  %v5103_v32 = vcombine.low %v752_v33, %v756_v17 }
  0x96   :  { %1542 = vmatpush1.bf16.msra.mxu1 %v5064_v15  ;;  %1502 = vmatprep.subr.bf16.mxu0 %v5071_v48  ;;  %7243 = vst [vmem:[#allocation106_spill] sm:$0xff] %v5095_v26  ;;  %7244 = vst [vmem:[#allocation107_spill] sm:$0xff] %v5097_v31  ;;  %v747_v48 = vld [vmem:[#allocation7 + $0x3b0] sm:$0xff]  ;;  %v744_v15 = vld [vmem:[#allocation7 + $0x398] sm:$0xff] }
  0x97   :  { %1543 = vmatprep.subr.bf16.mxu1 %v5073_v57  ;;  %v743_v57 = vld [vmem:[#allocation7 + $0x390] sm:$0xff]  ;;  %7245 = vst [vmem:[#allocation108_spill] sm:$0xff] %v5101_v3  ;;  %7246 = vst [vmem:[#allocation109_spill] sm:$0xff] %v5103_v32  ;;  %v5109_v16 = vcombine.high %v744_v15, %v748_v5  ;;  %v5115_v33 = vcombine.low %v744_v15, %v748_v5 }
  0x98   :  { %v5107_v56 = vcombine.high %v743_v57, %v747_v48  ;;  %v5113_v4 = vcombine.low %v743_v57, %v747_v48 }
  0x99   :  { %1503 = vmatpush1.bf16.msra.mxu0 %v5077_v47  ;;  %7248 = vst [vmem:[#allocation111_spill] sm:$0xff] %v5109_v16  ;;  %v740_v47 = vld [vmem:[#allocation7 + $0x378] sm:$0xff]  ;;  %7250 = vst [vmem:[#allocation113_spill] sm:$0xff] %v5115_v33 }
  0x9a   :  { %1544 = vmatpush1.bf16.msra.mxu1 %v5079_v58  ;;  %1504 = vmatprep.subr.bf16.mxu0 %v5083_v1  ;;  %7247 = vst [vmem:[#allocation110_spill] sm:$0xff] %v5107_v56  ;;  %v739_v1 = vld [vmem:[#allocation7 + $0x370] sm:$0xff]  ;;  %v736_v58 = vld [vmem:[#allocation7 + $0x358] sm:$0xff]  ;;  %7249 = vst [vmem:[#allocation112_spill] sm:$0xff] %v5113_v4 }
  0x9b   :  { %1545 = vmatprep.subr.bf16.mxu1 %v5085_v42  ;;  %v735_v42 = vld [vmem:[#allocation7 + $0x350] sm:$0xff]  ;;  %v5121_v17 = vcombine.high %v736_v58, %v740_v47  ;;  %v5127_v5 = vcombine.low %v736_v58, %v740_v47 }
  0x9c   :  { %v5119_v49 = vcombine.high %v735_v42, %v739_v1  ;;  %v5125_v48 = vcombine.low %v735_v42, %v739_v1 }
  0x9d   :  { %1505 = vmatpush1.bf16.msra.mxu0 %v5089_v6  ;;  %7252 = vst [vmem:[#allocation115_spill] sm:$0xff] %v5121_v17  ;;  %v732_v6 = vld [vmem:[#allocation7 + $0x338] sm:$0xff]  ;;  %7254 = vst [vmem:[#allocation117_spill] sm:$0xff] %v5127_v5 }
  0x9e   :  { %1546 = vmatpush1.bf16.msra.mxu1 %v5091_v2  ;;  %1506 = vmatprep.subr.bf16.mxu0 %v5095_v26  ;;  %7251 = vst [vmem:[#allocation114_spill] sm:$0xff] %v5119_v49  ;;  %v731_v26 = vld [vmem:[#allocation7 + $0x330] sm:$0xff]  ;;  %v728_v2 = vld [vmem:[#allocation7 + $0x318] sm:$0xff]  ;;  %7253 = vst [vmem:[#allocation116_spill] sm:$0xff] %v5125_v48 }
  0x9f   :  { %1547 = vmatprep.subr.bf16.mxu1 %v5097_v31  ;;  %v727_v31 = vld [vmem:[#allocation7 + $0x310] sm:$0xff]  ;;  %v5133_v57 = vcombine.high %v728_v2, %v732_v6  ;;  %v5139_v47 = vcombine.low %v728_v2, %v732_v6 }
  0xa0   :  { %v5131_v15 = vcombine.high %v727_v31, %v731_v26  ;;  %v5137_v1 = vcombine.low %v727_v31, %v731_v26 }
  0xa1   :  { %1507 = vmatpush2.bf16.msra.mxu0 %v5101_v3  ;;  %7256 = vst [vmem:[#allocation119_spill] sm:$0xff] %v5133_v57  ;;  %v724_v3 = vld [vmem:[#allocation7 + $0x2f8] sm:$0xff]  ;;  %7258 = vst [vmem:[#allocation121_spill] sm:$0xff] %v5139_v47 }
  0xa2   :  { %1548 = vmatpush2.bf16.msra.mxu1 %v5103_v32  ;;  %1508 = vmatprep.subr.bf16.mxu0 %v5107_v56  ;;  %7255 = vst [vmem:[#allocation118_spill] sm:$0xff] %v5131_v15  ;;  %v723_v56 = vld [vmem:[#allocation7 + $0x2f0] sm:$0xff]  ;;  %v720_v32 = vld [vmem:[#allocation7 + $0x2d8] sm:$0xff]  ;;  %7257 = vst [vmem:[#allocation120_spill] sm:$0xff] %v5137_v1 }
  0xa3   :  { %1549 = vmatprep.subr.bf16.mxu1 %v5109_v16  ;;  %v719_v16 = vld [vmem:[#allocation7 + $0x2d0] sm:$0xff]  ;;  %v5145_v42 = vcombine.high %v720_v32, %v724_v3  ;;  %v5151_v6 = vcombine.low %v720_v32, %v724_v3 }
  0xa4   :  { %v5143_v58 = vcombine.high %v719_v16, %v723_v56  ;;  %v5149_v26 = vcombine.low %v719_v16, %v723_v56 }
  0xa5   :  { %1509 = vmatpush2.bf16.msra.mxu0 %v5113_v4  ;;  %7260 = vst [vmem:[#allocation123_spill] sm:$0xff] %v5145_v42  ;;  %v716_v4 = vld [vmem:[#allocation7 + $0x2b8] sm:$0xff]  ;;  %7262 = vst [vmem:[#allocation125_spill] sm:$0xff] %v5151_v6 }
  0xa6   :  { %1550 = vmatpush2.bf16.msra.mxu1 %v5115_v33  ;;  %1510 = vmatprep.subr.bf16.mxu0 %v5119_v49  ;;  %7259 = vst [vmem:[#allocation122_spill] sm:$0xff] %v5143_v58  ;;  %v715_v49 = vld [vmem:[#allocation7 + $0x2b0] sm:$0xff]  ;;  %v712_v33 = vld [vmem:[#allocation7 + $0x298] sm:$0xff]  ;;  %7261 = vst [vmem:[#allocation124_spill] sm:$0xff] %v5149_v26 }
  0xa7   :  { %1551 = vmatprep.subr.bf16.mxu1 %v5121_v17  ;;  %v711_v17 = vld [vmem:[#allocation7 + $0x290] sm:$0xff]  ;;  %v5157_v31 = vcombine.high %v712_v33, %v716_v4  ;;  %v5163_v3 = vcombine.low %v712_v33, %v716_v4 }
  0xa8   :  { %v5155_v2 = vcombine.high %v711_v17, %v715_v49  ;;  %v5161_v56 = vcombine.low %v711_v17, %v715_v49 }
  0xa9   :  { %1511 = vmatpush2.bf16.msra.mxu0 %v5125_v48  ;;  %7264 = vst [vmem:[#allocation127_spill] sm:$0xff] %v5157_v31  ;;  %v708_v48 = vld [vmem:[#allocation7 + $0x278] sm:$0xff]  ;;  %7266 = vst [vmem:[#allocation129_spill] sm:$0xff] %v5163_v3 }
  0xaa   :  { %1552 = vmatpush2.bf16.msra.mxu1 %v5127_v5  ;;  %1512 = vmatprep.subr.bf16.mxu0 %v5131_v15  ;;  %7263 = vst [vmem:[#allocation126_spill] sm:$0xff] %v5155_v2  ;;  %v707_v15 = vld [vmem:[#allocation7 + $0x270] sm:$0xff]  ;;  %v704_v5 = vld [vmem:[#allocation7 + $0x258] sm:$0xff]  ;;  %7265 = vst [vmem:[#allocation128_spill] sm:$0xff] %v5161_v56 }
  0xab   :  { %1553 = vmatprep.subr.bf16.mxu1 %v5133_v57  ;;  %v703_v57 = vld [vmem:[#allocation7 + $0x250] sm:$0xff]  ;;  %v5169_v16 = vcombine.high %v704_v5, %v708_v48  ;;  %v5175_v4 = vcombine.low %v704_v5, %v708_v48 }
  0xac   :  { %v5167_v32 = vcombine.high %v703_v57, %v707_v15  ;;  %v5173_v49 = vcombine.low %v703_v57, %v707_v15  ;;  %v5238_v57 = vld [vmem:[%s6853_s4] sm:$0xff] }
  0xad   :  { %1513 = vmatpush2.bf16.msra.mxu0 %v5137_v1  ;;  %7268 = vst [vmem:[#allocation131_spill] sm:$0xff] %v5169_v16  ;;  %v700_v1 = vld [vmem:[#allocation7 + $0x238] sm:$0xff]  ;;  %7270 = vst [vmem:[#allocation133_spill] sm:$0xff] %v5175_v4 }
  0xae   :  { %1554 = vmatpush2.bf16.msra.mxu1 %v5139_v47  ;;  %1514 = vmatprep.subr.bf16.mxu0 %v5143_v58  ;;  %7267 = vst [vmem:[#allocation130_spill] sm:$0xff] %v5167_v32  ;;  %v699_v58 = vld [vmem:[#allocation7 + $0x230] sm:$0xff]  ;;  %v696_v47 = vld [vmem:[#allocation7 + $0x218] sm:$0xff]  ;;  %7269 = vst [vmem:[#allocation132_spill] sm:$0xff] %v5173_v49 }
  0xaf   :  { %1555 = vmatprep.subr.bf16.mxu1 %v5145_v42  ;;  %v695_v42 = vld [vmem:[#allocation7 + $0x210] sm:$0xff]  ;;  %v5181_v17 = vcombine.high %v696_v47, %v700_v1 }
  0xb0   :  { %v5179_v33 = vcombine.high %v695_v42, %v699_v58 }
  0xb1   :  { %1515 = vmatpush2.bf16.msra.mxu0 %v5149_v26  ;;  %7272 = vst [vmem:[#allocation135_spill] sm:$0xff] %v5181_v17 }
  0xb2   :  { %1556 = vmatpush2.bf16.msra.mxu1 %v5151_v6  ;;  %1516 = vmatprep.subr.bf16.mxu0 %v5155_v2  ;;  %7271 = vst [vmem:[#allocation134_spill] sm:$0xff] %v5179_v33 }
  0xb3   :  { %1557 = vmatprep.subr.bf16.mxu1 %v5157_v31  ;;  %v5185_v31 = vcombine.low %v695_v42, %v699_v58 }
  0xb5   :  { %1517 = vmatpush2.bf16.msra.mxu0 %v5161_v56  ;;  %7273 = vst [vmem:[#allocation136_spill] sm:$0xff] %v5185_v31  ;;  %v5187_v56 = vcombine.low %v696_v47, %v700_v1 }
  0xb6   :  { %1558 = vmatpush2.bf16.msra.mxu1 %v5163_v3  ;;  %1518 = vmatprep.subr.bf16.mxu0 %v5167_v32 }
  0xb7   :  { %1559 = vmatprep.subr.bf16.mxu1 %v5169_v16  ;;  %7274 = vst [vmem:[#allocation137_spill] sm:$0xff] %v5187_v56 }
  0xb9   :  { %1519 = vmatpush2.bf16.msra.mxu0 %v5173_v49 }
  0xba   :  { %1560 = vmatpush2.bf16.msra.mxu1 %v5175_v4  ;;  %1520 = vmatprep.subr.bf16.mxu0 %v5179_v33 }
  0xbb   :  { %1561 = vmatprep.subr.bf16.mxu1 %v5181_v17 }
  0xbd   :  { %1521 = vmatpush2.bf16.msra.mxu0 %v5185_v31 }
  0xbe   :  { %1562 = vmatpush2.bf16.msra.mxu1 %v5187_v56  ;;  %1649 = vmatprep.subr.bf16.mxu0 %v4732_v62 }
  0xbf   :  { %1690 = vmatprep.subr.bf16.mxu1 %v4734_v63 }
  0xc0   :  { %1523 = vmatmul.mubr.bf16.vlgmr.msra.gmra.mxu0 %v7216_v55 }
  0xc1   :  { %1564 = vmatmul.mubr.bf16.vlgmr.msra.gmra.mxu1 %v7216_v55  ;;  %1650 = vmatpush1.bf16.msra.mxu0 %v4772_v11  ;;  %v95_v55 = vlaneseq }
  0xc2   :  { %1691 = vmatpush1.bf16.msra.mxu1 %v4774_v12  ;;  %1651 = vmatprep.subr.bf16.mxu0 %v4776_v13 }
  0xc3   :  { %1692 = vmatprep.subr.bf16.mxu1 %v4778_v14  ;;  %v5225_v48 = vshrl.u32 %v95_v55, 7 }
  0xc5   :  { %1652 = vmatpush1.bf16.msra.mxu0 %v4786_v19  ;;  %7275 = vst [vmem:[#allocation138_spill] sm:$0xff] %v5225_v48  ;;  %v5232_v5 = vsub.s32 0, %v5225_v48  ;;  %v105_v15 = vsub.s32 2, %v5225_v48  ;;  %v5245_v58 = vsub.s32 1, %v5225_v48  ;;  %v109_v42 = vsub.s32 3, %v5225_v48 }
  0xc6   :  { %1693 = vmatpush1.bf16.msra.mxu1 %v4788_v20  ;;  %1653 = vmatprep.subr.bf16.mxu0 %v4792_v21 }
  0xc7   :  { %1694 = vmatprep.subr.bf16.mxu1 %v4794_v22  ;;  %7276 = vst [vmem:[#allocation139_spill] sm:$0xff] %v5232_v5  ;;  %7277 = vst [vmem:[#allocation140_spill] sm:$0xff] %v5245_v58 }
  0xc9   :  { %1654 = vmatpush1.bf16.msra.mxu0 %v4800_v27 }
  0xca   :  { %1695 = vmatpush1.bf16.msra.mxu1 %v4802_v28  ;;  %1655 = vmatprep.subr.bf16.mxu0 %v4806_v29 }
  0xcb   :  { %1696 = vmatprep.subr.bf16.mxu1 %v4808_v30 }
  0xcd   :  { %1656 = vmatpush1.bf16.msra.mxu0 %v4816_v35 }
  0xce   :  { %1697 = vmatpush1.bf16.msra.mxu1 %v4818_v36  ;;  %1657 = vmatprep.subr.bf16.mxu0 %v4822_v37 }
  0xcf   :  { %1698 = vmatprep.subr.bf16.mxu1 %v4824_v38 }
  0xd1   :  { %1658 = vmatpush1.bf16.msra.mxu0 %v4830_v43 }
  0xd2   :  { %1699 = vmatpush1.bf16.msra.mxu1 %v4832_v44  ;;  %1659 = vmatprep.subr.bf16.mxu0 %v4836_v45 }
  0xd3   :  { %1700 = vmatprep.subr.bf16.mxu1 %v4838_v46 }
  0xd5   :  { %1660 = vmatpush1.bf16.msra.mxu0 %v4846_v51 }
  0xd6   :  { %1701 = vmatpush1.bf16.msra.mxu1 %v4848_v52  ;;  %1661 = vmatprep.subr.bf16.mxu0 %v4852_v53 }
  0xd7   :  { %1702 = vmatprep.subr.bf16.mxu1 %v4854_v54 }
  0xd9   :  { %1662 = vmatpush1.bf16.msra.mxu0 %v4860_v59 }
  0xda   :  { %1703 = vmatpush1.bf16.msra.mxu1 %v4862_v60  ;;  %1663 = vmatprep.subr.bf16.mxu0 %v4866_v61 }
  0xdb   :  { %1704 = vmatprep.subr.bf16.mxu1 %v4868_v0  ;;  %v5268_v0 = vrot.slane %v5238_v57, %v109_v42 }
  0xdd   :  { %1664 = vmatpush1.bf16.msra.mxu0 %v4876_v7 }
  0xde   :  { %1705 = vmatpush1.bf16.msra.mxu1 %v4878_v8  ;;  %1665 = vmatprep.subr.bf16.mxu0 %v4882_v9  ;;  %v5258_v9 = vrot.slane %v5238_v57, %v5232_v5  ;;  %v5261_v8 = vrot.slane %v5238_v57, %v105_v15 }
  0xdf   :  { %1706 = vmatprep.subr.bf16.mxu1 %v4884_v10 }
  0xe0   :  { %v5240_v1 = vpop.f32.mrf.mxu0 }
  0xe1   :  { %v5242_v47 = vpop.f32.mrf.mxu1  ;;  %1666 = vmatpush2.bf16.msra.mxu0 %v4890_v18  ;;  %v5265_v18 = vrot.slane %v5238_v57, %v5245_v58 }
  0xe2   :  { %1707 = vmatpush2.bf16.msra.mxu1 %v4892_v23  ;;  %v5250_v55 = vpop.f32.mrf.mxu0  ;;  %1667 = vmatprep.subr.bf16.mxu0 %v4896_v24 }
  0xe3   :  { %v5252_v10 = vpop.f32.mrf.mxu1  ;;  %1708 = vmatprep.subr.bf16.mxu1 %v4898_v25 }
  0xe4   :  { %v311_v23 = vpop.f32.mrf.mxu0 }
  0xe5   :  { %v384_v7 = vpop.f32.mrf.mxu1  ;;  %v5271_v24 = vadd.f32 %v311_v23, %v5258_v9  ;;  %1668 = vmatpush2.bf16.msra.mxu0 %v4902_v34  ;;  %v7285_v34 = vld [vmem:[#allocation54_spill] sm:$0xff] }
  0xe6   :  { %v5274_v25 = vadd.f32 %v384_v7, %v5261_v8  ;;  %1709 = vmatpush2.bf16.msra.mxu1 %v4904_v39  ;;  %v313_v15 = vpop.f32.mrf.mxu0  ;;  %1669 = vmatprep.subr.bf16.mxu0 %v4908_v40  ;;  %v7284_v39 = vld [vmem:[#allocation53_spill] sm:$0xff] }
  0xe7   :  { %7278 = vst [vmem:[#allocation141_spill] sm:$0xff] %v5271_v24  ;;  %v386_v5 = vpop.f32.mrf.mxu1  ;;  %1710 = vmatprep.subr.bf16.mxu1 %v4910_v41  ;;  %v5281_v58 = vadd.f32 %v313_v15, %v5265_v18  ;;  %v7286_v15 = vld [vmem:[#allocation55_spill] sm:$0xff] }
  0xe8   :  { %7279 = vst [vmem:[#allocation142_spill] sm:$0xff] %v5274_v25  ;;  %v5284_v42 = vadd.f32 %v386_v5, %v5268_v0  ;;  %v317_v23 = vpop.f32.mrf.mxu0 }
  0xe9   :  { %7280 = vst [vmem:[#allocation143_spill] sm:$0xff] %v5281_v58  ;;  %v390_v24 = vpop.f32.mrf.mxu1  ;;  %v5287_v7 = vadd.f32 %v317_v23, %v5258_v9  ;;  %1670 = vmatpush2.bf16.msra.mxu0 %v4914_v50  ;;  %v7291_v58 = vld [vmem:[#allocation56_spill] sm:$0xff]  ;;  %v7293_v50 = vld [vmem:[#allocation58_spill] sm:$0xff] }
  0xea   :  { %7281 = vst [vmem:[#allocation144_spill] sm:$0xff] %v5284_v42  ;;  %v5290_v25 = vadd.f32 %v390_v24, %v5261_v8  ;;  %1711 = vmatpush2.bf16.msra.mxu1 %v7284_v39  ;;  %v319_v40 = vpop.f32.mrf.mxu0  ;;  %1671 = vmatprep.subr.bf16.mxu0 %v7285_v34  ;;  %v7292_v39 = vld [vmem:[#allocation57_spill] sm:$0xff] }
  0xeb   :  { %7282 = vst [vmem:[#allocation145_spill] sm:$0xff] %v5287_v7  ;;  %v392_v41 = vpop.f32.mrf.mxu1  ;;  %1712 = vmatprep.subr.bf16.mxu1 %v7286_v15  ;;  %v5297_v5 = vadd.f32 %v319_v40, %v5265_v18  ;;  %v7294_v40 = vld [vmem:[#allocation59_spill] sm:$0xff] }
  0xec   :  { %7283 = vst [vmem:[#allocation146_spill] sm:$0xff] %v5290_v25  ;;  %v5300_v42 = vadd.f32 %v392_v41, %v5268_v0  ;;  %v321_v23 = vpop.f32.mrf.mxu0 }
  0xed   :  { %7287 = vst [vmem:[#allocation147_spill] sm:$0xff] %v5297_v5  ;;  %v394_v7 = vpop.f32.mrf.mxu1  ;;  %v5303_v24 = vadd.f32 %v321_v23, %v5258_v9  ;;  %1672 = vmatpush2.bf16.msra.mxu0 %v7291_v58  ;;  %v7299_v5 = vld [vmem:[#allocation60_spill] sm:$0xff]  ;;  %v7301_v58 = vld [vmem:[#allocation62_spill] sm:$0xff] }
  0xee   :  { %7288 = vst [vmem:[#allocation148_spill] sm:$0xff] %v5300_v42  ;;  %v5306_v25 = vadd.f32 %v394_v7, %v5261_v8  ;;  %1713 = vmatpush2.bf16.msra.mxu1 %v7292_v39  ;;  %v323_v34 = vpop.f32.mrf.mxu0  ;;  %1673 = vmatprep.subr.bf16.mxu0 %v7293_v50  ;;  %v7300_v39 = vld [vmem:[#allocation61_spill] sm:$0xff] }
  0xef   :  { %7289 = vst [vmem:[#allocation149_spill] sm:$0xff] %v5303_v24  ;;  %v396_v15 = vpop.f32.mrf.mxu1  ;;  %1714 = vmatprep.subr.bf16.mxu1 %v7294_v40  ;;  %v5313_v41 = vadd.f32 %v323_v34, %v5265_v18  ;;  %v7302_v34 = vld [vmem:[#allocation63_spill] sm:$0xff] }
  0xf0   :  { %7290 = vst [vmem:[#allocation150_spill] sm:$0xff] %v5306_v25  ;;  %v5316_v42 = vadd.f32 %v396_v15, %v5268_v0  ;;  %v327_v23 = vpop.f32.mrf.mxu0 }
  0xf1   :  { %7295 = vst [vmem:[#allocation151_spill] sm:$0xff] %v5313_v41  ;;  %v400_v24 = vpop.f32.mrf.mxu1  ;;  %v5319_v7 = vadd.f32 %v327_v23, %v5258_v9  ;;  %1674 = vmatpush2.bf16.msra.mxu0 %v7299_v5  ;;  %v7307_v41 = vld [vmem:[#allocation64_spill] sm:$0xff]  ;;  %v7309_v5 = vld [vmem:[#allocation66_spill] sm:$0xff] }
  0xf2   :  { %7296 = vst [vmem:[#allocation152_spill] sm:$0xff] %v5316_v42  ;;  %v5322_v25 = vadd.f32 %v400_v24, %v5261_v8  ;;  %1715 = vmatpush2.bf16.msra.mxu1 %v7300_v39  ;;  %v329_v50 = vpop.f32.mrf.mxu0  ;;  %1675 = vmatprep.subr.bf16.mxu0 %v7301_v58  ;;  %v7308_v39 = vld [vmem:[#allocation65_spill] sm:$0xff] }
  0xf3   :  { %7297 = vst [vmem:[#allocation153_spill] sm:$0xff] %v5319_v7  ;;  %v402_v40 = vpop.f32.mrf.mxu1  ;;  %1716 = vmatprep.subr.bf16.mxu1 %v7302_v34  ;;  %v5329_v15 = vadd.f32 %v329_v50, %v5265_v18  ;;  %v7310_v50 = vld [vmem:[#allocation67_spill] sm:$0xff] }
  0xf4   :  { %7298 = vst [vmem:[#allocation154_spill] sm:$0xff] %v5322_v25  ;;  %v5332_v42 = vadd.f32 %v402_v40, %v5268_v0  ;;  %v331_v23 = vpop.f32.mrf.mxu0 }
  0xf5   :  { %7303 = vst [vmem:[#allocation155_spill] sm:$0xff] %v5329_v15  ;;  %v404_v7 = vpop.f32.mrf.mxu1  ;;  %v5335_v24 = vadd.f32 %v331_v23, %v5258_v9  ;;  %1676 = vmatpush2.bf16.msra.mxu0 %v7307_v41  ;;  %v7315_v15 = vld [vmem:[#allocation68_spill] sm:$0xff]  ;;  %v7317_v41 = vld [vmem:[#allocation70_spill] sm:$0xff] }
  0xf6   :  { %7304 = vst [vmem:[#allocation156_spill] sm:$0xff] %v5332_v42  ;;  %v5338_v25 = vadd.f32 %v404_v7, %v5261_v8  ;;  %1717 = vmatpush2.bf16.msra.mxu1 %v7308_v39  ;;  %v333_v58 = vpop.f32.mrf.mxu0  ;;  %1677 = vmatprep.subr.bf16.mxu0 %v7309_v5  ;;  %v7316_v39 = vld [vmem:[#allocation69_spill] sm:$0xff] }
  0xf7   :  { %7305 = vst [vmem:[#allocation157_spill] sm:$0xff] %v5335_v24  ;;  %v406_v34 = vpop.f32.mrf.mxu1  ;;  %1718 = vmatprep.subr.bf16.mxu1 %v7310_v50  ;;  %v5345_v40 = vadd.f32 %v333_v58, %v5265_v18  ;;  %v7318_v58 = vld [vmem:[#allocation71_spill] sm:$0xff] }
  0xf8   :  { %7306 = vst [vmem:[#allocation158_spill] sm:$0xff] %v5338_v25  ;;  %v5348_v42 = vadd.f32 %v406_v34, %v5268_v0  ;;  %v337_v23 = vpop.f32.mrf.mxu0 }
  0xf9   :  { %7311 = vst [vmem:[#allocation159_spill] sm:$0xff] %v5345_v40  ;;  %v410_v24 = vpop.f32.mrf.mxu1  ;;  %v5351_v7 = vadd.f32 %v337_v23, %v5258_v9  ;;  %1678 = vmatpush2.bf16.msra.mxu0 %v7315_v15  ;;  %v7323_v40 = vld [vmem:[#allocation72_spill] sm:$0xff]  ;;  %v7325_v15 = vld [vmem:[#allocation74_spill] sm:$0xff] }
  0xfa   :  { %7312 = vst [vmem:[#allocation160_spill] sm:$0xff] %v5348_v42  ;;  %v5354_v25 = vadd.f32 %v410_v24, %v5261_v8  ;;  %1719 = vmatpush2.bf16.msra.mxu1 %v7316_v39  ;;  %v339_v5 = vpop.f32.mrf.mxu0  ;;  %1679 = vmatprep.subr.bf16.mxu0 %v7317_v41  ;;  %v7324_v39 = vld [vmem:[#allocation73_spill] sm:$0xff] }
  0xfb   :  { %7313 = vst [vmem:[#allocation161_spill] sm:$0xff] %v5351_v7  ;;  %v412_v50 = vpop.f32.mrf.mxu1  ;;  %1720 = vmatprep.subr.bf16.mxu1 %v7318_v58  ;;  %v5361_v34 = vadd.f32 %v339_v5, %v5265_v18  ;;  %v7326_v5 = vld [vmem:[#allocation75_spill] sm:$0xff] }
  0xfc   :  { %7314 = vst [vmem:[#allocation162_spill] sm:$0xff] %v5354_v25  ;;  %v5364_v42 = vadd.f32 %v412_v50, %v5268_v0  ;;  %v341_v23 = vpop.f32.mrf.mxu0 }
  0xfd   :  { %7319 = vst [vmem:[#allocation163_spill] sm:$0xff] %v5361_v34  ;;  %v414_v7 = vpop.f32.mrf.mxu1  ;;  %v5367_v24 = vadd.f32 %v341_v23, %v5258_v9  ;;  %1680 = vmatpush2.bf16.msra.mxu0 %v7323_v40  ;;  %v113_v23 = vsub.s32 4, %v5225_v48  ;;  %v117_v34 = vsub.s32 5, %v5225_v48 }
  0xfe   :  { %7320 = vst [vmem:[#allocation164_spill] sm:$0xff] %v5364_v42  ;;  %v5370_v25 = vadd.f32 %v414_v7, %v5261_v8  ;;  %1721 = vmatpush2.bf16.msra.mxu1 %v7324_v39  ;;  %v343_v41 = vpop.f32.mrf.mxu0  ;;  %1731 = vmatprep.subr.bf16.mxu0 %v7325_v15  ;;  %v121_v7 = vsub.s32 6, %v5225_v48  ;;  %v125_v15 = vsub.s32 7, %v5225_v48 }
  0xff   :  { %7321 = vst [vmem:[#allocation165_spill] sm:$0xff] %v5367_v24  ;;  %v416_v58 = vpop.f32.mrf.mxu1  ;;  %1772 = vmatprep.subr.bf16.mxu1 %v7326_v5  ;;  %v5377_v50 = vadd.f32 %v343_v41, %v5265_v18  ;;  %v5395_v41 = vrot.slane %v5238_v57, %v113_v23  ;;  %v5401_v40 = vrot.slane %v5238_v57, %v117_v34 }
 0x100   :  { %7322 = vst [vmem:[#allocation166_spill] sm:$0xff] %v5370_v25  ;;  %v5380_v42 = vadd.f32 %v416_v58, %v5268_v0  ;;  %v5384_v25 = vpop.f32.mrf.mxu0  ;;  %v5398_v58 = vrot.slane %v5238_v57, %v121_v7  ;;  %v5404_v61 = vrot.slane %v5238_v57, %v125_v15 }
 0x101   :  { %7327 = vst [vmem:[#allocation167_spill] sm:$0xff] %v5377_v50  ;;  %v5386_v24 = vpop.f32.mrf.mxu1 }
 0x102   :  { %7328 = vst [vmem:[#allocation168_spill] sm:$0xff] %v5380_v42  ;;  %v5390_v39 = vpop.f32.mrf.mxu0 }
 0x103   :  { %v5392_v5 = vpop.f32.mrf.mxu1 }
 0x104   :  { %v457_v42 = vpop.f32.mrf.mxu0 }
 0x105   :  { %v530_v50 = vpop.f32.mrf.mxu1  ;;  %v5407_v48 = vadd.f32 %v457_v42, %v5395_v41 }
 0x106   :  { %v5410_v60 = vadd.f32 %v530_v50, %v5398_v58  ;;  %v459_v59 = vpop.f32.mrf.mxu0 }
 0x107   :  { %7329 = vst [vmem:[#allocation169_spill] sm:$0xff] %v5407_v48  ;;  %v532_v23 = vpop.f32.mrf.mxu1  ;;  %v5413_v54 = vadd.f32 %v459_v59, %v5401_v40 }
 0x108   :  { %7330 = vst [vmem:[#allocation170_spill] sm:$0xff] %v5410_v60  ;;  %v5416_v7 = vadd.f32 %v532_v23, %v5404_v61  ;;  %v463_v53 = vpop.f32.mrf.mxu0 }
 0x109   :  { %7331 = vst [vmem:[#allocation171_spill] sm:$0xff] %v5413_v54  ;;  %v536_v34 = vpop.f32.mrf.mxu1  ;;  %v5419_v52 = vadd.f32 %v463_v53, %v5395_v41 }
 0x10a   :  { %7332 = vst [vmem:[#allocation172_spill] sm:$0xff] %v5416_v7  ;;  %v5422_v57 = vadd.f32 %v536_v34, %v5398_v58  ;;  %v465_v42 = vpop.f32.mrf.mxu0 }
 0x10b   :  { %7333 = vst [vmem:[#allocation173_spill] sm:$0xff] %v5419_v52  ;;  %v538_v15 = vpop.f32.mrf.mxu1  ;;  %v5425_v50 = vadd.f32 %v465_v42, %v5401_v40 }
 0x10c   :  { %7334 = vst [vmem:[#allocation174_spill] sm:$0xff] %v5422_v57  ;;  %v5428_v60 = vadd.f32 %v538_v15, %v5404_v61  ;;  %v467_v59 = vpop.f32.mrf.mxu0 }
 0x10d   :  { %7335 = vst [vmem:[#allocation175_spill] sm:$0xff] %v5425_v50  ;;  %v540_v54 = vpop.f32.mrf.mxu1  ;;  %v5431_v23 = vadd.f32 %v467_v59, %v5395_v41 }
 0x10e   :  { %7336 = vst [vmem:[#allocation176_spill] sm:$0xff] %v5428_v60  ;;  %v5434_v7 = vadd.f32 %v540_v54, %v5398_v58  ;;  %v469_v53 = vpop.f32.mrf.mxu0 }
 0x10f   :  { %7337 = vst [vmem:[#allocation177_spill] sm:$0xff] %v5431_v23  ;;  %v542_v52 = vpop.f32.mrf.mxu1  ;;  %v5437_v34 = vadd.f32 %v469_v53, %v5401_v40 }
 0x110   :  { %7338 = vst [vmem:[#allocation178_spill] sm:$0xff] %v5434_v7  ;;  %v5440_v57 = vadd.f32 %v542_v52, %v5404_v61  ;;  %v473_v42 = vpop.f32.mrf.mxu0 }
 0x111   :  { %7339 = vst [vmem:[#allocation179_spill] sm:$0xff] %v5437_v34  ;;  %v546_v50 = vpop.f32.mrf.mxu1  ;;  %v5443_v15 = vadd.f32 %v473_v42, %v5395_v41 }
 0x112   :  { %7340 = vst [vmem:[#allocation180_spill] sm:$0xff] %v5440_v57  ;;  %v5446_v60 = vadd.f32 %v546_v50, %v5398_v58  ;;  %v475_v59 = vpop.f32.mrf.mxu0 }
 0x113   :  { %7341 = vst [vmem:[#allocation181_spill] sm:$0xff] %v5443_v15  ;;  %v548_v23 = vpop.f32.mrf.mxu1  ;;  %v5449_v54 = vadd.f32 %v475_v59, %v5401_v40 }
 0x114   :  { %7342 = vst [vmem:[#allocation182_spill] sm:$0xff] %v5446_v60  ;;  %v5452_v7 = vadd.f32 %v548_v23, %v5404_v61  ;;  %v477_v53 = vpop.f32.mrf.mxu0 }
 0x115   :  { %7343 = vst [vmem:[#allocation183_spill] sm:$0xff] %v5449_v54  ;;  %v550_v34 = vpop.f32.mrf.mxu1  ;;  %v5455_v52 = vadd.f32 %v477_v53, %v5395_v41 }
 0x116   :  { %7344 = vst [vmem:[#allocation184_spill] sm:$0xff] %v5452_v7  ;;  %v5458_v57 = vadd.f32 %v550_v34, %v5398_v58  ;;  %v479_v42 = vpop.f32.mrf.mxu0 }
 0x117   :  { %7345 = vst [vmem:[#allocation185_spill] sm:$0xff] %v5455_v52  ;;  %v552_v15 = vpop.f32.mrf.mxu1  ;;  %v5461_v50 = vadd.f32 %v479_v42, %v5401_v40 }
 0x118   :  { %7346 = vst [vmem:[#allocation186_spill] sm:$0xff] %v5458_v57  ;;  %v5464_v60 = vadd.f32 %v552_v15, %v5404_v61  ;;  %v483_v59 = vpop.f32.mrf.mxu0 }
 0x119   :  { %7347 = vst [vmem:[#allocation187_spill] sm:$0xff] %v5461_v50  ;;  %v556_v54 = vpop.f32.mrf.mxu1  ;;  %v5467_v23 = vadd.f32 %v483_v59, %v5395_v41 }
 0x11a   :  { %7348 = vst [vmem:[#allocation188_spill] sm:$0xff] %v5464_v60  ;;  %v5470_v7 = vadd.f32 %v556_v54, %v5398_v58  ;;  %v485_v53 = vpop.f32.mrf.mxu0 }
 0x11b   :  { %7349 = vst [vmem:[#allocation189_spill] sm:$0xff] %v5467_v23  ;;  %v558_v52 = vpop.f32.mrf.mxu1  ;;  %v5473_v34 = vadd.f32 %v485_v53, %v5401_v40 }
 0x11c   :  { %7350 = vst [vmem:[#allocation190_spill] sm:$0xff] %v5470_v7  ;;  %v5476_v57 = vadd.f32 %v558_v52, %v5404_v61  ;;  %v487_v42 = vpop.f32.mrf.mxu0 }
 0x11d   :  { %7351 = vst [vmem:[#allocation191_spill] sm:$0xff] %v5473_v34  ;;  %v560_v50 = vpop.f32.mrf.mxu1  ;;  %v5479_v15 = vadd.f32 %v487_v42, %v5395_v41 }
 0x11e   :  { %7352 = vst [vmem:[#allocation192_spill] sm:$0xff] %v5476_v57  ;;  %v5482_v60 = vadd.f32 %v560_v50, %v5398_v58  ;;  %v489_v59 = vpop.f32.mrf.mxu0  ;;  %v308_v50 = vadd.f32 %v5240_v1, %v5258_v9  ;;  %v3332_v9 = vld [vmem:[%s6850_s1 + $0x8] sm:$0xff] }
 0x11f   :  { %7353 = vst [vmem:[#allocation193_spill] sm:$0xff] %v5479_v15  ;;  %v562_v23 = vpop.f32.mrf.mxu1  ;;  %v5485_v54 = vadd.f32 %v489_v59, %v5401_v40  ;;  %v310_v59 = vadd.f32 %v5250_v55, %v5265_v18  ;;  %3346 = vperm.xlu0 %4174, %v3332_v9  }
 0x120   :  { %7354 = vst [vmem:[#allocation194_spill] sm:$0xff] %v5482_v60  ;;  %v5488_v7 = vadd.f32 %v562_v23, %v5404_v61  ;;  %v381_v60 = vadd.f32 %v5242_v47, %v5261_v8 }
 0x121   :  { %7355 = vst [vmem:[#allocation195_spill] sm:$0xff] %v5485_v54 }
 0x122   :  { %7356 = vst [vmem:[#allocation196_spill] sm:$0xff] %v5488_v7  ;;  %v383_v7 = vadd.f32 %v5252_v10, %v5268_v0  ;;  %v3337_v0 = vld [vmem:[%s6850_s1 + $0x30] sm:$0xff] }
 0x140   :  { %v1442_v53 = vpop.f32.mrf.mxu0 }
 0x141   :  { %v1483_v34 = vpop.f32.mrf.mxu1  ;;  %v1572_v54 = vadd.f32 %v1442_v53, %v308_v50 }
 0x142   :  { %v1444_v52 = vpop.f32.mrf.mxu0  ;;  %v1574_v23 = vadd.f32 %v1483_v34, %v381_v60  ;;  %v3335_v60 = vld [vmem:[%s6850_s1 + $0x20] sm:$0xff]  ;;  %v527_v34 = vadd.f32 %v5386_v24, %v5398_v58 }
 0x143   :  { %v1485_v57 = vpop.f32.mrf.mxu1  ;;  %v1573_v15 = vadd.f32 %v1444_v52, %v310_v59  ;;  %v4112_v45 = vmul.f32 -1.442695, %v1572_v54  ;;  %3361 = vperm.xlu0 %4174, %v3335_v60  }
 0x144   :  { %v1446_v48 = vpop.f32.mrf.mxu0 }
 0x145   :  { %v1487_v51 = vpop.f32.mrf.mxu1  ;;  %v1575_v48 = vadd.f32 %v1485_v57, %v383_v7  ;;  %4184 = vpow2.f32 %v4112_v45  ;;  %v454_v57 = vadd.f32 %v5384_v25, %v5395_v41 }
 0x146   :  { %v1447_v46 = vpop.f32.mrf.mxu0  ;;  %v4114_v51 = vmul.f32 -1.442695, %v1574_v23 }
 0x147   :  { %v1488_v42 = vpop.f32.mrf.mxu1  ;;  %v4113_v46 = vmul.f32 -1.442695, %v1573_v15  ;;  %v4115_v1 = vmul.f32 -1.442695, %v1575_v48  ;;  %3371 = vperm.xlu0 %4174, %v3337_v0   ;;  %v456_v15 = vadd.f32 %v5390_v39, %v5401_v40 }
 0x148   :  { %4186 = vpow2.f32 %v4114_v51  ;;  %v529_v42 = vadd.f32 %v5392_v5, %v5404_v61 }
 0x149   :  { %4188 = vpow2.f32 %v4113_v46 }
 0x14a   :  { %4190 = vpow2.f32 %v4115_v1 }
 0x152   :  { %v4185_v8 = vpop.eup %4184 }
 0x153   :  { %v1586_v47 = vadd.f32 1.0, %v4185_v8 }
 0x155   :  { %v4187_v10 = vpop.eup %4186  ;;  %4192 = vrcp.f32 %v1586_v47 }
 0x156   :  { %v4189_v18 = vpop.eup %4188  ;;  %v1598_v55 = vadd.f32 1.0, %v4187_v10 }
 0x157   :  { %v4191_v45 = vpop.eup %4190  ;;  %v1587_v7 = vadd.f32 1.0, %v4189_v18 }
 0x158   :  { %v1599_v54 = vadd.f32 1.0, %v4191_v45  ;;  %4194 = vrcp.f32 %v1598_v55 }
 0x159   :  { %4196 = vrcp.f32 %v1587_v7 }
 0x162   :  { %v4193_v61 = vpop.eup %4192 }
 0x165   :  { %v4195_v5 = vpop.eup %4194 }
 0x166   :  { %v4197_v9 = vpop.eup %4196  ;;  %v1618_v0 = vmul.f32 0.0, %v4195_v5  ;;  %v7368_v5 = vld [vmem:[#allocation85_spill] sm:$0xff] }
 0x180   :  { %v1524_v53 = vpop.f32.mrf.mxu0 }
 0x181   :  { %v1565_v52 = vpop.f32.mrf.mxu1  ;;  %v1576_v50 = vadd.f32 %v1524_v53, %v454_v57 }
 0x182   :  { %v1578_v59 = vadd.f32 %v1565_v52, %v527_v34  ;;  %v1526_v23 = vpop.f32.mrf.mxu0 }
 0x183   :  { %v1567_v48 = vpop.f32.mrf.mxu1  ;;  %4198 = vtanh.f32 %v1576_v50  ;;  %v1577_v41 = vadd.f32 %v1526_v23, %v456_v15 }
 0x184   :  { %v4116_v25 = vmul.f32 -1.442695, %v1578_v59  ;;  %v1579_v24 = vadd.f32 %v1567_v48, %v529_v42  ;;  %4200 = vrcp.f32 %v1599_v54  ;;  %v1528_v58 = vpop.f32.mrf.mxu0 }
 0x185   :  { %v1569_v39 = vpop.f32.mrf.mxu1  ;;  %v7362_v58 = vld [vmem:[#allocation79_spill] sm:$0xff] }
 0x186   :  { %4202 = vpow2.f32 %v4116_v25  ;;  %v4117_v40 = vmul.f32 -1.442695, %v1579_v24  ;;  %v1529_v51 = vpop.f32.mrf.mxu0  ;;  %v7359_v25 = vld [vmem:[#allocation76_spill] sm:$0xff]  ;;  %v7361_v24 = vld [vmem:[#allocation78_spill] sm:$0xff] }
 0x187   :  { %4204 = vtanh.f32 %v1577_v41  ;;  %v1570_v46 = vpop.f32.mrf.mxu1  ;;  %v7360_v41 = vld [vmem:[#allocation77_spill] sm:$0xff]  ;;  %v7363_v39 = vld [vmem:[#allocation80_spill] sm:$0xff]  ;;  %v7365_v51 = vld [vmem:[#allocation82_spill] sm:$0xff] }
 0x188   :  { %4206 = vpow2.f32 %v4117_v40  ;;  %v7364_v40 = vld [vmem:[#allocation81_spill] sm:$0xff]  ;;  %v7366_v46 = vld [vmem:[#allocation83_spill] sm:$0xff] }
 0x190   :  { %v4199_v1 = vpop.eup %4198 }
 0x191   :  { %v4201_v60 = vpop.eup %4200  ;;  %v1620_v8 = vmul.f32 %v4199_v1, %v4193_v61  ;;  %v7367_v61 = vld [vmem:[#allocation84_spill] sm:$0xff]  ;;  %v7370_v1 = vld [vmem:[#allocation87_spill] sm:$0xff] }
 0x192   :  { %v1619_v7 = vmul.f32 0.0, %v4201_v60  ;;  %v7371_v60 = vld [vmem:[#allocation88_spill] sm:$0xff] }
 0x193   :  { %v4203_v10 = vpop.eup %4202  ;;  %v5515_v47 = vadd.f32 %v1620_v8, %v1618_v0  ;;  %v7372_v0 = vld [vmem:[#allocation89_spill] sm:$0xff]  ;;  %v7373_v8 = vld [vmem:[#allocation90_spill] sm:$0xff] }
 0x194   :  { %v4205_v18 = vpop.eup %4204  ;;  %v1612_v45 = vadd.f32 1.0, %v4203_v10  ;;  %v7374_v10 = vld [vmem:[#allocation91_spill] sm:$0xff] }
 0x195   :  { %v4207_v55 = vpop.eup %4206  ;;  %v1621_v57 = vmul.f32 %v4205_v18, %v4197_v9  ;;  %4208 = vtanh.f32 %v5515_v47  ;;  %v7369_v9 = vld [vmem:[#allocation86_spill] sm:$0xff]  ;;  %v7375_v18 = vld [vmem:[#allocation92_spill] sm:$0xff] }
 0x196   :  { %v1613_v34 = vadd.f32 1.0, %v4207_v55  ;;  %4210 = vrcp.f32 %v1612_v45  ;;  %v7376_v45 = vld [vmem:[#allocation93_spill] sm:$0xff]  ;;  %v7377_v55 = vld [vmem:[#allocation94_spill] sm:$0xff] }
 0x197   :  { %v5518_v15 = vadd.f32 %v1621_v57, %v1619_v7  ;;  %v7378_v7 = vld [vmem:[#allocation95_spill] sm:$0xff]  ;;  %v7379_v57 = vld [vmem:[#allocation96_spill] sm:$0xff] }
 0x198   :  { %4212 = vrcp.f32 %v1613_v34  ;;  %v7380_v34 = vld [vmem:[#allocation97_spill] sm:$0xff] }
 0x199   :  { %4214 = vtanh.f32 %v5518_v15 }
 0x1a2   :  { %v4209_v54 = vpop.eup %4208 }
 0x1a3   :  { %v4211_v53 = vpop.eup %4210 }
 0x1a4   :  { %v5521_v50 = vmul.f32 %v4211_v53, %v4209_v54  ;;  %v7381_v54 = vld [vmem:[#allocation98_spill] sm:$0xff]  ;;  %v7382_v53 = vld [vmem:[#allocation99_spill] sm:$0xff] }
 0x1a5   :  { %v4213_v52 = vpop.eup %4212 }
 0x1a6   :  { %v4215_v42 = vpop.eup %4214  ;;  %7357 = vst [vmem:[#allocation197_spill] sm:$0xff] %v5521_v50  ;;  %v5529_v48 = vpack.c.bf16 %v5521_v50, %v5521_v50  ;;  %v7387_v50 = vld [vmem:[#allocation104_spill] sm:$0xff] }
 0x1a7   :  { %v5523_v59 = vmul.f32 %v4215_v42, %v4213_v52  ;;  %v7383_v52 = vld [vmem:[#allocation100_spill] sm:$0xff]  ;;  %v7384_v42 = vld [vmem:[#allocation101_spill] sm:$0xff] }
 0x1a9   :  { %7358 = vst [vmem:[#allocation198_spill] sm:$0xff] %v5523_v59  ;;  %v1637_v23 = vpack.c.bf16 %v5523_v59, %v5523_v59  ;;  %v7386_v59 = vld [vmem:[#allocation103_spill] sm:$0xff] }
 0x1ab   :  { %1681 = vmatprep.mubr.bf16.mxu0 %v1637_v23  ;;  %1722 = vmatprep.mubr.bf16.mxu1 %v1637_v23 }
 0x1ac   :  { %1682 = vmatmul.mubr.bf16.vlgmr.msra.gmra.mxu0 %v5529_v48  ;;  %1723 = vmatmul.mubr.bf16.vlgmr.msra.gmra.mxu1 %v5529_v48 }
 0x1ad   :  { %1732 = vmatpush1.bf16.msra.mxu0 %v7359_v25  ;;  %1773 = vmatpush1.bf16.msra.mxu1 %v7360_v41 }
 0x1ae   :  { %1763 = vmatprep.mubr.bf16.mxu0 %v1637_v23  ;;  %1804 = vmatprep.mubr.bf16.mxu1 %v1637_v23  ;;  %v7385_v23 = vld [vmem:[#allocation102_spill] sm:$0xff] }
 0x1af   :  { %1733 = vmatprep.subr.bf16.mxu0 %v7361_v24  ;;  %1774 = vmatprep.subr.bf16.mxu1 %v7362_v58 }
 0x1b1   :  { %1734 = vmatpush1.bf16.msra.mxu0 %v7363_v39  ;;  %1775 = vmatpush1.bf16.msra.mxu1 %v7364_v40 }
 0x1b2   :  { %1735 = vmatprep.subr.bf16.mxu0 %v7365_v51  ;;  %1776 = vmatprep.subr.bf16.mxu1 %v7366_v46 }
 0x1b5   :  { %1736 = vmatpush1.bf16.msra.mxu0 %v7367_v61  ;;  %1777 = vmatpush1.bf16.msra.mxu1 %v7368_v5 }
 0x1b6   :  { %1737 = vmatprep.subr.bf16.mxu0 %v7369_v9  ;;  %1778 = vmatprep.subr.bf16.mxu1 %v7370_v1 }
 0x1b9   :  { %1738 = vmatpush1.bf16.msra.mxu0 %v7371_v60  ;;  %1779 = vmatpush1.bf16.msra.mxu1 %v7372_v0 }
 0x1ba   :  { %1739 = vmatprep.subr.bf16.mxu0 %v7373_v8  ;;  %1780 = vmatprep.subr.bf16.mxu1 %v7374_v10 }
 0x1bd   :  { %1740 = vmatpush1.bf16.msra.mxu0 %v7375_v18  ;;  %1781 = vmatpush1.bf16.msra.mxu1 %v7376_v45 }
 0x1be   :  { %1741 = vmatprep.subr.bf16.mxu0 %v7377_v55  ;;  %1782 = vmatprep.subr.bf16.mxu1 %v7378_v7  ;;  %v7388_v55 = vld [vmem:[#allocation105_spill] sm:$0xff]  ;;  %v7389_v7 = vld [vmem:[#allocation106_spill] sm:$0xff] }
 0x1c1   :  { %1742 = vmatpush1.bf16.msra.mxu0 %v7379_v57  ;;  %1783 = vmatpush1.bf16.msra.mxu1 %v7380_v34  ;;  %v7390_v57 = vld [vmem:[#allocation107_spill] sm:$0xff]  ;;  %v7391_v34 = vld [vmem:[#allocation108_spill] sm:$0xff] }
 0x1c2   :  { %1743 = vmatprep.subr.bf16.mxu0 %v7381_v54  ;;  %1784 = vmatprep.subr.bf16.mxu1 %v7382_v53  ;;  %v7392_v54 = vld [vmem:[#allocation109_spill] sm:$0xff]  ;;  %v7393_v53 = vld [vmem:[#allocation110_spill] sm:$0xff] }
 0x1c5   :  { %1744 = vmatpush1.bf16.msra.mxu0 %v7383_v52  ;;  %1785 = vmatpush1.bf16.msra.mxu1 %v7384_v42  ;;  %v7394_v52 = vld [vmem:[#allocation111_spill] sm:$0xff]  ;;  %v7395_v42 = vld [vmem:[#allocation112_spill] sm:$0xff] }
 0x1c6   :  { %1745 = vmatprep.subr.bf16.mxu0 %v7385_v23  ;;  %1786 = vmatprep.subr.bf16.mxu1 %v7386_v59  ;;  %v7396_v23 = vld [vmem:[#allocation113_spill] sm:$0xff]  ;;  %v7397_v59 = vld [vmem:[#allocation114_spill] sm:$0xff] }
 0x1c9   :  { %1746 = vmatpush1.bf16.msra.mxu0 %v7387_v50  ;;  %1787 = vmatpush1.bf16.msra.mxu1 %v7388_v55  ;;  %v7398_v50 = vld [vmem:[#allocation115_spill] sm:$0xff]  ;;  %v7399_v55 = vld [vmem:[#allocation116_spill] sm:$0xff] }
 0x1ca   :  { %1747 = vmatprep.subr.bf16.mxu0 %v7389_v7  ;;  %1788 = vmatprep.subr.bf16.mxu1 %v7390_v57  ;;  %v7400_v7 = vld [vmem:[#allocation117_spill] sm:$0xff]  ;;  %v7401_v57 = vld [vmem:[#allocation118_spill] sm:$0xff] }
 0x1cd   :  { %1748 = vmatpush2.bf16.msra.mxu0 %v7391_v34  ;;  %1789 = vmatpush2.bf16.msra.mxu1 %v7392_v54  ;;  %v7402_v34 = vld [vmem:[#allocation119_spill] sm:$0xff]  ;;  %v7403_v54 = vld [vmem:[#allocation120_spill] sm:$0xff] }
 0x1ce   :  { %1749 = vmatprep.subr.bf16.mxu0 %v7393_v53  ;;  %1790 = vmatprep.subr.bf16.mxu1 %v7394_v52  ;;  %v7404_v53 = vld [vmem:[#allocation121_spill] sm:$0xff]  ;;  %v7405_v52 = vld [vmem:[#allocation122_spill] sm:$0xff] }
 0x1d1   :  { %1750 = vmatpush2.bf16.msra.mxu0 %v7395_v42  ;;  %1791 = vmatpush2.bf16.msra.mxu1 %v7396_v23  ;;  %v7406_v42 = vld [vmem:[#allocation123_spill] sm:$0xff] }
 0x1d2   :  { %1751 = vmatprep.subr.bf16.mxu0 %v7397_v59  ;;  %1792 = vmatprep.subr.bf16.mxu1 %v7398_v50 }
 0x1d5   :  { %1752 = vmatpush2.bf16.msra.mxu0 %v7399_v55  ;;  %1793 = vmatpush2.bf16.msra.mxu1 %v7400_v7  ;;  %v7407_v55 = vld [vmem:[#allocation127_spill] sm:$0xff]  ;;  %v7408_v7 = vld [vmem:[#allocation128_spill] sm:$0xff] }
 0x1d6   :  { %1753 = vmatprep.subr.bf16.mxu0 %v7401_v57  ;;  %1794 = vmatprep.subr.bf16.mxu1 %v7402_v34 }
 0x1d9   :  { %1754 = vmatpush2.bf16.msra.mxu0 %v7403_v54  ;;  %1795 = vmatpush2.bf16.msra.mxu1 %v7404_v53 }
 0x1da   :  { %1755 = vmatprep.subr.bf16.mxu0 %v7405_v52  ;;  %1796 = vmatprep.subr.bf16.mxu1 %v7406_v42 }
 0x1dd   :  { %1756 = vmatpush2.bf16.msra.mxu0 %v5149_v26  ;;  %1797 = vmatpush2.bf16.msra.mxu1 %v5151_v6 }
 0x1de   :  { %1757 = vmatprep.subr.bf16.mxu0 %v5155_v2  ;;  %1798 = vmatprep.subr.bf16.mxu1 %v7407_v55 }
 0x1e1   :  { %1758 = vmatpush2.bf16.msra.mxu0 %v7408_v7  ;;  %1799 = vmatpush2.bf16.msra.mxu1 %v5163_v3 }
 0x1e2   :  { %1759 = vmatprep.subr.bf16.mxu0 %v5167_v32  ;;  %1800 = vmatprep.subr.bf16.mxu1 %v5169_v16 }
 0x1e5   :  { %1760 = vmatpush2.bf16.msra.mxu0 %v5173_v49  ;;  %1801 = vmatpush2.bf16.msra.mxu1 %v5175_v4 }
 0x1e6   :  { %1761 = vmatprep.subr.bf16.mxu0 %v5179_v33  ;;  %1802 = vmatprep.subr.bf16.mxu1 %v5181_v17 }
 0x1e9   :  { %1762 = vmatpush2.bf16.msra.mxu0 %v5185_v31  ;;  %1803 = vmatpush2.bf16.msra.mxu1 %v5187_v56 }
 0x1ea   :  { %1890 = vmatprep.subr.bf16.mxu0 %v4732_v62  ;;  %1931 = vmatprep.subr.bf16.mxu1 %v4734_v63 }
 0x1ec   :  { %1764 = vmatmul.mubr.bf16.vlgmr.msra.gmra.mxu0 %v5529_v48  ;;  %1805 = vmatmul.mubr.bf16.vlgmr.msra.gmra.mxu1 %v5529_v48  ;;  %v7409_v48 = vld [vmem:[#allocation30_spill] sm:$0xff] }
 0x1ed   :  { %1891 = vmatpush1.bf16.msra.mxu0 %v4772_v11  ;;  %1932 = vmatpush1.bf16.msra.mxu1 %v4774_v12 }
 0x1ee   :  { %1892 = vmatprep.subr.bf16.mxu0 %v4776_v13  ;;  %1933 = vmatprep.subr.bf16.mxu1 %v4778_v14  ;;  %v7456_v14 = vld [vmem:[#allocation142_spill] sm:$0xff]  ;;  %v7457_v13 = vld [vmem:[#allocation143_spill] sm:$0xff] }
 0x1f1   :  { %1893 = vmatpush1.bf16.msra.mxu0 %v4786_v19  ;;  %1934 = vmatpush1.bf16.msra.mxu1 %v4788_v20  ;;  %v7455_v19 = vld [vmem:[#allocation141_spill] sm:$0xff] }
 0x1f2   :  { %1894 = vmatprep.subr.bf16.mxu0 %v4792_v21  ;;  %1935 = vmatprep.subr.bf16.mxu1 %v4794_v22 }
 0x1f5   :  { %1895 = vmatpush1.bf16.msra.mxu0 %v4800_v27  ;;  %1936 = vmatpush1.bf16.msra.mxu1 %v4802_v28  ;;  %v7410_v27 = vld [vmem:[#allocation31_spill] sm:$0xff]  ;;  %v7411_v28 = vld [vmem:[#allocation32_spill] sm:$0xff] }
 0x1f6   :  { %1896 = vmatprep.subr.bf16.mxu0 %v4806_v29  ;;  %1937 = vmatprep.subr.bf16.mxu1 %v4808_v30  ;;  %v7412_v29 = vld [vmem:[#allocation33_spill] sm:$0xff]  ;;  %v7413_v30 = vld [vmem:[#allocation34_spill] sm:$0xff] }
 0x1f9   :  { %1897 = vmatpush1.bf16.msra.mxu0 %v4816_v35  ;;  %1938 = vmatpush1.bf16.msra.mxu1 %v4818_v36  ;;  %v7414_v35 = vld [vmem:[#allocation35_spill] sm:$0xff]  ;;  %v7415_v36 = vld [vmem:[#allocation36_spill] sm:$0xff] }
 0x1fa   :  { %1898 = vmatprep.subr.bf16.mxu0 %v4822_v37  ;;  %1939 = vmatprep.subr.bf16.mxu1 %v4824_v38  ;;  %v7416_v37 = vld [vmem:[#allocation37_spill] sm:$0xff]  ;;  %v7417_v38 = vld [vmem:[#allocation38_spill] sm:$0xff] }
 0x1fd   :  { %1899 = vmatpush1.bf16.msra.mxu0 %v4830_v43  ;;  %1940 = vmatpush1.bf16.msra.mxu1 %v4832_v44  ;;  %v7418_v43 = vld [vmem:[#allocation39_spill] sm:$0xff]  ;;  %v7419_v44 = vld [vmem:[#allocation40_spill] sm:$0xff] }
 0x1fe   :  { %1900 = vmatprep.subr.bf16.mxu0 %v7409_v48  ;;  %1941 = vmatprep.subr.bf16.mxu1 %v7410_v27  ;;  %v7420_v48 = vld [vmem:[#allocation41_spill] sm:$0xff]  ;;  %v7421_v27 = vld [vmem:[#allocation42_spill] sm:$0xff] }
 0x201   :  { %1901 = vmatpush1.bf16.msra.mxu0 %v7411_v28  ;;  %1942 = vmatpush1.bf16.msra.mxu1 %v7412_v29  ;;  %v7422_v28 = vld [vmem:[#allocation43_spill] sm:$0xff]  ;;  %v7423_v29 = vld [vmem:[#allocation44_spill] sm:$0xff] }
 0x202   :  { %1902 = vmatprep.subr.bf16.mxu0 %v7413_v30  ;;  %1943 = vmatprep.subr.bf16.mxu1 %v7414_v35  ;;  %v7424_v30 = vld [vmem:[#allocation45_spill] sm:$0xff]  ;;  %v7425_v35 = vld [vmem:[#allocation46_spill] sm:$0xff] }
 0x205   :  { %1903 = vmatpush1.bf16.msra.mxu0 %v7415_v36  ;;  %1944 = vmatpush1.bf16.msra.mxu1 %v7416_v37  ;;  %v7426_v36 = vld [vmem:[#allocation47_spill] sm:$0xff]  ;;  %v7427_v37 = vld [vmem:[#allocation48_spill] sm:$0xff] }
 0x206   :  { %1904 = vmatprep.subr.bf16.mxu0 %v7417_v38  ;;  %1945 = vmatprep.subr.bf16.mxu1 %v7418_v43  ;;  %v7428_v38 = vld [vmem:[#allocation49_spill] sm:$0xff]  ;;  %v7429_v43 = vld [vmem:[#allocation50_spill] sm:$0xff] }
 0x209   :  { %1905 = vmatpush1.bf16.msra.mxu0 %v7419_v44  ;;  %1946 = vmatpush1.bf16.msra.mxu1 %v7420_v48  ;;  %v7430_v44 = vld [vmem:[#allocation51_spill] sm:$0xff]  ;;  %v7431_v48 = vld [vmem:[#allocation52_spill] sm:$0xff] }
 0x20a   :  { %1906 = vmatprep.subr.bf16.mxu0 %v7421_v27  ;;  %1947 = vmatprep.subr.bf16.mxu1 %v7422_v28  ;;  %v7432_v27 = vld [vmem:[#allocation53_spill] sm:$0xff]  ;;  %v7433_v28 = vld [vmem:[#allocation54_spill] sm:$0xff] }
 0x20d   :  { %1907 = vmatpush2.bf16.msra.mxu0 %v7423_v29  ;;  %1948 = vmatpush2.bf16.msra.mxu1 %v7424_v30  ;;  %v7434_v29 = vld [vmem:[#allocation55_spill] sm:$0xff]  ;;  %v7435_v30 = vld [vmem:[#allocation56_spill] sm:$0xff] }
 0x20e   :  { %1908 = vmatprep.subr.bf16.mxu0 %v7425_v35  ;;  %1949 = vmatprep.subr.bf16.mxu1 %v7426_v36  ;;  %v7436_v35 = vld [vmem:[#allocation57_spill] sm:$0xff]  ;;  %v7437_v36 = vld [vmem:[#allocation58_spill] sm:$0xff] }
 0x211   :  { %1909 = vmatpush2.bf16.msra.mxu0 %v7427_v37  ;;  %1950 = vmatpush2.bf16.msra.mxu1 %v7428_v38  ;;  %v7438_v37 = vld [vmem:[#allocation59_spill] sm:$0xff]  ;;  %v7439_v38 = vld [vmem:[#allocation60_spill] sm:$0xff] }
 0x212   :  { %1910 = vmatprep.subr.bf16.mxu0 %v7429_v43  ;;  %1951 = vmatprep.subr.bf16.mxu1 %v7430_v44  ;;  %v7440_v43 = vld [vmem:[#allocation61_spill] sm:$0xff]  ;;  %v7441_v44 = vld [vmem:[#allocation62_spill] sm:$0xff] }
 0x215   :  { %1911 = vmatpush2.bf16.msra.mxu0 %v7431_v48  ;;  %1952 = vmatpush2.bf16.msra.mxu1 %v7432_v27  ;;  %v7442_v48 = vld [vmem:[#allocation63_spill] sm:$0xff]  ;;  %v7443_v27 = vld [vmem:[#allocation64_spill] sm:$0xff] }
 0x216   :  { %1912 = vmatprep.subr.bf16.mxu0 %v7433_v28  ;;  %1953 = vmatprep.subr.bf16.mxu1 %v7434_v29  ;;  %v7444_v28 = vld [vmem:[#allocation65_spill] sm:$0xff]  ;;  %v7445_v29 = vld [vmem:[#allocation66_spill] sm:$0xff] }
 0x219   :  { %1913 = vmatpush2.bf16.msra.mxu0 %v7435_v30  ;;  %1954 = vmatpush2.bf16.msra.mxu1 %v7436_v35  ;;  %v7446_v30 = vld [vmem:[#allocation67_spill] sm:$0xff]  ;;  %v7447_v35 = vld [vmem:[#allocation68_spill] sm:$0xff] }
 0x21a   :  { %1914 = vmatprep.subr.bf16.mxu0 %v7437_v36  ;;  %1955 = vmatprep.subr.bf16.mxu1 %v7438_v37  ;;  %v7448_v36 = vld [vmem:[#allocation69_spill] sm:$0xff]  ;;  %v7449_v37 = vld [vmem:[#allocation70_spill] sm:$0xff] }
 0x21d   :  { %1915 = vmatpush2.bf16.msra.mxu0 %v7439_v38  ;;  %1956 = vmatpush2.bf16.msra.mxu1 %v7440_v43  ;;  %v7450_v38 = vld [vmem:[#allocation71_spill] sm:$0xff]  ;;  %v7451_v43 = vld [vmem:[#allocation72_spill] sm:$0xff] }
 0x21e   :  { %1916 = vmatprep.subr.bf16.mxu0 %v7441_v44  ;;  %1957 = vmatprep.subr.bf16.mxu1 %v7442_v48  ;;  %v7452_v44 = vld [vmem:[#allocation73_spill] sm:$0xff]  ;;  %v7453_v48 = vld [vmem:[#allocation74_spill] sm:$0xff] }
 0x221   :  { %1917 = vmatpush2.bf16.msra.mxu0 %v7443_v27  ;;  %1958 = vmatpush2.bf16.msra.mxu1 %v7444_v28  ;;  %v7454_v27 = vld [vmem:[#allocation75_spill] sm:$0xff] }
 0x222   :  { %1918 = vmatprep.subr.bf16.mxu0 %v7445_v29  ;;  %1959 = vmatprep.subr.bf16.mxu1 %v7446_v30 }
 0x225   :  { %1919 = vmatpush2.bf16.msra.mxu0 %v7447_v35  ;;  %1960 = vmatpush2.bf16.msra.mxu1 %v7448_v36 }
 0x226   :  { %1920 = vmatprep.subr.bf16.mxu0 %v7449_v37  ;;  %1961 = vmatprep.subr.bf16.mxu1 %v7450_v38 }
 0x229   :  { %1921 = vmatpush2.bf16.msra.mxu0 %v7451_v43  ;;  %1962 = vmatpush2.bf16.msra.mxu1 %v7452_v44  ;;  %v7458_v44 = vld [vmem:[#allocation144_spill] sm:$0xff] }
 0x22a   :  { %1972 = vmatprep.subr.bf16.mxu0 %v7453_v48  ;;  %2013 = vmatprep.subr.bf16.mxu1 %v7454_v27 }
 0x26c   :  { %v1683_v28 = vpop.f32.mrf.mxu0  ;;  %v1724_v29 = vpop.f32.mrf.mxu1 }
 0x26d   :  { %v1813_v37 = vadd.f32 %v1683_v28, %v7455_v19  ;;  %v1815_v38 = vadd.f32 %v1724_v29, %v7456_v14  ;;  %v7459_v29 = vld [vmem:[#allocation169_spill] sm:$0xff] }
 0x26e   :  { %v1685_v22 = vpop.f32.mrf.mxu0  ;;  %v1726_v30 = vpop.f32.mrf.mxu1 }
 0x26f   :  { %v1814_v43 = vadd.f32 %v1685_v22, %v7457_v13  ;;  %v4118_v12 = vmul.f32 -1.442695, %v1813_v37  ;;  %v1816_v11 = vadd.f32 %v1726_v30, %v7458_v44  ;;  %v4120_v48 = vmul.f32 -1.442695, %v1815_v38  ;;  %v7460_v37 = vld [vmem:[#allocation170_spill] sm:$0xff]  ;;  %v7461_v38 = vld [vmem:[#allocation171_spill] sm:$0xff] }
 0x270   :  { %v1687_v21 = vpop.f32.mrf.mxu0  ;;  %v1728_v35 = vpop.f32.mrf.mxu1  ;;  %v7462_v44 = vld [vmem:[#allocation172_spill] sm:$0xff] }
 0x271   :  { %v4119_v63 = vmul.f32 -1.442695, %v1814_v43  ;;  %4216 = vpow2.f32 %v4118_v12  ;;  %v4121_v27 = vmul.f32 -1.442695, %v1816_v11 }
 0x272   :  { %v1688_v20 = vpop.f32.mrf.mxu0  ;;  %v1729_v36 = vpop.f32.mrf.mxu1  ;;  %4218 = vpow2.f32 %v4120_v48 }
 0x273   :  { %4220 = vpow2.f32 %v4119_v63 }
 0x274   :  { %4222 = vpow2.f32 %v4121_v27 }
 0x27e   :  { %v4217_v21 = vpop.eup %4216 }
 0x27f   :  { %v4219_v35 = vpop.eup %4218  ;;  %v1827_v36 = vadd.f32 1.0, %v4217_v21 }
 0x280   :  { %v4221_v20 = vpop.eup %4220  ;;  %v1839_v19 = vadd.f32 1.0, %v4219_v35 }
 0x281   :  { %v4223_v62 = vpop.eup %4222  ;;  %v1828_v28 = vadd.f32 1.0, %v4221_v20  ;;  %4224 = vrcp.f32 %v1827_v36 }
 0x282   :  { %v1840_v14 = vadd.f32 1.0, %v4223_v62  ;;  %4226 = vrcp.f32 %v1839_v19 }
 0x283   :  { %4228 = vrcp.f32 %v1828_v28 }
 0x28e   :  { %v4225_v19 = vpop.eup %4224 }
 0x2ac   :  { %v1765_v13 = vpop.f32.mrf.mxu0  ;;  %v1806_v22 = vpop.f32.mrf.mxu1 }
 0x2ad   :  { %v1817_v30 = vadd.f32 %v1765_v13, %v7459_v29  ;;  %v1819_v12 = vadd.f32 %v1806_v22, %v7460_v37  ;;  %v4227_v13 = vpop.eup %4226 }
 0x2ae   :  { %v1767_v11 = vpop.f32.mrf.mxu0  ;;  %v1808_v63 = vpop.f32.mrf.mxu1 }
 0x2af   :  { %4230 = vtanh.f32 %v1817_v30  ;;  %v4122_v27 = vmul.f32 -1.442695, %v1819_v12  ;;  %v1818_v43 = vadd.f32 %v1767_v11, %v7461_v38  ;;  %v1820_v48 = vadd.f32 %v1808_v63, %v7462_v44  ;;  %v4229_v28 = vpop.eup %4228 }
 0x2b0   :  { %4232 = vrcp.f32 %v1840_v14  ;;  %v1769_v21 = vpop.f32.mrf.mxu0  ;;  %v1810_v35 = vpop.f32.mrf.mxu1  ;;  %v1859_v30 = vmul.f32 %v4227_v13, %v5515_v47  ;;  %v7465_v13 = vld [vmem:[#allocation94_spill] sm:$0xff] }
 0x2b1   :  { %4234 = vpow2.f32 %v4122_v27  ;;  %v4123_v62 = vmul.f32 -1.442695, %v1820_v48 }
 0x2b2   :  { %4236 = vtanh.f32 %v1818_v43  ;;  %v1770_v20 = vpop.f32.mrf.mxu0  ;;  %v1811_v36 = vpop.f32.mrf.mxu1 }
 0x2b3   :  { %4238 = vpow2.f32 %v4123_v62 }
 0x2bc   :  { %v4231_v22 = vpop.eup %4230 }
 0x2bd   :  { %v4233_v29 = vpop.eup %4232  ;;  %v1861_v37 = vmul.f32 %v4231_v22, %v4225_v19  ;;  %v7467_v22 = vld [vmem:[#allocation96_spill] sm:$0xff] }
 0x2be   :  { %v4235_v12 = vpop.eup %4234  ;;  %v1860_v27 = vmul.f32 %v4233_v29, %v5518_v15  ;;  %v7468_v29 = vld [vmem:[#allocation97_spill] sm:$0xff] }
 0x2bf   :  { %v4237_v11 = vpop.eup %4236  ;;  %v5672_v63 = vadd.f32 %v1861_v37, %v1859_v30  ;;  %v1853_v14 = vadd.f32 1.0, %v4235_v12  ;;  %v7469_v30 = vld [vmem:[#allocation98_spill] sm:$0xff]  ;;  %v7470_v37 = vld [vmem:[#allocation99_spill] sm:$0xff]  ;;  %v7471_v12 = vld [vmem:[#allocation100_spill] sm:$0xff] }
 0x2c0   :  { %v4239_v38 = vpop.eup %4238  ;;  %v1862_v43 = vmul.f32 %v4237_v11, %v4229_v28  ;;  %v7466_v28 = vld [vmem:[#allocation95_spill] sm:$0xff]  ;;  %v7472_v11 = vld [vmem:[#allocation101_spill] sm:$0xff] }
 0x2c1   :  { %4240 = vtanh.f32 %v5672_v63  ;;  %v1854_v44 = vadd.f32 1.0, %v4239_v38  ;;  %v7474_v38 = vld [vmem:[#allocation103_spill] sm:$0xff] }
 0x2c2   :  { %4242 = vrcp.f32 %v1853_v14  ;;  %v5676_v48 = vadd.f32 %v1862_v43, %v1860_v27  ;;  %v7473_v14 = vld [vmem:[#allocation102_spill] sm:$0xff]  ;;  %v7475_v27 = vld [vmem:[#allocation104_spill] sm:$0xff]  ;;  %v7476_v43 = vld [vmem:[#allocation105_spill] sm:$0xff] }
 0x2c3   :  { %4244 = vrcp.f32 %v1854_v44  ;;  %v7477_v44 = vld [vmem:[#allocation106_spill] sm:$0xff] }
 0x2c4   :  { %4246 = vtanh.f32 %v5676_v48 }
 0x2ce   :  { %v4241_v47 = vpop.eup %4240 }
 0x2cf   :  { %v4243_v21 = vpop.eup %4242 }
 0x2d0   :  { %v4245_v35 = vpop.eup %4244  ;;  %v5679_v20 = vmul.f32 %v4243_v21, %v4241_v47  ;;  %v7478_v47 = vld [vmem:[#allocation107_spill] sm:$0xff]  ;;  %v7479_v21 = vld [vmem:[#allocation108_spill] sm:$0xff] }
 0x2d1   :  { %v4247_v62 = vpop.eup %4246 }
 0x2d2   :  { %7463 = vst [vmem:[#allocation76_spill] sm:$0xff] %v5679_v20  ;;  %v5681_v36 = vmul.f32 %v4247_v62, %v4245_v35  ;;  %v5687_v19 = vpack.c.bf16 %v5679_v20, %v5679_v20  ;;  %v7480_v35 = vld [vmem:[#allocation109_spill] sm:$0xff]  ;;  %v7481_v62 = vld [vmem:[#allocation110_spill] sm:$0xff]  ;;  %v7484_v20 = vld [vmem:[#allocation116_spill] sm:$0xff] }
 0x2d4   :  { %7464 = vst [vmem:[#allocation77_spill] sm:$0xff] %v5681_v36  ;;  %v1878_v15 = vpack.c.bf16 %v5681_v36, %v5681_v36  ;;  %v7483_v36 = vld [vmem:[#allocation112_spill] sm:$0xff] }
 0x2d6   :  { %1922 = vmatprep.mubr.bf16.mxu0 %v1878_v15  ;;  %1963 = vmatprep.mubr.bf16.mxu1 %v1878_v15 }
 0x2d7   :  { %1923 = vmatmul.mubr.bf16.vlgmr.msra.gmra.mxu0 %v5687_v19  ;;  %1964 = vmatmul.mubr.bf16.vlgmr.msra.gmra.mxu1 %v5687_v19 }
 0x2d8   :  { %1973 = vmatpush1.bf16.msra.mxu0 %v7359_v25  ;;  %2014 = vmatpush1.bf16.msra.mxu1 %v7360_v41 }
 0x2d9   :  { %2004 = vmatprep.mubr.bf16.mxu0 %v1878_v15  ;;  %2045 = vmatprep.mubr.bf16.mxu1 %v1878_v15  ;;  %v7482_v15 = vld [vmem:[#allocation111_spill] sm:$0xff] }
 0x2da   :  { %1974 = vmatprep.subr.bf16.mxu0 %v7361_v24  ;;  %2015 = vmatprep.subr.bf16.mxu1 %v7362_v58 }
 0x2dc   :  { %1975 = vmatpush1.bf16.msra.mxu0 %v7363_v39  ;;  %2016 = vmatpush1.bf16.msra.mxu1 %v7364_v40 }
 0x2dd   :  { %1976 = vmatprep.subr.bf16.mxu0 %v7365_v51  ;;  %2017 = vmatprep.subr.bf16.mxu1 %v7366_v46 }
 0x2e0   :  { %1977 = vmatpush1.bf16.msra.mxu0 %v7367_v61  ;;  %2018 = vmatpush1.bf16.msra.mxu1 %v7368_v5 }
 0x2e1   :  { %1978 = vmatprep.subr.bf16.mxu0 %v7369_v9  ;;  %2019 = vmatprep.subr.bf16.mxu1 %v7370_v1 }
 0x2e4   :  { %1979 = vmatpush1.bf16.msra.mxu0 %v7371_v60  ;;  %2020 = vmatpush1.bf16.msra.mxu1 %v7372_v0 }
 0x2e5   :  { %1980 = vmatprep.subr.bf16.mxu0 %v7373_v8  ;;  %2021 = vmatprep.subr.bf16.mxu1 %v7374_v10 }
 0x2e8   :  { %1981 = vmatpush1.bf16.msra.mxu0 %v7375_v18  ;;  %2022 = vmatpush1.bf16.msra.mxu1 %v7376_v45 }
 0x2e9   :  { %1982 = vmatprep.subr.bf16.mxu0 %v7465_v13  ;;  %2023 = vmatprep.subr.bf16.mxu1 %v7466_v28 }
 0x2ec   :  { %1983 = vmatpush1.bf16.msra.mxu0 %v7467_v22  ;;  %2024 = vmatpush1.bf16.msra.mxu1 %v7468_v29 }
 0x2ed   :  { %1984 = vmatprep.subr.bf16.mxu0 %v7469_v30  ;;  %2025 = vmatprep.subr.bf16.mxu1 %v7470_v37 }
 0x2f0   :  { %1985 = vmatpush1.bf16.msra.mxu0 %v7471_v12  ;;  %2026 = vmatpush1.bf16.msra.mxu1 %v7472_v11 }
 0x2f1   :  { %1986 = vmatprep.subr.bf16.mxu0 %v7473_v14  ;;  %2027 = vmatprep.subr.bf16.mxu1 %v7474_v38 }
 0x2f4   :  { %1987 = vmatpush1.bf16.msra.mxu0 %v7475_v27  ;;  %2028 = vmatpush1.bf16.msra.mxu1 %v7476_v43 }
 0x2f5   :  { %1988 = vmatprep.subr.bf16.mxu0 %v7477_v44  ;;  %2029 = vmatprep.subr.bf16.mxu1 %v7478_v47  ;;  %v7485_v44 = vld [vmem:[#allocation117_spill] sm:$0xff] }
 0x2f8   :  { %1989 = vmatpush2.bf16.msra.mxu0 %v7479_v21  ;;  %2030 = vmatpush2.bf16.msra.mxu1 %v7480_v35 }
 0x2f9   :  { %1990 = vmatprep.subr.bf16.mxu0 %v7481_v62  ;;  %2031 = vmatprep.subr.bf16.mxu1 %v7482_v15 }
 0x2fc   :  { %1991 = vmatpush2.bf16.msra.mxu0 %v7483_v36  ;;  %2032 = vmatpush2.bf16.msra.mxu1 %v7396_v23 }
 0x2fd   :  { %1992 = vmatprep.subr.bf16.mxu0 %v7397_v59  ;;  %2033 = vmatprep.subr.bf16.mxu1 %v7398_v50 }
 0x300   :  { %1993 = vmatpush2.bf16.msra.mxu0 %v7484_v20  ;;  %2034 = vmatpush2.bf16.msra.mxu1 %v7485_v44 }
 0x301   :  { %1994 = vmatprep.subr.bf16.mxu0 %v7401_v57  ;;  %2035 = vmatprep.subr.bf16.mxu1 %v7402_v34 }
 0x304   :  { %1995 = vmatpush2.bf16.msra.mxu0 %v7403_v54  ;;  %2036 = vmatpush2.bf16.msra.mxu1 %v7404_v53 }
 0x305   :  { %1996 = vmatprep.subr.bf16.mxu0 %v7405_v52  ;;  %2037 = vmatprep.subr.bf16.mxu1 %v7406_v42  ;;  %v7553_v42 = vld [vmem:[#allocation146_spill] sm:$0xff]  ;;  %v7554_v52 = vld [vmem:[#allocation147_spill] sm:$0xff] }
 0x308   :  { %1997 = vmatpush2.bf16.msra.mxu0 %v5149_v26  ;;  %2038 = vmatpush2.bf16.msra.mxu1 %v5151_v6  ;;  %v7552_v26 = vld [vmem:[#allocation145_spill] sm:$0xff] }
 0x309   :  { %1998 = vmatprep.subr.bf16.mxu0 %v5155_v2  ;;  %2039 = vmatprep.subr.bf16.mxu1 %v7407_v55  ;;  %v7486_v55 = vld [vmem:[#allocation10_spill] sm:$0xff] }
 0x30c   :  { %1999 = vmatpush2.bf16.msra.mxu0 %v7408_v7  ;;  %2040 = vmatpush2.bf16.msra.mxu1 %v5163_v3  ;;  %v7487_v7 = vld [vmem:[#allocation11_spill] sm:$0xff] }
 0x30d   :  { %2000 = vmatprep.subr.bf16.mxu0 %v5167_v32  ;;  %2041 = vmatprep.subr.bf16.mxu1 %v5169_v16  ;;  %v7488_v16 = vld [vmem:[#allocation12_spill] sm:$0xff]  ;;  %v7497_v32 = vld [vmem:[#allocation21_spill] sm:$0xff] }
 0x310   :  { %2001 = vmatpush2.bf16.msra.mxu0 %v5173_v49  ;;  %2042 = vmatpush2.bf16.msra.mxu1 %v5175_v4  ;;  %v7489_v49 = vld [vmem:[#allocation13_spill] sm:$0xff]  ;;  %v7490_v4 = vld [vmem:[#allocation14_spill] sm:$0xff] }
 0x311   :  { %2002 = vmatprep.subr.bf16.mxu0 %v5179_v33  ;;  %2043 = vmatprep.subr.bf16.mxu1 %v5181_v17  ;;  %v7491_v33 = vld [vmem:[#allocation15_spill] sm:$0xff]  ;;  %v7492_v17 = vld [vmem:[#allocation16_spill] sm:$0xff] }
 0x314   :  { %2003 = vmatpush2.bf16.msra.mxu0 %v5185_v31  ;;  %2044 = vmatpush2.bf16.msra.mxu1 %v5187_v56  ;;  %v7493_v31 = vld [vmem:[#allocation17_spill] sm:$0xff]  ;;  %v7494_v56 = vld [vmem:[#allocation18_spill] sm:$0xff] }
 0x315   :  { %2131 = vmatprep.subr.bf16.mxu0 %v7486_v55  ;;  %2172 = vmatprep.subr.bf16.mxu1 %v7487_v7  ;;  %v7495_v55 = vld [vmem:[#allocation19_spill] sm:$0xff]  ;;  %v7496_v7 = vld [vmem:[#allocation20_spill] sm:$0xff] }
 0x317   :  { %2005 = vmatmul.mubr.bf16.vlgmr.msra.gmra.mxu0 %v5687_v19  ;;  %2046 = vmatmul.mubr.bf16.vlgmr.msra.gmra.mxu1 %v5687_v19  ;;  %v7498_v19 = vld [vmem:[#allocation22_spill] sm:$0xff] }
 0x318   :  { %2132 = vmatpush1.bf16.msra.mxu0 %v7488_v16  ;;  %2173 = vmatpush1.bf16.msra.mxu1 %v7489_v49  ;;  %v7499_v16 = vld [vmem:[#allocation23_spill] sm:$0xff]  ;;  %v7500_v49 = vld [vmem:[#allocation24_spill] sm:$0xff] }
 0x319   :  { %2133 = vmatprep.subr.bf16.mxu0 %v7490_v4  ;;  %2174 = vmatprep.subr.bf16.mxu1 %v7491_v33  ;;  %v7501_v4 = vld [vmem:[#allocation25_spill] sm:$0xff]  ;;  %v7502_v33 = vld [vmem:[#allocation26_spill] sm:$0xff] }
 0x31c   :  { %2134 = vmatpush1.bf16.msra.mxu0 %v7492_v17  ;;  %2175 = vmatpush1.bf16.msra.mxu1 %v7493_v31  ;;  %v7503_v17 = vld [vmem:[#allocation27_spill] sm:$0xff]  ;;  %v7504_v31 = vld [vmem:[#allocation28_spill] sm:$0xff] }
 0x31d   :  { %2135 = vmatprep.subr.bf16.mxu0 %v7494_v56  ;;  %2176 = vmatprep.subr.bf16.mxu1 %v7495_v55  ;;  %v7505_v56 = vld [vmem:[#allocation29_spill] sm:$0xff]  ;;  %v7506_v55 = vld [vmem:[#allocation30_spill] sm:$0xff] }
 0x320   :  { %2136 = vmatpush1.bf16.msra.mxu0 %v7496_v7  ;;  %2177 = vmatpush1.bf16.msra.mxu1 %v7497_v32  ;;  %v7507_v7 = vld [vmem:[#allocation31_spill] sm:$0xff]  ;;  %v7508_v32 = vld [vmem:[#allocation32_spill] sm:$0xff] }
 0x321   :  { %2137 = vmatprep.subr.bf16.mxu0 %v7498_v19  ;;  %2178 = vmatprep.subr.bf16.mxu1 %v7499_v16  ;;  %v7509_v19 = vld [vmem:[#allocation33_spill] sm:$0xff]  ;;  %v7510_v16 = vld [vmem:[#allocation34_spill] sm:$0xff] }
 0x324   :  { %2138 = vmatpush1.bf16.msra.mxu0 %v7500_v49  ;;  %2179 = vmatpush1.bf16.msra.mxu1 %v7501_v4  ;;  %v7511_v49 = vld [vmem:[#allocation35_spill] sm:$0xff]  ;;  %v7512_v4 = vld [vmem:[#allocation36_spill] sm:$0xff] }
 0x325   :  { %2139 = vmatprep.subr.bf16.mxu0 %v7502_v33  ;;  %2180 = vmatprep.subr.bf16.mxu1 %v7503_v17  ;;  %v7513_v33 = vld [vmem:[#allocation37_spill] sm:$0xff]  ;;  %v7514_v17 = vld [vmem:[#allocation38_spill] sm:$0xff] }
 0x328   :  { %2140 = vmatpush1.bf16.msra.mxu0 %v7504_v31  ;;  %2181 = vmatpush1.bf16.msra.mxu1 %v7505_v56  ;;  %v7515_v31 = vld [vmem:[#allocation39_spill] sm:$0xff]  ;;  %v7516_v56 = vld [vmem:[#allocation40_spill] sm:$0xff] }
 0x329   :  { %2141 = vmatprep.subr.bf16.mxu0 %v7506_v55  ;;  %2182 = vmatprep.subr.bf16.mxu1 %v7507_v7  ;;  %v7517_v55 = vld [vmem:[#allocation41_spill] sm:$0xff]  ;;  %v7518_v7 = vld [vmem:[#allocation42_spill] sm:$0xff] }
 0x32c   :  { %2142 = vmatpush1.bf16.msra.mxu0 %v7508_v32  ;;  %2183 = vmatpush1.bf16.msra.mxu1 %v7509_v19  ;;  %v7519_v32 = vld [vmem:[#allocation43_spill] sm:$0xff]  ;;  %v7520_v19 = vld [vmem:[#allocation44_spill] sm:$0xff] }
 0x32d   :  { %2143 = vmatprep.subr.bf16.mxu0 %v7510_v16  ;;  %2184 = vmatprep.subr.bf16.mxu1 %v7511_v49  ;;  %v7521_v16 = vld [vmem:[#allocation45_spill] sm:$0xff]  ;;  %v7522_v49 = vld [vmem:[#allocation46_spill] sm:$0xff] }
 0x330   :  { %2144 = vmatpush1.bf16.msra.mxu0 %v7512_v4  ;;  %2185 = vmatpush1.bf16.msra.mxu1 %v7513_v33  ;;  %v7523_v4 = vld [vmem:[#allocation47_spill] sm:$0xff]  ;;  %v7524_v33 = vld [vmem:[#allocation48_spill] sm:$0xff] }
 0x331   :  { %2145 = vmatprep.subr.bf16.mxu0 %v7514_v17  ;;  %2186 = vmatprep.subr.bf16.mxu1 %v7515_v31  ;;  %v7525_v17 = vld [vmem:[#allocation49_spill] sm:$0xff]  ;;  %v7526_v31 = vld [vmem:[#allocation50_spill] sm:$0xff] }
 0x334   :  { %2146 = vmatpush1.bf16.msra.mxu0 %v7516_v56  ;;  %2187 = vmatpush1.bf16.msra.mxu1 %v7517_v55  ;;  %v7527_v56 = vld [vmem:[#allocation51_spill] sm:$0xff]  ;;  %v7528_v55 = vld [vmem:[#allocation52_spill] sm:$0xff] }
 0x335   :  { %2147 = vmatprep.subr.bf16.mxu0 %v7518_v7  ;;  %2188 = vmatprep.subr.bf16.mxu1 %v7519_v32  ;;  %v7529_v7 = vld [vmem:[#allocation53_spill] sm:$0xff]  ;;  %v7530_v32 = vld [vmem:[#allocation54_spill] sm:$0xff] }
 0x338   :  { %2148 = vmatpush2.bf16.msra.mxu0 %v7520_v19  ;;  %2189 = vmatpush2.bf16.msra.mxu1 %v7521_v16  ;;  %v7531_v19 = vld [vmem:[#allocation55_spill] sm:$0xff]  ;;  %v7532_v16 = vld [vmem:[#allocation56_spill] sm:$0xff] }
 0x339   :  { %2149 = vmatprep.subr.bf16.mxu0 %v7522_v49  ;;  %2190 = vmatprep.subr.bf16.mxu1 %v7523_v4  ;;  %v7533_v49 = vld [vmem:[#allocation57_spill] sm:$0xff]  ;;  %v7534_v4 = vld [vmem:[#allocation58_spill] sm:$0xff] }
 0x33c   :  { %2150 = vmatpush2.bf16.msra.mxu0 %v7524_v33  ;;  %2191 = vmatpush2.bf16.msra.mxu1 %v7525_v17  ;;  %v7535_v33 = vld [vmem:[#allocation59_spill] sm:$0xff]  ;;  %v7536_v17 = vld [vmem:[#allocation60_spill] sm:$0xff] }
 0x33d   :  { %2151 = vmatprep.subr.bf16.mxu0 %v7526_v31  ;;  %2192 = vmatprep.subr.bf16.mxu1 %v7527_v56  ;;  %v7537_v31 = vld [vmem:[#allocation61_spill] sm:$0xff]  ;;  %v7538_v56 = vld [vmem:[#allocation62_spill] sm:$0xff] }
 0x340   :  { %2152 = vmatpush2.bf16.msra.mxu0 %v7528_v55  ;;  %2193 = vmatpush2.bf16.msra.mxu1 %v7529_v7  ;;  %v7539_v55 = vld [vmem:[#allocation63_spill] sm:$0xff]  ;;  %v7540_v7 = vld [vmem:[#allocation64_spill] sm:$0xff] }
 0x341   :  { %2153 = vmatprep.subr.bf16.mxu0 %v7530_v32  ;;  %2194 = vmatprep.subr.bf16.mxu1 %v7531_v19  ;;  %v7541_v32 = vld [vmem:[#allocation65_spill] sm:$0xff]  ;;  %v7542_v19 = vld [vmem:[#allocation66_spill] sm:$0xff] }
 0x344   :  { %2154 = vmatpush2.bf16.msra.mxu0 %v7532_v16  ;;  %2195 = vmatpush2.bf16.msra.mxu1 %v7533_v49  ;;  %v7543_v16 = vld [vmem:[#allocation67_spill] sm:$0xff]  ;;  %v7544_v49 = vld [vmem:[#allocation68_spill] sm:$0xff] }
 0x345   :  { %2155 = vmatprep.subr.bf16.mxu0 %v7534_v4  ;;  %2196 = vmatprep.subr.bf16.mxu1 %v7535_v33  ;;  %v7545_v4 = vld [vmem:[#allocation69_spill] sm:$0xff]  ;;  %v7546_v33 = vld [vmem:[#allocation70_spill] sm:$0xff] }
 0x348   :  { %2156 = vmatpush2.bf16.msra.mxu0 %v7536_v17  ;;  %2197 = vmatpush2.bf16.msra.mxu1 %v7537_v31  ;;  %v7547_v17 = vld [vmem:[#allocation71_spill] sm:$0xff]  ;;  %v7548_v31 = vld [vmem:[#allocation72_spill] sm:$0xff] }
 0x349   :  { %2157 = vmatprep.subr.bf16.mxu0 %v7538_v56  ;;  %2198 = vmatprep.subr.bf16.mxu1 %v7539_v55  ;;  %v7549_v56 = vld [vmem:[#allocation73_spill] sm:$0xff]  ;;  %v7550_v55 = vld [vmem:[#allocation74_spill] sm:$0xff] }
 0x34c   :  { %2158 = vmatpush2.bf16.msra.mxu0 %v7540_v7  ;;  %2199 = vmatpush2.bf16.msra.mxu1 %v7541_v32  ;;  %v7551_v7 = vld [vmem:[#allocation75_spill] sm:$0xff] }
 0x34d   :  { %2159 = vmatprep.subr.bf16.mxu0 %v7542_v19  ;;  %2200 = vmatprep.subr.bf16.mxu1 %v7543_v16 }
 0x350   :  { %2160 = vmatpush2.bf16.msra.mxu0 %v7544_v49  ;;  %2201 = vmatpush2.bf16.msra.mxu1 %v7545_v4 }
 0x351   :  { %2161 = vmatprep.subr.bf16.mxu0 %v7546_v33  ;;  %2202 = vmatprep.subr.bf16.mxu1 %v7547_v17 }
 0x354   :  { %2162 = vmatpush2.bf16.msra.mxu0 %v7548_v31  ;;  %2203 = vmatpush2.bf16.msra.mxu1 %v7549_v56  ;;  %v7555_v56 = vld [vmem:[#allocation148_spill] sm:$0xff] }
 0x355   :  { %2213 = vmatprep.subr.bf16.mxu0 %v7550_v55  ;;  %2254 = vmatprep.subr.bf16.mxu1 %v7551_v7 }
 0x397   :  { %v1924_v32 = vpop.f32.mrf.mxu0  ;;  %v1965_v19 = vpop.f32.mrf.mxu1 }
 0x398   :  { %v2054_v33 = vadd.f32 %v1924_v32, %v7552_v26  ;;  %v2056_v17 = vadd.f32 %v1965_v19, %v7553_v42 }
 0x399   :  { %v1926_v3 = vpop.f32.mrf.mxu0  ;;  %v1967_v16 = vpop.f32.mrf.mxu1 }
 0x39a   :  { %v2055_v31 = vadd.f32 %v1926_v3, %v7554_v52  ;;  %v4124_v53 = vmul.f32 -1.442695, %v2054_v33  ;;  %v2057_v54 = vadd.f32 %v1967_v16, %v7555_v56  ;;  %v4126_v55 = vmul.f32 -1.442695, %v2056_v17  ;;  %v7556_v56 = vld [vmem:[#allocation173_spill] sm:$0xff]  ;;  %v7559_v52 = vld [vmem:[#allocation176_spill] sm:$0xff] }
 0x39b   :  { %v1928_v2 = vpop.f32.mrf.mxu0  ;;  %v1969_v49 = vpop.f32.mrf.mxu1 }
 0x39c   :  { %v4125_v34 = vmul.f32 -1.442695, %v2055_v31  ;;  %4248 = vpow2.f32 %v4124_v53  ;;  %v4127_v7 = vmul.f32 -1.442695, %v2057_v54  ;;  %v7557_v31 = vld [vmem:[#allocation174_spill] sm:$0xff]  ;;  %v7558_v54 = vld [vmem:[#allocation175_spill] sm:$0xff] }
 0x39d   :  { %v1929_v6 = vpop.f32.mrf.mxu0  ;;  %v1970_v4 = vpop.f32.mrf.mxu1  ;;  %4250 = vpow2.f32 %v4126_v55 }
 0x39e   :  { %4252 = vpow2.f32 %v4125_v34 }
 0x39f   :  { %4254 = vpow2.f32 %v4127_v7 }
 0x3a9   :  { %v4249_v2 = vpop.eup %4248 }
 0x3aa   :  { %v4251_v49 = vpop.eup %4250  ;;  %v2068_v4 = vadd.f32 1.0, %v4249_v2 }
 0x3ab   :  { %v4253_v6 = vpop.eup %4252  ;;  %v2080_v26 = vadd.f32 1.0, %v4251_v49 }
 0x3ac   :  { %v4255_v57 = vpop.eup %4254  ;;  %v2069_v32 = vadd.f32 1.0, %v4253_v6  ;;  %4256 = vrcp.f32 %v2068_v4 }
 0x3ad   :  { %v2081_v42 = vadd.f32 1.0, %v4255_v57  ;;  %4258 = vrcp.f32 %v2080_v26 }
 0x3ae   :  { %4260 = vrcp.f32 %v2069_v32 }
 0x3b9   :  { %v4257_v26 = vpop.eup %4256 }
 0x3d7   :  { %v2006_v3 = vpop.f32.mrf.mxu0  ;;  %v2047_v33 = vpop.f32.mrf.mxu1 }
 0x3d8   :  { %v2058_v16 = vadd.f32 %v2006_v3, %v7556_v56  ;;  %v2060_v17 = vadd.f32 %v2047_v33, %v7557_v31  ;;  %v4259_v3 = vpop.eup %4258 }
 0x3d9   :  { %v2008_v55 = vpop.f32.mrf.mxu0  ;;  %v2049_v34 = vpop.f32.mrf.mxu1 }
 0x3da   :  { %4262 = vtanh.f32 %v2058_v16  ;;  %v4128_v7 = vmul.f32 -1.442695, %v2060_v17  ;;  %v2059_v53 = vadd.f32 %v2008_v55, %v7558_v54  ;;  %v2061_v19 = vadd.f32 %v2049_v34, %v7559_v52  ;;  %v4261_v32 = vpop.eup %4260 }
 0x3db   :  { %4264 = vrcp.f32 %v2081_v42  ;;  %v2010_v2 = vpop.f32.mrf.mxu0  ;;  %v2051_v49 = vpop.f32.mrf.mxu1  ;;  %v2100_v16 = vmul.f32 %v4259_v3, %v5672_v63  ;;  %v7562_v3 = vld [vmem:[#allocation106_spill] sm:$0xff] }
 0x3dc   :  { %4266 = vpow2.f32 %v4128_v7  ;;  %v4129_v57 = vmul.f32 -1.442695, %v2061_v19 }
 0x3dd   :  { %4268 = vtanh.f32 %v2059_v53  ;;  %v2011_v6 = vpop.f32.mrf.mxu0  ;;  %v2052_v4 = vpop.f32.mrf.mxu1 }
 0x3de   :  { %4270 = vpow2.f32 %v4129_v57 }
 0x3e7   :  { %v4263_v33 = vpop.eup %4262 }
 0x3e8   :  { %v4265_v56 = vpop.eup %4264  ;;  %v2102_v31 = vmul.f32 %v4263_v33, %v4257_v26  ;;  %v7564_v33 = vld [vmem:[#allocation119_spill] sm:$0xff] }
 0x3e9   :  { %v4267_v17 = vpop.eup %4266  ;;  %v2101_v7 = vmul.f32 %v4265_v56, %v5676_v48  ;;  %v7565_v56 = vld [vmem:[#allocation120_spill] sm:$0xff] }
 0x3ea   :  { %v4269_v55 = vpop.eup %4268  ;;  %v5830_v34 = vadd.f32 %v2102_v31, %v2100_v16  ;;  %v2094_v42 = vadd.f32 1.0, %v4267_v17  ;;  %v7566_v16 = vld [vmem:[#allocation121_spill] sm:$0xff]  ;;  %v7567_v31 = vld [vmem:[#allocation122_spill] sm:$0xff]  ;;  %v7568_v17 = vld [vmem:[#allocation123_spill] sm:$0xff] }
 0x3eb   :  { %v4271_v54 = vpop.eup %4270  ;;  %v2103_v53 = vmul.f32 %v4269_v55, %v4261_v32  ;;  %v7563_v32 = vld [vmem:[#allocation118_spill] sm:$0xff]  ;;  %v7569_v55 = vld [vmem:[#allocation124_spill] sm:$0xff] }
 0x3ec   :  { %4272 = vtanh.f32 %v5830_v34  ;;  %v2095_v52 = vadd.f32 1.0, %v4271_v54  ;;  %v7571_v54 = vld [vmem:[#allocation126_spill] sm:$0xff] }
 0x3ed   :  { %4274 = vrcp.f32 %v2094_v42  ;;  %v5834_v19 = vadd.f32 %v2103_v53, %v2101_v7  ;;  %v7570_v42 = vld [vmem:[#allocation125_spill] sm:$0xff]  ;;  %v7572_v7 = vld [vmem:[#allocation127_spill] sm:$0xff]  ;;  %v7573_v53 = vld [vmem:[#allocation128_spill] sm:$0xff] }
 0x3ee   :  { %4276 = vrcp.f32 %v2095_v52  ;;  %v7574_v52 = vld [vmem:[#allocation129_spill] sm:$0xff] }
 0x3ef   :  { %4278 = vtanh.f32 %v5834_v19 }
 0x3f9   :  { %v4273_v63 = vpop.eup %4272 }
 0x3fa   :  { %v4275_v2 = vpop.eup %4274 }
 0x3fb   :  { %v4277_v49 = vpop.eup %4276  ;;  %v5837_v6 = vmul.f32 %v4275_v2, %v4273_v63  ;;  %v7575_v63 = vld [vmem:[#allocation130_spill] sm:$0xff]  ;;  %v7576_v2 = vld [vmem:[#allocation131_spill] sm:$0xff] }
 0x3fc   :  { %v4279_v57 = vpop.eup %4278 }
 0x3fd   :  { %7560 = vst [vmem:[#allocation78_spill] sm:$0xff] %v5837_v6  ;;  %v5839_v4 = vmul.f32 %v4279_v57, %v4277_v49  ;;  %v5845_v26 = vpack.c.bf16 %v5837_v6, %v5837_v6  ;;  %v7577_v49 = vld [vmem:[#allocation132_spill] sm:$0xff]  ;;  %v7578_v57 = vld [vmem:[#allocation133_spill] sm:$0xff] }
 0x3fe   :  { %v7581_v6 = vld [vmem:[#allocation136_spill] sm:$0xff] }
 0x3ff   :  { %7561 = vst [vmem:[#allocation79_spill] sm:$0xff] %v5839_v4  ;;  %v2119_v48 = vpack.c.bf16 %v5839_v4, %v5839_v4  ;;  %v7580_v4 = vld [vmem:[#allocation135_spill] sm:$0xff] }
 0x401   :  { %2163 = vmatprep.mubr.bf16.mxu0 %v2119_v48  ;;  %2204 = vmatprep.mubr.bf16.mxu1 %v2119_v48 }
 0x402   :  { %2164 = vmatmul.mubr.bf16.vlgmr.msra.gmra.mxu0 %v5845_v26  ;;  %2205 = vmatmul.mubr.bf16.vlgmr.msra.gmra.mxu1 %v5845_v26 }
 0x403   :  { %2214 = vmatpush1.bf16.msra.mxu0 %v7359_v25  ;;  %2255 = vmatpush1.bf16.msra.mxu1 %v7360_v41 }
 0x404   :  { %2245 = vmatprep.mubr.bf16.mxu0 %v2119_v48  ;;  %2286 = vmatprep.mubr.bf16.mxu1 %v2119_v48  ;;  %v7579_v48 = vld [vmem:[#allocation134_spill] sm:$0xff] }
 0x405   :  { %2215 = vmatprep.subr.bf16.mxu0 %v7361_v24  ;;  %2256 = vmatprep.subr.bf16.mxu1 %v7362_v58 }
 0x407   :  { %2216 = vmatpush1.bf16.msra.mxu0 %v7363_v39  ;;  %2257 = vmatpush1.bf16.msra.mxu1 %v7364_v40 }
 0x408   :  { %2217 = vmatprep.subr.bf16.mxu0 %v7365_v51  ;;  %2258 = vmatprep.subr.bf16.mxu1 %v7366_v46 }
 0x40b   :  { %2218 = vmatpush1.bf16.msra.mxu0 %v7367_v61  ;;  %2259 = vmatpush1.bf16.msra.mxu1 %v7368_v5 }
 0x40c   :  { %2219 = vmatprep.subr.bf16.mxu0 %v7369_v9  ;;  %2260 = vmatprep.subr.bf16.mxu1 %v7370_v1 }
 0x40f   :  { %2220 = vmatpush1.bf16.msra.mxu0 %v7371_v60  ;;  %2261 = vmatpush1.bf16.msra.mxu1 %v7372_v0 }
 0x410   :  { %2221 = vmatprep.subr.bf16.mxu0 %v7373_v8  ;;  %2262 = vmatprep.subr.bf16.mxu1 %v7374_v10 }
 0x413   :  { %2222 = vmatpush1.bf16.msra.mxu0 %v7375_v18  ;;  %2263 = vmatpush1.bf16.msra.mxu1 %v7376_v45 }
 0x414   :  { %2223 = vmatprep.subr.bf16.mxu0 %v7465_v13  ;;  %2264 = vmatprep.subr.bf16.mxu1 %v7466_v28 }
 0x417   :  { %2224 = vmatpush1.bf16.msra.mxu0 %v7467_v22  ;;  %2265 = vmatpush1.bf16.msra.mxu1 %v7468_v29 }
 0x418   :  { %2225 = vmatprep.subr.bf16.mxu0 %v7469_v30  ;;  %2266 = vmatprep.subr.bf16.mxu1 %v7470_v37 }
 0x41b   :  { %2226 = vmatpush1.bf16.msra.mxu0 %v7471_v12  ;;  %2267 = vmatpush1.bf16.msra.mxu1 %v7472_v11 }
 0x41c   :  { %2227 = vmatprep.subr.bf16.mxu0 %v7473_v14  ;;  %2268 = vmatprep.subr.bf16.mxu1 %v7474_v38 }
 0x41f   :  { %2228 = vmatpush1.bf16.msra.mxu0 %v7475_v27  ;;  %2269 = vmatpush1.bf16.msra.mxu1 %v7476_v43 }
 0x420   :  { %2229 = vmatprep.subr.bf16.mxu0 %v7562_v3  ;;  %2270 = vmatprep.subr.bf16.mxu1 %v7478_v47 }
 0x423   :  { %2230 = vmatpush2.bf16.msra.mxu0 %v7479_v21  ;;  %2271 = vmatpush2.bf16.msra.mxu1 %v7480_v35 }
 0x424   :  { %2231 = vmatprep.subr.bf16.mxu0 %v7481_v62  ;;  %2272 = vmatprep.subr.bf16.mxu1 %v7482_v15 }
 0x427   :  { %2232 = vmatpush2.bf16.msra.mxu0 %v7483_v36  ;;  %2273 = vmatpush2.bf16.msra.mxu1 %v7396_v23 }
 0x428   :  { %2233 = vmatprep.subr.bf16.mxu0 %v7397_v59  ;;  %2274 = vmatprep.subr.bf16.mxu1 %v7398_v50 }
 0x42b   :  { %2234 = vmatpush2.bf16.msra.mxu0 %v7484_v20  ;;  %2275 = vmatpush2.bf16.msra.mxu1 %v7485_v44 }
 0x42c   :  { %2235 = vmatprep.subr.bf16.mxu0 %v7563_v32  ;;  %2276 = vmatprep.subr.bf16.mxu1 %v7564_v33 }
 0x42f   :  { %2236 = vmatpush2.bf16.msra.mxu0 %v7565_v56  ;;  %2277 = vmatpush2.bf16.msra.mxu1 %v7566_v16  ;;  %v7651_v16 = vld [vmem:[#allocation151_spill] sm:$0xff] }
 0x430   :  { %2237 = vmatprep.subr.bf16.mxu0 %v7567_v31  ;;  %2278 = vmatprep.subr.bf16.mxu1 %v7568_v17  ;;  %v7649_v17 = vld [vmem:[#allocation149_spill] sm:$0xff]  ;;  %v7650_v31 = vld [vmem:[#allocation150_spill] sm:$0xff] }
 0x433   :  { %2238 = vmatpush2.bf16.msra.mxu0 %v7569_v55  ;;  %2279 = vmatpush2.bf16.msra.mxu1 %v7570_v42 }
 0x434   :  { %2239 = vmatprep.subr.bf16.mxu0 %v7571_v54  ;;  %2280 = vmatprep.subr.bf16.mxu1 %v7572_v7  ;;  %v7582_v54 = vld [vmem:[#allocation137_spill] sm:$0xff]  ;;  %v7583_v7 = vld [vmem:[#allocation10_spill] sm:$0xff] }
 0x437   :  { %2240 = vmatpush2.bf16.msra.mxu0 %v7573_v53  ;;  %2281 = vmatpush2.bf16.msra.mxu1 %v7574_v52  ;;  %v7584_v53 = vld [vmem:[#allocation11_spill] sm:$0xff] }
 0x438   :  { %2241 = vmatprep.subr.bf16.mxu0 %v7575_v63  ;;  %2282 = vmatprep.subr.bf16.mxu1 %v7576_v2  ;;  %v7585_v2 = vld [vmem:[#allocation12_spill] sm:$0xff]  ;;  %v7594_v63 = vld [vmem:[#allocation21_spill] sm:$0xff] }
 0x43b   :  { %2242 = vmatpush2.bf16.msra.mxu0 %v7577_v49  ;;  %2283 = vmatpush2.bf16.msra.mxu1 %v7578_v57  ;;  %v7586_v49 = vld [vmem:[#allocation13_spill] sm:$0xff]  ;;  %v7587_v57 = vld [vmem:[#allocation14_spill] sm:$0xff] }
 0x43c   :  { %2243 = vmatprep.subr.bf16.mxu0 %v7579_v48  ;;  %2284 = vmatprep.subr.bf16.mxu1 %v7580_v4  ;;  %v7588_v48 = vld [vmem:[#allocation15_spill] sm:$0xff]  ;;  %v7589_v4 = vld [vmem:[#allocation16_spill] sm:$0xff] }
 0x43f   :  { %2244 = vmatpush2.bf16.msra.mxu0 %v7581_v6  ;;  %2285 = vmatpush2.bf16.msra.mxu1 %v7582_v54  ;;  %v7590_v6 = vld [vmem:[#allocation17_spill] sm:$0xff]  ;;  %v7591_v54 = vld [vmem:[#allocation18_spill] sm:$0xff] }
 0x440   :  { %2372 = vmatprep.subr.bf16.mxu0 %v7583_v7  ;;  %2413 = vmatprep.subr.bf16.mxu1 %v7584_v53  ;;  %v7592_v7 = vld [vmem:[#allocation19_spill] sm:$0xff]  ;;  %v7593_v53 = vld [vmem:[#allocation20_spill] sm:$0xff] }
 0x442   :  { %2246 = vmatmul.mubr.bf16.vlgmr.msra.gmra.mxu0 %v5845_v26  ;;  %2287 = vmatmul.mubr.bf16.vlgmr.msra.gmra.mxu1 %v5845_v26  ;;  %v7595_v26 = vld [vmem:[#allocation22_spill] sm:$0xff] }
 0x443   :  { %2373 = vmatpush1.bf16.msra.mxu0 %v7585_v2  ;;  %2414 = vmatpush1.bf16.msra.mxu1 %v7586_v49  ;;  %v7596_v2 = vld [vmem:[#allocation23_spill] sm:$0xff]  ;;  %v7597_v49 = vld [vmem:[#allocation24_spill] sm:$0xff] }
 0x444   :  { %2374 = vmatprep.subr.bf16.mxu0 %v7587_v57  ;;  %2415 = vmatprep.subr.bf16.mxu1 %v7588_v48  ;;  %v7598_v57 = vld [vmem:[#allocation25_spill] sm:$0xff]  ;;  %v7599_v48 = vld [vmem:[#allocation26_spill] sm:$0xff] }
 0x447   :  { %2375 = vmatpush1.bf16.msra.mxu0 %v7589_v4  ;;  %2416 = vmatpush1.bf16.msra.mxu1 %v7590_v6  ;;  %v7600_v4 = vld [vmem:[#allocation27_spill] sm:$0xff]  ;;  %v7601_v6 = vld [vmem:[#allocation28_spill] sm:$0xff] }
 0x448   :  { %2376 = vmatprep.subr.bf16.mxu0 %v7591_v54  ;;  %2417 = vmatprep.subr.bf16.mxu1 %v7592_v7  ;;  %v7602_v54 = vld [vmem:[#allocation29_spill] sm:$0xff]  ;;  %v7603_v7 = vld [vmem:[#allocation30_spill] sm:$0xff] }
 0x44b   :  { %2377 = vmatpush1.bf16.msra.mxu0 %v7593_v53  ;;  %2418 = vmatpush1.bf16.msra.mxu1 %v7594_v63  ;;  %v7604_v53 = vld [vmem:[#allocation31_spill] sm:$0xff]  ;;  %v7605_v63 = vld [vmem:[#allocation32_spill] sm:$0xff] }
 0x44c   :  { %2378 = vmatprep.subr.bf16.mxu0 %v7595_v26  ;;  %2419 = vmatprep.subr.bf16.mxu1 %v7596_v2  ;;  %v7606_v26 = vld [vmem:[#allocation33_spill] sm:$0xff]  ;;  %v7607_v2 = vld [vmem:[#allocation34_spill] sm:$0xff] }
 0x44f   :  { %2379 = vmatpush1.bf16.msra.mxu0 %v7597_v49  ;;  %2420 = vmatpush1.bf16.msra.mxu1 %v7598_v57  ;;  %v7608_v49 = vld [vmem:[#allocation35_spill] sm:$0xff]  ;;  %v7609_v57 = vld [vmem:[#allocation36_spill] sm:$0xff] }
 0x450   :  { %2380 = vmatprep.subr.bf16.mxu0 %v7599_v48  ;;  %2421 = vmatprep.subr.bf16.mxu1 %v7600_v4  ;;  %v7610_v48 = vld [vmem:[#allocation37_spill] sm:$0xff]  ;;  %v7611_v4 = vld [vmem:[#allocation38_spill] sm:$0xff] }
 0x453   :  { %2381 = vmatpush1.bf16.msra.mxu0 %v7601_v6  ;;  %2422 = vmatpush1.bf16.msra.mxu1 %v7602_v54  ;;  %v7612_v6 = vld [vmem:[#allocation39_spill] sm:$0xff]  ;;  %v7613_v54 = vld [vmem:[#allocation40_spill] sm:$0xff] }
 0x454   :  { %2382 = vmatprep.subr.bf16.mxu0 %v7603_v7  ;;  %2423 = vmatprep.subr.bf16.mxu1 %v7604_v53  ;;  %v7614_v7 = vld [vmem:[#allocation41_spill] sm:$0xff]  ;;  %v7615_v53 = vld [vmem:[#allocation42_spill] sm:$0xff] }
 0x457   :  { %2383 = vmatpush1.bf16.msra.mxu0 %v7605_v63  ;;  %2424 = vmatpush1.bf16.msra.mxu1 %v7606_v26  ;;  %v7616_v63 = vld [vmem:[#allocation43_spill] sm:$0xff]  ;;  %v7617_v26 = vld [vmem:[#allocation44_spill] sm:$0xff] }
 0x458   :  { %2384 = vmatprep.subr.bf16.mxu0 %v7607_v2  ;;  %2425 = vmatprep.subr.bf16.mxu1 %v7608_v49  ;;  %v7618_v2 = vld [vmem:[#allocation45_spill] sm:$0xff]  ;;  %v7619_v49 = vld [vmem:[#allocation46_spill] sm:$0xff] }
 0x45b   :  { %2385 = vmatpush1.bf16.msra.mxu0 %v7609_v57  ;;  %2426 = vmatpush1.bf16.msra.mxu1 %v7610_v48  ;;  %v7620_v57 = vld [vmem:[#allocation47_spill] sm:$0xff]  ;;  %v7621_v48 = vld [vmem:[#allocation48_spill] sm:$0xff] }
 0x45c   :  { %2386 = vmatprep.subr.bf16.mxu0 %v7611_v4  ;;  %2427 = vmatprep.subr.bf16.mxu1 %v7612_v6  ;;  %v7622_v4 = vld [vmem:[#allocation49_spill] sm:$0xff]  ;;  %v7623_v6 = vld [vmem:[#allocation50_spill] sm:$0xff] }
 0x45f   :  { %2387 = vmatpush1.bf16.msra.mxu0 %v7613_v54  ;;  %2428 = vmatpush1.bf16.msra.mxu1 %v7614_v7  ;;  %v7624_v54 = vld [vmem:[#allocation51_spill] sm:$0xff]  ;;  %v7625_v7 = vld [vmem:[#allocation52_spill] sm:$0xff] }
 0x460   :  { %2388 = vmatprep.subr.bf16.mxu0 %v7615_v53  ;;  %2429 = vmatprep.subr.bf16.mxu1 %v7616_v63  ;;  %v7626_v53 = vld [vmem:[#allocation53_spill] sm:$0xff]  ;;  %v7627_v63 = vld [vmem:[#allocation54_spill] sm:$0xff] }
 0x463   :  { %2389 = vmatpush2.bf16.msra.mxu0 %v7617_v26  ;;  %2430 = vmatpush2.bf16.msra.mxu1 %v7618_v2  ;;  %v7628_v26 = vld [vmem:[#allocation55_spill] sm:$0xff]  ;;  %v7629_v2 = vld [vmem:[#allocation56_spill] sm:$0xff] }
 0x464   :  { %2390 = vmatprep.subr.bf16.mxu0 %v7619_v49  ;;  %2431 = vmatprep.subr.bf16.mxu1 %v7620_v57  ;;  %v7630_v49 = vld [vmem:[#allocation57_spill] sm:$0xff]  ;;  %v7631_v57 = vld [vmem:[#allocation58_spill] sm:$0xff] }
 0x467   :  { %2391 = vmatpush2.bf16.msra.mxu0 %v7621_v48  ;;  %2432 = vmatpush2.bf16.msra.mxu1 %v7622_v4  ;;  %v7632_v48 = vld [vmem:[#allocation59_spill] sm:$0xff]  ;;  %v7633_v4 = vld [vmem:[#allocation60_spill] sm:$0xff] }
 0x468   :  { %2392 = vmatprep.subr.bf16.mxu0 %v7623_v6  ;;  %2433 = vmatprep.subr.bf16.mxu1 %v7624_v54  ;;  %v7634_v6 = vld [vmem:[#allocation61_spill] sm:$0xff]  ;;  %v7635_v54 = vld [vmem:[#allocation62_spill] sm:$0xff] }
 0x46b   :  { %2393 = vmatpush2.bf16.msra.mxu0 %v7625_v7  ;;  %2434 = vmatpush2.bf16.msra.mxu1 %v7626_v53  ;;  %v7636_v7 = vld [vmem:[#allocation63_spill] sm:$0xff]  ;;  %v7637_v53 = vld [vmem:[#allocation64_spill] sm:$0xff] }
 0x46c   :  { %2394 = vmatprep.subr.bf16.mxu0 %v7627_v63  ;;  %2435 = vmatprep.subr.bf16.mxu1 %v7628_v26  ;;  %v7638_v63 = vld [vmem:[#allocation65_spill] sm:$0xff]  ;;  %v7639_v26 = vld [vmem:[#allocation66_spill] sm:$0xff] }
 0x46f   :  { %2395 = vmatpush2.bf16.msra.mxu0 %v7629_v2  ;;  %2436 = vmatpush2.bf16.msra.mxu1 %v7630_v49  ;;  %v7640_v2 = vld [vmem:[#allocation67_spill] sm:$0xff]  ;;  %v7641_v49 = vld [vmem:[#allocation68_spill] sm:$0xff] }
 0x470   :  { %2396 = vmatprep.subr.bf16.mxu0 %v7631_v57  ;;  %2437 = vmatprep.subr.bf16.mxu1 %v7632_v48  ;;  %v7642_v57 = vld [vmem:[#allocation69_spill] sm:$0xff]  ;;  %v7643_v48 = vld [vmem:[#allocation70_spill] sm:$0xff] }
 0x473   :  { %2397 = vmatpush2.bf16.msra.mxu0 %v7633_v4  ;;  %2438 = vmatpush2.bf16.msra.mxu1 %v7634_v6  ;;  %v7644_v4 = vld [vmem:[#allocation71_spill] sm:$0xff]  ;;  %v7645_v6 = vld [vmem:[#allocation72_spill] sm:$0xff] }
 0x474   :  { %2398 = vmatprep.subr.bf16.mxu0 %v7635_v54  ;;  %2439 = vmatprep.subr.bf16.mxu1 %v7636_v7  ;;  %v7646_v54 = vld [vmem:[#allocation73_spill] sm:$0xff]  ;;  %v7647_v7 = vld [vmem:[#allocation74_spill] sm:$0xff] }
 0x477   :  { %2399 = vmatpush2.bf16.msra.mxu0 %v7637_v53  ;;  %2440 = vmatpush2.bf16.msra.mxu1 %v7638_v63  ;;  %v7648_v53 = vld [vmem:[#allocation75_spill] sm:$0xff] }
 0x478   :  { %2400 = vmatprep.subr.bf16.mxu0 %v7639_v26  ;;  %2441 = vmatprep.subr.bf16.mxu1 %v7640_v2 }
 0x47b   :  { %2401 = vmatpush2.bf16.msra.mxu0 %v7641_v49  ;;  %2442 = vmatpush2.bf16.msra.mxu1 %v7642_v57 }
 0x47c   :  { %2402 = vmatprep.subr.bf16.mxu0 %v7643_v48  ;;  %2443 = vmatprep.subr.bf16.mxu1 %v7644_v4 }
 0x47f   :  { %2403 = vmatpush2.bf16.msra.mxu0 %v7645_v6  ;;  %2444 = vmatpush2.bf16.msra.mxu1 %v7646_v54  ;;  %v7652_v54 = vld [vmem:[#allocation152_spill] sm:$0xff] }
 0x480   :  { %2454 = vmatprep.subr.bf16.mxu0 %v7647_v7  ;;  %2495 = vmatprep.subr.bf16.mxu1 %v7648_v53 }
 0x4c2   :  { %v2165_v63 = vpop.f32.mrf.mxu0  ;;  %v2206_v26 = vpop.f32.mrf.mxu1 }
 0x4c3   :  { %v2295_v48 = vadd.f32 %v2165_v63, %v7649_v17  ;;  %v2297_v4 = vadd.f32 %v2206_v26, %v7650_v31 }
 0x4c4   :  { %v2167_v52 = vpop.f32.mrf.mxu0  ;;  %v2208_v2 = vpop.f32.mrf.mxu1 }
 0x4c5   :  { %v2296_v6 = vadd.f32 %v2167_v52, %v7651_v16  ;;  %v4130_v56 = vmul.f32 -1.442695, %v2295_v48  ;;  %v2298_v33 = vadd.f32 %v2208_v2, %v7652_v54  ;;  %v4132_v7 = vmul.f32 -1.442695, %v2297_v4  ;;  %v7653_v54 = vld [vmem:[#allocation177_spill] sm:$0xff]  ;;  %v7656_v48 = vld [vmem:[#allocation180_spill] sm:$0xff] }
 0x4c6   :  { %v2169_v42 = vpop.f32.mrf.mxu0  ;;  %v2210_v49 = vpop.f32.mrf.mxu1 }
 0x4c7   :  { %v4131_v32 = vmul.f32 -1.442695, %v2296_v6  ;;  %4280 = vpow2.f32 %v4130_v56  ;;  %v4133_v53 = vmul.f32 -1.442695, %v2298_v33  ;;  %v7654_v6 = vld [vmem:[#allocation178_spill] sm:$0xff] }
 0x4c8   :  { %v2170_v55 = vpop.f32.mrf.mxu0  ;;  %v2211_v57 = vpop.f32.mrf.mxu1  ;;  %4282 = vpow2.f32 %v4132_v7 }
 0x4c9   :  { %4284 = vpow2.f32 %v4131_v32 }
 0x4ca   :  { %4286 = vpow2.f32 %v4133_v53  ;;  %v7655_v53 = vld [vmem:[#allocation179_spill] sm:$0xff] }
 0x4d4   :  { %v4281_v42 = vpop.eup %4280 }
 0x4d5   :  { %v4283_v49 = vpop.eup %4282  ;;  %v2309_v57 = vadd.f32 1.0, %v4281_v42 }
 0x4d6   :  { %v4285_v55 = vpop.eup %4284  ;;  %v2321_v17 = vadd.f32 1.0, %v4283_v49 }
 0x4d7   :  { %v4287_v44 = vpop.eup %4286  ;;  %v2310_v63 = vadd.f32 1.0, %v4285_v55  ;;  %4288 = vrcp.f32 %v2309_v57 }
 0x4d8   :  { %v2322_v31 = vadd.f32 1.0, %v4287_v44  ;;  %4290 = vrcp.f32 %v2321_v17 }
 0x4d9   :  { %4292 = vrcp.f32 %v2310_v63 }
 0x4e4   :  { %v4289_v17 = vpop.eup %4288 }
 0x502   :  { %v2247_v16 = vpop.f32.mrf.mxu0  ;;  %v2288_v52 = vpop.f32.mrf.mxu1 }
 0x503   :  { %v2299_v4 = vadd.f32 %v2247_v16, %v7653_v54  ;;  %v2301_v56 = vadd.f32 %v2288_v52, %v7654_v6  ;;  %v4291_v16 = vpop.eup %4290 }
 0x504   :  { %v2249_v33 = vpop.f32.mrf.mxu0  ;;  %v2290_v32 = vpop.f32.mrf.mxu1 }
 0x505   :  { %4294 = vtanh.f32 %v2299_v4  ;;  %v4134_v7 = vmul.f32 -1.442695, %v2301_v56  ;;  %v2300_v2 = vadd.f32 %v2249_v33, %v7655_v53  ;;  %v2302_v26 = vadd.f32 %v2290_v32, %v7656_v48  ;;  %v4293_v63 = vpop.eup %4292 }
 0x506   :  { %4296 = vrcp.f32 %v2322_v31  ;;  %v2251_v42 = vpop.f32.mrf.mxu0  ;;  %v2292_v49 = vpop.f32.mrf.mxu1  ;;  %v2341_v4 = vmul.f32 %v4291_v16, %v5830_v34  ;;  %v7659_v16 = vld [vmem:[#allocation117_spill] sm:$0xff] }
 0x507   :  { %4298 = vpow2.f32 %v4134_v7  ;;  %v4135_v44 = vmul.f32 -1.442695, %v2302_v26 }
 0x508   :  { %4300 = vtanh.f32 %v2300_v2  ;;  %v2252_v55 = vpop.f32.mrf.mxu0  ;;  %v2293_v57 = vpop.f32.mrf.mxu1 }
 0x509   :  { %4302 = vpow2.f32 %v4135_v44 }
 0x512   :  { %v4295_v52 = vpop.eup %4294 }
 0x513   :  { %v4297_v54 = vpop.eup %4296  ;;  %v2343_v6 = vmul.f32 %v4295_v52, %v4289_v17  ;;  %v7661_v52 = vld [vmem:[#allocation119_spill] sm:$0xff] }
 0x514   :  { %v4299_v56 = vpop.eup %4298  ;;  %v2342_v7 = vmul.f32 %v4297_v54, %v5834_v19  ;;  %v7662_v54 = vld [vmem:[#allocation120_spill] sm:$0xff] }
 0x515   :  { %v4301_v33 = vpop.eup %4300  ;;  %v5988_v32 = vadd.f32 %v2343_v6, %v2341_v4  ;;  %v2335_v31 = vadd.f32 1.0, %v4299_v56  ;;  %v7663_v4 = vld [vmem:[#allocation121_spill] sm:$0xff]  ;;  %v7664_v6 = vld [vmem:[#allocation122_spill] sm:$0xff]  ;;  %v7665_v56 = vld [vmem:[#allocation123_spill] sm:$0xff] }
 0x516   :  { %v4303_v53 = vpop.eup %4302  ;;  %v2344_v2 = vmul.f32 %v4301_v33, %v4293_v63  ;;  %v7660_v63 = vld [vmem:[#allocation118_spill] sm:$0xff]  ;;  %v7666_v33 = vld [vmem:[#allocation124_spill] sm:$0xff] }
 0x517   :  { %4304 = vtanh.f32 %v5988_v32  ;;  %v2336_v48 = vadd.f32 1.0, %v4303_v53  ;;  %v7668_v53 = vld [vmem:[#allocation126_spill] sm:$0xff] }
 0x518   :  { %4306 = vrcp.f32 %v2335_v31  ;;  %v5992_v26 = vadd.f32 %v2344_v2, %v2342_v7  ;;  %v7667_v31 = vld [vmem:[#allocation125_spill] sm:$0xff]  ;;  %v7669_v7 = vld [vmem:[#allocation127_spill] sm:$0xff]  ;;  %v7670_v2 = vld [vmem:[#allocation128_spill] sm:$0xff] }
 0x519   :  { %4308 = vrcp.f32 %v2336_v48  ;;  %v7671_v48 = vld [vmem:[#allocation129_spill] sm:$0xff] }
 0x51a   :  { %4310 = vtanh.f32 %v5992_v26 }
 0x524   :  { %v4305_v34 = vpop.eup %4304 }
 0x525   :  { %v4307_v42 = vpop.eup %4306 }
 0x526   :  { %v4309_v49 = vpop.eup %4308  ;;  %v5995_v55 = vmul.f32 %v4307_v42, %v4305_v34  ;;  %v7672_v34 = vld [vmem:[#allocation130_spill] sm:$0xff]  ;;  %v7673_v42 = vld [vmem:[#allocation131_spill] sm:$0xff] }
 0x527   :  { %v4311_v44 = vpop.eup %4310 }
 0x528   :  { %7657 = vst [vmem:[#allocation80_spill] sm:$0xff] %v5995_v55  ;;  %v5997_v57 = vmul.f32 %v4311_v44, %v4309_v49  ;;  %v6003_v17 = vpack.c.bf16 %v5995_v55, %v5995_v55  ;;  %v7674_v49 = vld [vmem:[#allocation132_spill] sm:$0xff]  ;;  %v7675_v44 = vld [vmem:[#allocation133_spill] sm:$0xff] }
 0x529   :  { %v7678_v55 = vld [vmem:[#allocation136_spill] sm:$0xff] }
 0x52a   :  { %7658 = vst [vmem:[#allocation81_spill] sm:$0xff] %v5997_v57  ;;  %v2360_v19 = vpack.c.bf16 %v5997_v57, %v5997_v57  ;;  %v7677_v57 = vld [vmem:[#allocation135_spill] sm:$0xff] }
 0x52c   :  { %2404 = vmatprep.mubr.bf16.mxu0 %v2360_v19  ;;  %2445 = vmatprep.mubr.bf16.mxu1 %v2360_v19 }
 0x52d   :  { %2405 = vmatmul.mubr.bf16.vlgmr.msra.gmra.mxu0 %v6003_v17  ;;  %2446 = vmatmul.mubr.bf16.vlgmr.msra.gmra.mxu1 %v6003_v17 }
 0x52e   :  { %2455 = vmatpush1.bf16.msra.mxu0 %v7359_v25  ;;  %2496 = vmatpush1.bf16.msra.mxu1 %v7360_v41 }
 0x52f   :  { %2486 = vmatprep.mubr.bf16.mxu0 %v2360_v19  ;;  %2527 = vmatprep.mubr.bf16.mxu1 %v2360_v19  ;;  %v7676_v19 = vld [vmem:[#allocation134_spill] sm:$0xff] }
 0x530   :  { %2456 = vmatprep.subr.bf16.mxu0 %v7361_v24  ;;  %2497 = vmatprep.subr.bf16.mxu1 %v7362_v58 }
 0x532   :  { %2457 = vmatpush1.bf16.msra.mxu0 %v7363_v39  ;;  %2498 = vmatpush1.bf16.msra.mxu1 %v7364_v40 }
 0x533   :  { %2458 = vmatprep.subr.bf16.mxu0 %v7365_v51  ;;  %2499 = vmatprep.subr.bf16.mxu1 %v7366_v46 }
 0x536   :  { %2459 = vmatpush1.bf16.msra.mxu0 %v7367_v61  ;;  %2500 = vmatpush1.bf16.msra.mxu1 %v7368_v5 }
 0x537   :  { %2460 = vmatprep.subr.bf16.mxu0 %v7369_v9  ;;  %2501 = vmatprep.subr.bf16.mxu1 %v7370_v1 }
 0x53a   :  { %2461 = vmatpush1.bf16.msra.mxu0 %v7371_v60  ;;  %2502 = vmatpush1.bf16.msra.mxu1 %v7372_v0 }
 0x53b   :  { %2462 = vmatprep.subr.bf16.mxu0 %v7373_v8  ;;  %2503 = vmatprep.subr.bf16.mxu1 %v7374_v10 }
 0x53e   :  { %2463 = vmatpush1.bf16.msra.mxu0 %v7375_v18  ;;  %2504 = vmatpush1.bf16.msra.mxu1 %v7376_v45 }
 0x53f   :  { %2464 = vmatprep.subr.bf16.mxu0 %v7465_v13  ;;  %2505 = vmatprep.subr.bf16.mxu1 %v7466_v28 }
 0x542   :  { %2465 = vmatpush1.bf16.msra.mxu0 %v7467_v22  ;;  %2506 = vmatpush1.bf16.msra.mxu1 %v7468_v29 }
 0x543   :  { %2466 = vmatprep.subr.bf16.mxu0 %v7469_v30  ;;  %2507 = vmatprep.subr.bf16.mxu1 %v7470_v37 }
 0x546   :  { %2467 = vmatpush1.bf16.msra.mxu0 %v7471_v12  ;;  %2508 = vmatpush1.bf16.msra.mxu1 %v7472_v11 }
 0x547   :  { %2468 = vmatprep.subr.bf16.mxu0 %v7473_v14  ;;  %2509 = vmatprep.subr.bf16.mxu1 %v7474_v38 }
 0x54a   :  { %2469 = vmatpush1.bf16.msra.mxu0 %v7475_v27  ;;  %2510 = vmatpush1.bf16.msra.mxu1 %v7476_v43 }
 0x54b   :  { %2470 = vmatprep.subr.bf16.mxu0 %v7562_v3  ;;  %2511 = vmatprep.subr.bf16.mxu1 %v7478_v47 }
 0x54e   :  { %2471 = vmatpush2.bf16.msra.mxu0 %v7479_v21  ;;  %2512 = vmatpush2.bf16.msra.mxu1 %v7480_v35 }
 0x54f   :  { %2472 = vmatprep.subr.bf16.mxu0 %v7481_v62  ;;  %2513 = vmatprep.subr.bf16.mxu1 %v7482_v15 }
 0x552   :  { %2473 = vmatpush2.bf16.msra.mxu0 %v7483_v36  ;;  %2514 = vmatpush2.bf16.msra.mxu1 %v7396_v23 }
 0x553   :  { %2474 = vmatprep.subr.bf16.mxu0 %v7397_v59  ;;  %2515 = vmatprep.subr.bf16.mxu1 %v7398_v50 }
 0x556   :  { %2475 = vmatpush2.bf16.msra.mxu0 %v7484_v20  ;;  %2516 = vmatpush2.bf16.msra.mxu1 %v7659_v16 }
 0x557   :  { %2476 = vmatprep.subr.bf16.mxu0 %v7660_v63  ;;  %2517 = vmatprep.subr.bf16.mxu1 %v7661_v52 }
 0x55a   :  { %2477 = vmatpush2.bf16.msra.mxu0 %v7662_v54  ;;  %2518 = vmatpush2.bf16.msra.mxu1 %v7663_v4  ;;  %v7748_v4 = vld [vmem:[#allocation155_spill] sm:$0xff] }
 0x55b   :  { %2478 = vmatprep.subr.bf16.mxu0 %v7664_v6  ;;  %2519 = vmatprep.subr.bf16.mxu1 %v7665_v56  ;;  %v7746_v56 = vld [vmem:[#allocation153_spill] sm:$0xff]  ;;  %v7747_v6 = vld [vmem:[#allocation154_spill] sm:$0xff] }
 0x55e   :  { %2479 = vmatpush2.bf16.msra.mxu0 %v7666_v33  ;;  %2520 = vmatpush2.bf16.msra.mxu1 %v7667_v31 }
 0x55f   :  { %2480 = vmatprep.subr.bf16.mxu0 %v7668_v53  ;;  %2521 = vmatprep.subr.bf16.mxu1 %v7669_v7  ;;  %v7679_v53 = vld [vmem:[#allocation137_spill] sm:$0xff]  ;;  %v7680_v7 = vld [vmem:[#allocation10_spill] sm:$0xff] }
 0x562   :  { %2481 = vmatpush2.bf16.msra.mxu0 %v7670_v2  ;;  %2522 = vmatpush2.bf16.msra.mxu1 %v7671_v48  ;;  %v7681_v2 = vld [vmem:[#allocation11_spill] sm:$0xff] }
 0x563   :  { %2482 = vmatprep.subr.bf16.mxu0 %v7672_v34  ;;  %2523 = vmatprep.subr.bf16.mxu1 %v7673_v42  ;;  %v7682_v42 = vld [vmem:[#allocation12_spill] sm:$0xff]  ;;  %v7691_v34 = vld [vmem:[#allocation21_spill] sm:$0xff] }
 0x566   :  { %2483 = vmatpush2.bf16.msra.mxu0 %v7674_v49  ;;  %2524 = vmatpush2.bf16.msra.mxu1 %v7675_v44  ;;  %v7683_v49 = vld [vmem:[#allocation13_spill] sm:$0xff]  ;;  %v7684_v44 = vld [vmem:[#allocation14_spill] sm:$0xff] }
 0x567   :  { %2484 = vmatprep.subr.bf16.mxu0 %v7676_v19  ;;  %2525 = vmatprep.subr.bf16.mxu1 %v7677_v57  ;;  %v7685_v19 = vld [vmem:[#allocation15_spill] sm:$0xff]  ;;  %v7686_v57 = vld [vmem:[#allocation16_spill] sm:$0xff] }
 0x56a   :  { %2485 = vmatpush2.bf16.msra.mxu0 %v7678_v55  ;;  %2526 = vmatpush2.bf16.msra.mxu1 %v7679_v53  ;;  %v7687_v55 = vld [vmem:[#allocation17_spill] sm:$0xff]  ;;  %v7688_v53 = vld [vmem:[#allocation18_spill] sm:$0xff] }
 0x56b   :  { %2607 = vmatprep.subr.bf16.mxu0 %v7680_v7  ;;  %2648 = vmatprep.subr.bf16.mxu1 %v7681_v2  ;;  %v7689_v7 = vld [vmem:[#allocation19_spill] sm:$0xff]  ;;  %v7690_v2 = vld [vmem:[#allocation20_spill] sm:$0xff] }
 0x56d   :  { %2487 = vmatmul.mubr.bf16.vlgmr.msra.gmra.mxu0 %v6003_v17  ;;  %2528 = vmatmul.mubr.bf16.vlgmr.msra.gmra.mxu1 %v6003_v17  ;;  %v7692_v17 = vld [vmem:[#allocation22_spill] sm:$0xff] }
 0x56e   :  { %2608 = vmatpush1.bf16.msra.mxu0 %v7682_v42  ;;  %2649 = vmatpush1.bf16.msra.mxu1 %v7683_v49  ;;  %v7693_v42 = vld [vmem:[#allocation23_spill] sm:$0xff]  ;;  %v7694_v49 = vld [vmem:[#allocation24_spill] sm:$0xff] }
 0x56f   :  { %2609 = vmatprep.subr.bf16.mxu0 %v7684_v44  ;;  %2650 = vmatprep.subr.bf16.mxu1 %v7685_v19  ;;  %v7695_v44 = vld [vmem:[#allocation25_spill] sm:$0xff]  ;;  %v7696_v19 = vld [vmem:[#allocation26_spill] sm:$0xff] }
 0x572   :  { %2610 = vmatpush1.bf16.msra.mxu0 %v7686_v57  ;;  %2651 = vmatpush1.bf16.msra.mxu1 %v7687_v55  ;;  %v7697_v57 = vld [vmem:[#allocation27_spill] sm:$0xff]  ;;  %v7698_v55 = vld [vmem:[#allocation28_spill] sm:$0xff] }
 0x573   :  { %2611 = vmatprep.subr.bf16.mxu0 %v7688_v53  ;;  %2652 = vmatprep.subr.bf16.mxu1 %v7689_v7  ;;  %v7699_v53 = vld [vmem:[#allocation29_spill] sm:$0xff]  ;;  %v7700_v7 = vld [vmem:[#allocation30_spill] sm:$0xff] }
 0x576   :  { %2612 = vmatpush1.bf16.msra.mxu0 %v7690_v2  ;;  %2653 = vmatpush1.bf16.msra.mxu1 %v7691_v34  ;;  %v7701_v2 = vld [vmem:[#allocation31_spill] sm:$0xff]  ;;  %v7702_v34 = vld [vmem:[#allocation32_spill] sm:$0xff] }
 0x577   :  { %2613 = vmatprep.subr.bf16.mxu0 %v7692_v17  ;;  %2654 = vmatprep.subr.bf16.mxu1 %v7693_v42  ;;  %v7703_v17 = vld [vmem:[#allocation33_spill] sm:$0xff]  ;;  %v7704_v42 = vld [vmem:[#allocation34_spill] sm:$0xff] }
 0x57a   :  { %2614 = vmatpush1.bf16.msra.mxu0 %v7694_v49  ;;  %2655 = vmatpush1.bf16.msra.mxu1 %v7695_v44  ;;  %v7705_v49 = vld [vmem:[#allocation35_spill] sm:$0xff]  ;;  %v7706_v44 = vld [vmem:[#allocation36_spill] sm:$0xff] }
 0x57b   :  { %2615 = vmatprep.subr.bf16.mxu0 %v7696_v19  ;;  %2656 = vmatprep.subr.bf16.mxu1 %v7697_v57  ;;  %v7707_v19 = vld [vmem:[#allocation37_spill] sm:$0xff]  ;;  %v7708_v57 = vld [vmem:[#allocation38_spill] sm:$0xff] }
 0x57e   :  { %2616 = vmatpush1.bf16.msra.mxu0 %v7698_v55  ;;  %2657 = vmatpush1.bf16.msra.mxu1 %v7699_v53  ;;  %v7709_v55 = vld [vmem:[#allocation39_spill] sm:$0xff]  ;;  %v7710_v53 = vld [vmem:[#allocation40_spill] sm:$0xff] }
 0x57f   :  { %2617 = vmatprep.subr.bf16.mxu0 %v7700_v7  ;;  %2658 = vmatprep.subr.bf16.mxu1 %v7701_v2  ;;  %v7711_v7 = vld [vmem:[#allocation41_spill] sm:$0xff]  ;;  %v7712_v2 = vld [vmem:[#allocation42_spill] sm:$0xff] }
 0x582   :  { %2618 = vmatpush1.bf16.msra.mxu0 %v7702_v34  ;;  %2659 = vmatpush1.bf16.msra.mxu1 %v7703_v17  ;;  %v7713_v34 = vld [vmem:[#allocation43_spill] sm:$0xff]  ;;  %v7714_v17 = vld [vmem:[#allocation44_spill] sm:$0xff] }
 0x583   :  { %2619 = vmatprep.subr.bf16.mxu0 %v7704_v42  ;;  %2660 = vmatprep.subr.bf16.mxu1 %v7705_v49  ;;  %v7715_v42 = vld [vmem:[#allocation45_spill] sm:$0xff]  ;;  %v7716_v49 = vld [vmem:[#allocation46_spill] sm:$0xff] }
 0x586   :  { %2620 = vmatpush1.bf16.msra.mxu0 %v7706_v44  ;;  %2661 = vmatpush1.bf16.msra.mxu1 %v7707_v19  ;;  %v7717_v44 = vld [vmem:[#allocation47_spill] sm:$0xff]  ;;  %v7718_v19 = vld [vmem:[#allocation48_spill] sm:$0xff] }
 0x587   :  { %2621 = vmatprep.subr.bf16.mxu0 %v7708_v57  ;;  %2662 = vmatprep.subr.bf16.mxu1 %v7709_v55  ;;  %v7719_v57 = vld [vmem:[#allocation49_spill] sm:$0xff]  ;;  %v7720_v55 = vld [vmem:[#allocation50_spill] sm:$0xff] }
 0x58a   :  { %2622 = vmatpush1.bf16.msra.mxu0 %v7710_v53  ;;  %2663 = vmatpush1.bf16.msra.mxu1 %v7711_v7  ;;  %v7721_v53 = vld [vmem:[#allocation51_spill] sm:$0xff]  ;;  %v7722_v7 = vld [vmem:[#allocation52_spill] sm:$0xff] }
 0x58b   :  { %2623 = vmatprep.subr.bf16.mxu0 %v7712_v2  ;;  %2664 = vmatprep.subr.bf16.mxu1 %v7713_v34  ;;  %v7723_v2 = vld [vmem:[#allocation53_spill] sm:$0xff]  ;;  %v7724_v34 = vld [vmem:[#allocation54_spill] sm:$0xff] }
 0x58e   :  { %2624 = vmatpush2.bf16.msra.mxu0 %v7714_v17  ;;  %2665 = vmatpush2.bf16.msra.mxu1 %v7715_v42  ;;  %v7725_v17 = vld [vmem:[#allocation55_spill] sm:$0xff]  ;;  %v7726_v42 = vld [vmem:[#allocation56_spill] sm:$0xff] }
 0x58f   :  { %2625 = vmatprep.subr.bf16.mxu0 %v7716_v49  ;;  %2666 = vmatprep.subr.bf16.mxu1 %v7717_v44  ;;  %v7727_v49 = vld [vmem:[#allocation57_spill] sm:$0xff]  ;;  %v7728_v44 = vld [vmem:[#allocation58_spill] sm:$0xff] }
 0x592   :  { %2626 = vmatpush2.bf16.msra.mxu0 %v7718_v19  ;;  %2667 = vmatpush2.bf16.msra.mxu1 %v7719_v57  ;;  %v7729_v19 = vld [vmem:[#allocation59_spill] sm:$0xff]  ;;  %v7730_v57 = vld [vmem:[#allocation60_spill] sm:$0xff] }
 0x593   :  { %2627 = vmatprep.subr.bf16.mxu0 %v7720_v55  ;;  %2668 = vmatprep.subr.bf16.mxu1 %v7721_v53  ;;  %v7731_v55 = vld [vmem:[#allocation61_spill] sm:$0xff]  ;;  %v7732_v53 = vld [vmem:[#allocation62_spill] sm:$0xff] }
 0x596   :  { %2628 = vmatpush2.bf16.msra.mxu0 %v7722_v7  ;;  %2669 = vmatpush2.bf16.msra.mxu1 %v7723_v2  ;;  %v7733_v7 = vld [vmem:[#allocation63_spill] sm:$0xff]  ;;  %v7734_v2 = vld [vmem:[#allocation64_spill] sm:$0xff] }
 0x597   :  { %2629 = vmatprep.subr.bf16.mxu0 %v7724_v34  ;;  %2670 = vmatprep.subr.bf16.mxu1 %v7725_v17  ;;  %v7735_v34 = vld [vmem:[#allocation65_spill] sm:$0xff]  ;;  %v7736_v17 = vld [vmem:[#allocation66_spill] sm:$0xff] }
 0x59a   :  { %2630 = vmatpush2.bf16.msra.mxu0 %v7726_v42  ;;  %2671 = vmatpush2.bf16.msra.mxu1 %v7727_v49  ;;  %v7737_v42 = vld [vmem:[#allocation67_spill] sm:$0xff]  ;;  %v7738_v49 = vld [vmem:[#allocation68_spill] sm:$0xff] }
 0x59b   :  { %2631 = vmatprep.subr.bf16.mxu0 %v7728_v44  ;;  %2672 = vmatprep.subr.bf16.mxu1 %v7729_v19  ;;  %v7739_v44 = vld [vmem:[#allocation69_spill] sm:$0xff]  ;;  %v7740_v19 = vld [vmem:[#allocation70_spill] sm:$0xff] }
 0x59e   :  { %2632 = vmatpush2.bf16.msra.mxu0 %v7730_v57  ;;  %2673 = vmatpush2.bf16.msra.mxu1 %v7731_v55  ;;  %v7741_v57 = vld [vmem:[#allocation71_spill] sm:$0xff]  ;;  %v7742_v55 = vld [vmem:[#allocation72_spill] sm:$0xff] }
 0x59f   :  { %2633 = vmatprep.subr.bf16.mxu0 %v7732_v53  ;;  %2674 = vmatprep.subr.bf16.mxu1 %v7733_v7  ;;  %v7743_v53 = vld [vmem:[#allocation73_spill] sm:$0xff]  ;;  %v7744_v7 = vld [vmem:[#allocation74_spill] sm:$0xff] }
 0x5a2   :  { %2634 = vmatpush2.bf16.msra.mxu0 %v7734_v2  ;;  %2675 = vmatpush2.bf16.msra.mxu1 %v7735_v34  ;;  %v7745_v2 = vld [vmem:[#allocation75_spill] sm:$0xff] }
 0x5a3   :  { %2635 = vmatprep.subr.bf16.mxu0 %v7736_v17  ;;  %2676 = vmatprep.subr.bf16.mxu1 %v7737_v42 }
 0x5a6   :  { %2636 = vmatpush2.bf16.msra.mxu0 %v7738_v49  ;;  %2677 = vmatpush2.bf16.msra.mxu1 %v7739_v44 }
 0x5a7   :  { %2637 = vmatprep.subr.bf16.mxu0 %v7740_v19  ;;  %2678 = vmatprep.subr.bf16.mxu1 %v7741_v57 }
 0x5aa   :  { %2638 = vmatpush2.bf16.msra.mxu0 %v7742_v55  ;;  %2679 = vmatpush2.bf16.msra.mxu1 %v7743_v53  ;;  %v7749_v53 = vld [vmem:[#allocation156_spill] sm:$0xff] }
 0x5ab   :  { %2689 = vmatprep.subr.bf16.mxu0 %v7744_v7  ;;  %2730 = vmatprep.subr.bf16.mxu1 %v7745_v2 }
 0x5ed   :  { %v2406_v34 = vpop.f32.mrf.mxu0  ;;  %v2447_v17 = vpop.f32.mrf.mxu1 }
 0x5ee   :  { %v2536_v19 = vadd.f32 %v2406_v34, %v7746_v56  ;;  %v2538_v57 = vadd.f32 %v2447_v17, %v7747_v6 }
 0x5ef   :  { %v2408_v48 = vpop.f32.mrf.mxu0  ;;  %v2449_v42 = vpop.f32.mrf.mxu1 }
 0x5f0   :  { %v2537_v55 = vadd.f32 %v2408_v48, %v7748_v4  ;;  %v4136_v54 = vmul.f32 -1.442695, %v2536_v19  ;;  %v2539_v52 = vadd.f32 %v2449_v42, %v7749_v53  ;;  %v4138_v7 = vmul.f32 -1.442695, %v2538_v57  ;;  %v7750_v53 = vld [vmem:[#allocation181_spill] sm:$0xff]  ;;  %v7753_v19 = vld [vmem:[#allocation184_spill] sm:$0xff] }
 0x5f1   :  { %v2410_v31 = vpop.f32.mrf.mxu0  ;;  %v2451_v49 = vpop.f32.mrf.mxu1 }
 0x5f2   :  { %v4137_v63 = vmul.f32 -1.442695, %v2537_v55  ;;  %4312 = vpow2.f32 %v4136_v54  ;;  %v4139_v2 = vmul.f32 -1.442695, %v2539_v52  ;;  %v7751_v55 = vld [vmem:[#allocation182_spill] sm:$0xff] }
 0x5f3   :  { %v2411_v33 = vpop.f32.mrf.mxu0  ;;  %v2452_v44 = vpop.f32.mrf.mxu1  ;;  %4314 = vpow2.f32 %v4138_v7 }
 0x5f4   :  { %4316 = vpow2.f32 %v4137_v63 }
 0x5f5   :  { %4318 = vpow2.f32 %v4139_v2  ;;  %v7752_v2 = vld [vmem:[#allocation183_spill] sm:$0xff] }
 0x5ff   :  { %v4313_v31 = vpop.eup %4312 }
 0x600   :  { %v4315_v49 = vpop.eup %4314  ;;  %v2550_v44 = vadd.f32 1.0, %v4313_v31 }
 0x601   :  { %v4317_v33 = vpop.eup %4316  ;;  %v2562_v56 = vadd.f32 1.0, %v4315_v49 }
 0x602   :  { %v4319_v16 = vpop.eup %4318  ;;  %v2551_v34 = vadd.f32 1.0, %v4317_v33  ;;  %4320 = vrcp.f32 %v2550_v44 }
 0x603   :  { %v2563_v6 = vadd.f32 1.0, %v4319_v16  ;;  %4322 = vrcp.f32 %v2562_v56 }
 0x604   :  { %4324 = vrcp.f32 %v2551_v34 }
 0x60f   :  { %v4321_v56 = vpop.eup %4320 }
 0x62d   :  { %v2488_v4 = vpop.f32.mrf.mxu0  ;;  %v2529_v48 = vpop.f32.mrf.mxu1 }
 0x62e   :  { %v2540_v57 = vadd.f32 %v2488_v4, %v7750_v53  ;;  %v2542_v54 = vadd.f32 %v2529_v48, %v7751_v55  ;;  %v4323_v4 = vpop.eup %4322 }
 0x62f   :  { %v2490_v52 = vpop.f32.mrf.mxu0  ;;  %v2531_v63 = vpop.f32.mrf.mxu1 }
 0x630   :  { %4326 = vtanh.f32 %v2540_v57  ;;  %v4140_v7 = vmul.f32 -1.442695, %v2542_v54  ;;  %v2541_v42 = vadd.f32 %v2490_v52, %v7752_v2  ;;  %v2543_v17 = vadd.f32 %v2531_v63, %v7753_v19  ;;  %v4325_v34 = vpop.eup %4324 }
 0x631   :  { %4328 = vrcp.f32 %v2563_v6  ;;  %v2492_v31 = vpop.f32.mrf.mxu0  ;;  %v2533_v49 = vpop.f32.mrf.mxu1  ;;  %v2582_v57 = vmul.f32 %v4323_v4, %v5988_v32  ;;  %v7756_v4 = vld [vmem:[#allocation117_spill] sm:$0xff] }
 0x632   :  { %4330 = vpow2.f32 %v4140_v7  ;;  %v4141_v16 = vmul.f32 -1.442695, %v2543_v17 }
 0x633   :  { %4332 = vtanh.f32 %v2541_v42  ;;  %v2493_v33 = vpop.f32.mrf.mxu0  ;;  %v2534_v44 = vpop.f32.mrf.mxu1 }
 0x634   :  { %4334 = vpow2.f32 %v4141_v16 }
 0x63d   :  { %v4327_v48 = vpop.eup %4326 }
 0x63e   :  { %v4329_v53 = vpop.eup %4328  ;;  %v2584_v55 = vmul.f32 %v4327_v48, %v4321_v56  ;;  %v7758_v48 = vld [vmem:[#allocation119_spill] sm:$0xff] }
 0x63f   :  { %v4331_v54 = vpop.eup %4330  ;;  %v2583_v7 = vmul.f32 %v4329_v53, %v5992_v26  ;;  %v7759_v53 = vld [vmem:[#allocation120_spill] sm:$0xff] }
 0x640   :  { %v4333_v52 = vpop.eup %4332  ;;  %v6146_v63 = vadd.f32 %v2584_v55, %v2582_v57  ;;  %v2576_v6 = vadd.f32 1.0, %v4331_v54  ;;  %v7760_v57 = vld [vmem:[#allocation121_spill] sm:$0xff]  ;;  %v7761_v55 = vld [vmem:[#allocation122_spill] sm:$0xff]  ;;  %v7762_v54 = vld [vmem:[#allocation123_spill] sm:$0xff] }
 0x641   :  { %v4335_v2 = vpop.eup %4334  ;;  %v2585_v42 = vmul.f32 %v4333_v52, %v4325_v34  ;;  %v7757_v34 = vld [vmem:[#allocation118_spill] sm:$0xff]  ;;  %v7763_v52 = vld [vmem:[#allocation124_spill] sm:$0xff] }
 0x642   :  { %4336 = vtanh.f32 %v6146_v63  ;;  %v2577_v19 = vadd.f32 1.0, %v4335_v2  ;;  %v7765_v2 = vld [vmem:[#allocation126_spill] sm:$0xff] }
 0x643   :  { %4338 = vrcp.f32 %v2576_v6  ;;  %v6150_v17 = vadd.f32 %v2585_v42, %v2583_v7  ;;  %v7764_v6 = vld [vmem:[#allocation125_spill] sm:$0xff]  ;;  %v7766_v7 = vld [vmem:[#allocation127_spill] sm:$0xff]  ;;  %v7767_v42 = vld [vmem:[#allocation128_spill] sm:$0xff] }
 0x644   :  { %4340 = vrcp.f32 %v2577_v19  ;;  %v7768_v19 = vld [vmem:[#allocation129_spill] sm:$0xff] }
 0x645   :  { %4342 = vtanh.f32 %v6150_v17 }
 0x64f   :  { %v4337_v32 = vpop.eup %4336 }
 0x650   :  { %v4339_v31 = vpop.eup %4338 }
 0x651   :  { %v4341_v49 = vpop.eup %4340  ;;  %v6153_v33 = vmul.f32 %v4339_v31, %v4337_v32  ;;  %v7769_v32 = vld [vmem:[#allocation130_spill] sm:$0xff]  ;;  %v7770_v31 = vld [vmem:[#allocation131_spill] sm:$0xff] }
 0x652   :  { %v4343_v16 = vpop.eup %4342 }
 0x653   :  { %7754 = vst [vmem:[#allocation82_spill] sm:$0xff] %v6153_v33  ;;  %v6155_v44 = vmul.f32 %v4343_v16, %v4341_v49  ;;  %v6161_v56 = vpack.c.bf16 %v6153_v33, %v6153_v33  ;;  %v7771_v49 = vld [vmem:[#allocation132_spill] sm:$0xff]  ;;  %v7772_v16 = vld [vmem:[#allocation133_spill] sm:$0xff] }
 0x654   :  { %v7775_v33 = vld [vmem:[#allocation136_spill] sm:$0xff] }
 0x655   :  { %7755 = vst [vmem:[#allocation83_spill] sm:$0xff] %v6155_v44  ;;  %v2595_v26 = vpack.c.bf16 %v6155_v44, %v6155_v44  ;;  %v7774_v44 = vld [vmem:[#allocation135_spill] sm:$0xff] }
 0x657   :  { %2639 = vmatprep.mubr.bf16.mxu0 %v2595_v26  ;;  %2680 = vmatprep.mubr.bf16.mxu1 %v2595_v26 }
 0x658   :  { %2640 = vmatmul.mubr.bf16.vlgmr.msra.gmra.mxu0 %v6161_v56  ;;  %2681 = vmatmul.mubr.bf16.vlgmr.msra.gmra.mxu1 %v6161_v56 }
 0x659   :  { %2690 = vmatpush1.bf16.msra.mxu0 %v7359_v25  ;;  %2731 = vmatpush1.bf16.msra.mxu1 %v7360_v41 }
 0x65a   :  { %2721 = vmatprep.mubr.bf16.mxu0 %v2595_v26  ;;  %2762 = vmatprep.mubr.bf16.mxu1 %v2595_v26  ;;  %v7773_v26 = vld [vmem:[#allocation134_spill] sm:$0xff] }
 0x65b   :  { %2691 = vmatprep.subr.bf16.mxu0 %v7361_v24  ;;  %2732 = vmatprep.subr.bf16.mxu1 %v7362_v58 }
 0x65d   :  { %2692 = vmatpush1.bf16.msra.mxu0 %v7363_v39  ;;  %2733 = vmatpush1.bf16.msra.mxu1 %v7364_v40 }
 0x65e   :  { %2693 = vmatprep.subr.bf16.mxu0 %v7365_v51  ;;  %2734 = vmatprep.subr.bf16.mxu1 %v7366_v46 }
 0x661   :  { %2694 = vmatpush1.bf16.msra.mxu0 %v7367_v61  ;;  %2735 = vmatpush1.bf16.msra.mxu1 %v7368_v5 }
 0x662   :  { %2695 = vmatprep.subr.bf16.mxu0 %v7369_v9  ;;  %2736 = vmatprep.subr.bf16.mxu1 %v7370_v1 }
 0x665   :  { %2696 = vmatpush1.bf16.msra.mxu0 %v7371_v60  ;;  %2737 = vmatpush1.bf16.msra.mxu1 %v7372_v0 }
 0x666   :  { %2697 = vmatprep.subr.bf16.mxu0 %v7373_v8  ;;  %2738 = vmatprep.subr.bf16.mxu1 %v7374_v10 }
 0x669   :  { %2698 = vmatpush1.bf16.msra.mxu0 %v7375_v18  ;;  %2739 = vmatpush1.bf16.msra.mxu1 %v7376_v45 }
 0x66a   :  { %2699 = vmatprep.subr.bf16.mxu0 %v7465_v13  ;;  %2740 = vmatprep.subr.bf16.mxu1 %v7466_v28 }
 0x66d   :  { %2700 = vmatpush1.bf16.msra.mxu0 %v7467_v22  ;;  %2741 = vmatpush1.bf16.msra.mxu1 %v7468_v29 }
 0x66e   :  { %2701 = vmatprep.subr.bf16.mxu0 %v7469_v30  ;;  %2742 = vmatprep.subr.bf16.mxu1 %v7470_v37 }
 0x671   :  { %2702 = vmatpush1.bf16.msra.mxu0 %v7471_v12  ;;  %2743 = vmatpush1.bf16.msra.mxu1 %v7472_v11 }
 0x672   :  { %2703 = vmatprep.subr.bf16.mxu0 %v7473_v14  ;;  %2744 = vmatprep.subr.bf16.mxu1 %v7474_v38 }
 0x675   :  { %2704 = vmatpush1.bf16.msra.mxu0 %v7475_v27  ;;  %2745 = vmatpush1.bf16.msra.mxu1 %v7476_v43 }
 0x676   :  { %2705 = vmatprep.subr.bf16.mxu0 %v7562_v3  ;;  %2746 = vmatprep.subr.bf16.mxu1 %v7478_v47 }
 0x679   :  { %2706 = vmatpush2.bf16.msra.mxu0 %v7479_v21  ;;  %2747 = vmatpush2.bf16.msra.mxu1 %v7480_v35 }
 0x67a   :  { %2707 = vmatprep.subr.bf16.mxu0 %v7481_v62  ;;  %2748 = vmatprep.subr.bf16.mxu1 %v7482_v15 }
 0x67d   :  { %2708 = vmatpush2.bf16.msra.mxu0 %v7483_v36  ;;  %2749 = vmatpush2.bf16.msra.mxu1 %v7396_v23 }
 0x67e   :  { %2709 = vmatprep.subr.bf16.mxu0 %v7397_v59  ;;  %2750 = vmatprep.subr.bf16.mxu1 %v7398_v50 }
 0x681   :  { %2710 = vmatpush2.bf16.msra.mxu0 %v7484_v20  ;;  %2751 = vmatpush2.bf16.msra.mxu1 %v7756_v4 }
 0x682   :  { %2711 = vmatprep.subr.bf16.mxu0 %v7757_v34  ;;  %2752 = vmatprep.subr.bf16.mxu1 %v7758_v48 }
 0x685   :  { %2712 = vmatpush2.bf16.msra.mxu0 %v7759_v53  ;;  %2753 = vmatpush2.bf16.msra.mxu1 %v7760_v57  ;;  %v7845_v57 = vld [vmem:[#allocation159_spill] sm:$0xff] }
 0x686   :  { %2713 = vmatprep.subr.bf16.mxu0 %v7761_v55  ;;  %2754 = vmatprep.subr.bf16.mxu1 %v7762_v54  ;;  %v7843_v54 = vld [vmem:[#allocation157_spill] sm:$0xff]  ;;  %v7844_v55 = vld [vmem:[#allocation158_spill] sm:$0xff] }
 0x689   :  { %2714 = vmatpush2.bf16.msra.mxu0 %v7763_v52  ;;  %2755 = vmatpush2.bf16.msra.mxu1 %v7764_v6 }
 0x68a   :  { %2715 = vmatprep.subr.bf16.mxu0 %v7765_v2  ;;  %2756 = vmatprep.subr.bf16.mxu1 %v7766_v7  ;;  %v7776_v2 = vld [vmem:[#allocation137_spill] sm:$0xff]  ;;  %v7777_v7 = vld [vmem:[#allocation10_spill] sm:$0xff] }
 0x68d   :  { %2716 = vmatpush2.bf16.msra.mxu0 %v7767_v42  ;;  %2757 = vmatpush2.bf16.msra.mxu1 %v7768_v19  ;;  %v7778_v42 = vld [vmem:[#allocation11_spill] sm:$0xff] }
 0x68e   :  { %2717 = vmatprep.subr.bf16.mxu0 %v7769_v32  ;;  %2758 = vmatprep.subr.bf16.mxu1 %v7770_v31  ;;  %v7779_v31 = vld [vmem:[#allocation12_spill] sm:$0xff]  ;;  %v7788_v32 = vld [vmem:[#allocation21_spill] sm:$0xff] }
 0x691   :  { %2718 = vmatpush2.bf16.msra.mxu0 %v7771_v49  ;;  %2759 = vmatpush2.bf16.msra.mxu1 %v7772_v16  ;;  %v7780_v49 = vld [vmem:[#allocation13_spill] sm:$0xff]  ;;  %v7781_v16 = vld [vmem:[#allocation14_spill] sm:$0xff] }
 0x692   :  { %2719 = vmatprep.subr.bf16.mxu0 %v7773_v26  ;;  %2760 = vmatprep.subr.bf16.mxu1 %v7774_v44  ;;  %v7782_v26 = vld [vmem:[#allocation15_spill] sm:$0xff]  ;;  %v7783_v44 = vld [vmem:[#allocation16_spill] sm:$0xff] }
 0x695   :  { %2720 = vmatpush2.bf16.msra.mxu0 %v7775_v33  ;;  %2761 = vmatpush2.bf16.msra.mxu1 %v7776_v2  ;;  %v7784_v33 = vld [vmem:[#allocation17_spill] sm:$0xff]  ;;  %v7785_v2 = vld [vmem:[#allocation18_spill] sm:$0xff] }
 0x696   :  { %2842 = vmatprep.subr.bf16.mxu0 %v7777_v7  ;;  %2883 = vmatprep.subr.bf16.mxu1 %v7778_v42  ;;  %v7786_v7 = vld [vmem:[#allocation19_spill] sm:$0xff]  ;;  %v7787_v42 = vld [vmem:[#allocation20_spill] sm:$0xff] }
 0x698   :  { %2722 = vmatmul.mubr.bf16.vlgmr.msra.gmra.mxu0 %v6161_v56  ;;  %2763 = vmatmul.mubr.bf16.vlgmr.msra.gmra.mxu1 %v6161_v56  ;;  %v7789_v56 = vld [vmem:[#allocation22_spill] sm:$0xff] }
 0x699   :  { %2843 = vmatpush1.bf16.msra.mxu0 %v7779_v31  ;;  %2884 = vmatpush1.bf16.msra.mxu1 %v7780_v49  ;;  %v7790_v31 = vld [vmem:[#allocation23_spill] sm:$0xff]  ;;  %v7791_v49 = vld [vmem:[#allocation24_spill] sm:$0xff] }
 0x69a   :  { %2844 = vmatprep.subr.bf16.mxu0 %v7781_v16  ;;  %2885 = vmatprep.subr.bf16.mxu1 %v7782_v26  ;;  %v7792_v16 = vld [vmem:[#allocation25_spill] sm:$0xff]  ;;  %v7793_v26 = vld [vmem:[#allocation26_spill] sm:$0xff] }
 0x69d   :  { %2845 = vmatpush1.bf16.msra.mxu0 %v7783_v44  ;;  %2886 = vmatpush1.bf16.msra.mxu1 %v7784_v33  ;;  %v7794_v44 = vld [vmem:[#allocation27_spill] sm:$0xff]  ;;  %v7795_v33 = vld [vmem:[#allocation28_spill] sm:$0xff] }
 0x69e   :  { %2846 = vmatprep.subr.bf16.mxu0 %v7785_v2  ;;  %2887 = vmatprep.subr.bf16.mxu1 %v7786_v7  ;;  %v7796_v2 = vld [vmem:[#allocation29_spill] sm:$0xff]  ;;  %v7797_v7 = vld [vmem:[#allocation30_spill] sm:$0xff] }
 0x6a1   :  { %2847 = vmatpush1.bf16.msra.mxu0 %v7787_v42  ;;  %2888 = vmatpush1.bf16.msra.mxu1 %v7788_v32  ;;  %v7798_v42 = vld [vmem:[#allocation31_spill] sm:$0xff]  ;;  %v7799_v32 = vld [vmem:[#allocation32_spill] sm:$0xff] }
 0x6a2   :  { %2848 = vmatprep.subr.bf16.mxu0 %v7789_v56  ;;  %2889 = vmatprep.subr.bf16.mxu1 %v7790_v31  ;;  %v7800_v56 = vld [vmem:[#allocation33_spill] sm:$0xff]  ;;  %v7801_v31 = vld [vmem:[#allocation34_spill] sm:$0xff] }
 0x6a5   :  { %2849 = vmatpush1.bf16.msra.mxu0 %v7791_v49  ;;  %2890 = vmatpush1.bf16.msra.mxu1 %v7792_v16  ;;  %v7802_v49 = vld [vmem:[#allocation35_spill] sm:$0xff]  ;;  %v7803_v16 = vld [vmem:[#allocation36_spill] sm:$0xff] }
 0x6a6   :  { %2850 = vmatprep.subr.bf16.mxu0 %v7793_v26  ;;  %2891 = vmatprep.subr.bf16.mxu1 %v7794_v44  ;;  %v7804_v26 = vld [vmem:[#allocation37_spill] sm:$0xff]  ;;  %v7805_v44 = vld [vmem:[#allocation38_spill] sm:$0xff] }
 0x6a9   :  { %2851 = vmatpush1.bf16.msra.mxu0 %v7795_v33  ;;  %2892 = vmatpush1.bf16.msra.mxu1 %v7796_v2  ;;  %v7806_v33 = vld [vmem:[#allocation39_spill] sm:$0xff]  ;;  %v7807_v2 = vld [vmem:[#allocation40_spill] sm:$0xff] }
 0x6aa   :  { %2852 = vmatprep.subr.bf16.mxu0 %v7797_v7  ;;  %2893 = vmatprep.subr.bf16.mxu1 %v7798_v42  ;;  %v7808_v7 = vld [vmem:[#allocation41_spill] sm:$0xff]  ;;  %v7809_v42 = vld [vmem:[#allocation42_spill] sm:$0xff] }
 0x6ad   :  { %2853 = vmatpush1.bf16.msra.mxu0 %v7799_v32  ;;  %2894 = vmatpush1.bf16.msra.mxu1 %v7800_v56  ;;  %v7810_v32 = vld [vmem:[#allocation43_spill] sm:$0xff]  ;;  %v7811_v56 = vld [vmem:[#allocation44_spill] sm:$0xff] }
 0x6ae   :  { %2854 = vmatprep.subr.bf16.mxu0 %v7801_v31  ;;  %2895 = vmatprep.subr.bf16.mxu1 %v7802_v49  ;;  %v7812_v31 = vld [vmem:[#allocation45_spill] sm:$0xff]  ;;  %v7813_v49 = vld [vmem:[#allocation46_spill] sm:$0xff] }
 0x6b1   :  { %2855 = vmatpush1.bf16.msra.mxu0 %v7803_v16  ;;  %2896 = vmatpush1.bf16.msra.mxu1 %v7804_v26  ;;  %v7814_v16 = vld [vmem:[#allocation47_spill] sm:$0xff]  ;;  %v7815_v26 = vld [vmem:[#allocation48_spill] sm:$0xff] }
 0x6b2   :  { %2856 = vmatprep.subr.bf16.mxu0 %v7805_v44  ;;  %2897 = vmatprep.subr.bf16.mxu1 %v7806_v33  ;;  %v7816_v44 = vld [vmem:[#allocation49_spill] sm:$0xff]  ;;  %v7817_v33 = vld [vmem:[#allocation50_spill] sm:$0xff] }
 0x6b5   :  { %2857 = vmatpush1.bf16.msra.mxu0 %v7807_v2  ;;  %2898 = vmatpush1.bf16.msra.mxu1 %v7808_v7  ;;  %v7818_v2 = vld [vmem:[#allocation51_spill] sm:$0xff]  ;;  %v7819_v7 = vld [vmem:[#allocation52_spill] sm:$0xff] }
 0x6b6   :  { %2858 = vmatprep.subr.bf16.mxu0 %v7809_v42  ;;  %2899 = vmatprep.subr.bf16.mxu1 %v7810_v32  ;;  %v7820_v42 = vld [vmem:[#allocation53_spill] sm:$0xff]  ;;  %v7821_v32 = vld [vmem:[#allocation54_spill] sm:$0xff] }
 0x6b9   :  { %2859 = vmatpush2.bf16.msra.mxu0 %v7811_v56  ;;  %2900 = vmatpush2.bf16.msra.mxu1 %v7812_v31  ;;  %v7822_v56 = vld [vmem:[#allocation55_spill] sm:$0xff]  ;;  %v7823_v31 = vld [vmem:[#allocation56_spill] sm:$0xff] }
 0x6ba   :  { %2860 = vmatprep.subr.bf16.mxu0 %v7813_v49  ;;  %2901 = vmatprep.subr.bf16.mxu1 %v7814_v16  ;;  %v7824_v49 = vld [vmem:[#allocation57_spill] sm:$0xff]  ;;  %v7825_v16 = vld [vmem:[#allocation58_spill] sm:$0xff] }
 0x6bd   :  { %2861 = vmatpush2.bf16.msra.mxu0 %v7815_v26  ;;  %2902 = vmatpush2.bf16.msra.mxu1 %v7816_v44  ;;  %v7826_v26 = vld [vmem:[#allocation59_spill] sm:$0xff]  ;;  %v7827_v44 = vld [vmem:[#allocation60_spill] sm:$0xff] }
 0x6be   :  { %2862 = vmatprep.subr.bf16.mxu0 %v7817_v33  ;;  %2903 = vmatprep.subr.bf16.mxu1 %v7818_v2  ;;  %v7828_v33 = vld [vmem:[#allocation61_spill] sm:$0xff]  ;;  %v7829_v2 = vld [vmem:[#allocation62_spill] sm:$0xff] }
 0x6c1   :  { %2863 = vmatpush2.bf16.msra.mxu0 %v7819_v7  ;;  %2904 = vmatpush2.bf16.msra.mxu1 %v7820_v42  ;;  %v7830_v7 = vld [vmem:[#allocation63_spill] sm:$0xff]  ;;  %v7831_v42 = vld [vmem:[#allocation64_spill] sm:$0xff] }
 0x6c2   :  { %2864 = vmatprep.subr.bf16.mxu0 %v7821_v32  ;;  %2905 = vmatprep.subr.bf16.mxu1 %v7822_v56  ;;  %v7832_v32 = vld [vmem:[#allocation65_spill] sm:$0xff]  ;;  %v7833_v56 = vld [vmem:[#allocation66_spill] sm:$0xff] }
 0x6c5   :  { %2865 = vmatpush2.bf16.msra.mxu0 %v7823_v31  ;;  %2906 = vmatpush2.bf16.msra.mxu1 %v7824_v49  ;;  %v7834_v31 = vld [vmem:[#allocation67_spill] sm:$0xff]  ;;  %v7835_v49 = vld [vmem:[#allocation68_spill] sm:$0xff] }
 0x6c6   :  { %2866 = vmatprep.subr.bf16.mxu0 %v7825_v16  ;;  %2907 = vmatprep.subr.bf16.mxu1 %v7826_v26  ;;  %v7836_v16 = vld [vmem:[#allocation69_spill] sm:$0xff]  ;;  %v7837_v26 = vld [vmem:[#allocation70_spill] sm:$0xff] }
 0x6c9   :  { %2867 = vmatpush2.bf16.msra.mxu0 %v7827_v44  ;;  %2908 = vmatpush2.bf16.msra.mxu1 %v7828_v33  ;;  %v7838_v44 = vld [vmem:[#allocation71_spill] sm:$0xff]  ;;  %v7839_v33 = vld [vmem:[#allocation72_spill] sm:$0xff] }
 0x6ca   :  { %2868 = vmatprep.subr.bf16.mxu0 %v7829_v2  ;;  %2909 = vmatprep.subr.bf16.mxu1 %v7830_v7  ;;  %v7840_v2 = vld [vmem:[#allocation73_spill] sm:$0xff]  ;;  %v7841_v7 = vld [vmem:[#allocation74_spill] sm:$0xff] }
 0x6cd   :  { %2869 = vmatpush2.bf16.msra.mxu0 %v7831_v42  ;;  %2910 = vmatpush2.bf16.msra.mxu1 %v7832_v32  ;;  %v7842_v42 = vld [vmem:[#allocation75_spill] sm:$0xff] }
 0x6ce   :  { %2870 = vmatprep.subr.bf16.mxu0 %v7833_v56  ;;  %2911 = vmatprep.subr.bf16.mxu1 %v7834_v31 }
 0x6d1   :  { %2871 = vmatpush2.bf16.msra.mxu0 %v7835_v49  ;;  %2912 = vmatpush2.bf16.msra.mxu1 %v7836_v16 }
 0x6d2   :  { %2872 = vmatprep.subr.bf16.mxu0 %v7837_v26  ;;  %2913 = vmatprep.subr.bf16.mxu1 %v7838_v44 }
 0x6d5   :  { %2873 = vmatpush2.bf16.msra.mxu0 %v7839_v33  ;;  %2914 = vmatpush2.bf16.msra.mxu1 %v7840_v2  ;;  %v7846_v2 = vld [vmem:[#allocation160_spill] sm:$0xff] }
 0x6d6   :  { %2924 = vmatprep.subr.bf16.mxu0 %v7841_v7  ;;  %2965 = vmatprep.subr.bf16.mxu1 %v7842_v42 }
 0x718   :  { %v2641_v32 = vpop.f32.mrf.mxu0  ;;  %v2682_v56 = vpop.f32.mrf.mxu1 }
 0x719   :  { %v2771_v26 = vadd.f32 %v2641_v32, %v7843_v54  ;;  %v2773_v44 = vadd.f32 %v2682_v56, %v7844_v55 }
 0x71a   :  { %v2643_v19 = vpop.f32.mrf.mxu0  ;;  %v2684_v31 = vpop.f32.mrf.mxu1 }
 0x71b   :  { %v2772_v33 = vadd.f32 %v2643_v19, %v7845_v57  ;;  %v4142_v53 = vmul.f32 -1.442695, %v2771_v26  ;;  %v2774_v48 = vadd.f32 %v2684_v31, %v7846_v2  ;;  %v4144_v7 = vmul.f32 -1.442695, %v2773_v44  ;;  %v7847_v2 = vld [vmem:[#allocation185_spill] sm:$0xff]  ;;  %v7850_v26 = vld [vmem:[#allocation188_spill] sm:$0xff] }
 0x71c   :  { %v2645_v6 = vpop.f32.mrf.mxu0  ;;  %v2686_v49 = vpop.f32.mrf.mxu1 }
 0x71d   :  { %v4143_v34 = vmul.f32 -1.442695, %v2772_v33  ;;  %4344 = vpow2.f32 %v4142_v53  ;;  %v4145_v42 = vmul.f32 -1.442695, %v2774_v48  ;;  %v7848_v33 = vld [vmem:[#allocation186_spill] sm:$0xff] }
 0x71e   :  { %v2646_v52 = vpop.f32.mrf.mxu0  ;;  %v2687_v16 = vpop.f32.mrf.mxu1  ;;  %4346 = vpow2.f32 %v4144_v7 }
 0x71f   :  { %4348 = vpow2.f32 %v4143_v34 }
 0x720   :  { %4350 = vpow2.f32 %v4145_v42  ;;  %v7849_v42 = vld [vmem:[#allocation187_spill] sm:$0xff] }
 0x72a   :  { %v4345_v6 = vpop.eup %4344 }
 0x72b   :  { %v4347_v49 = vpop.eup %4346  ;;  %v2785_v16 = vadd.f32 1.0, %v4345_v6 }
 0x72c   :  { %v4349_v52 = vpop.eup %4348  ;;  %v2797_v54 = vadd.f32 1.0, %v4347_v49 }
 0x72d   :  { %v4351_v4 = vpop.eup %4350  ;;  %v2786_v32 = vadd.f32 1.0, %v4349_v52  ;;  %4352 = vrcp.f32 %v2785_v16 }
 0x72e   :  { %v2798_v55 = vadd.f32 1.0, %v4351_v4  ;;  %4354 = vrcp.f32 %v2797_v54 }
 0x72f   :  { %4356 = vrcp.f32 %v2786_v32 }
 0x73a   :  { %v4353_v54 = vpop.eup %4352 }
 0x758   :  { %v2723_v57 = vpop.f32.mrf.mxu0  ;;  %v2764_v19 = vpop.f32.mrf.mxu1 }
 0x759   :  { %v2775_v44 = vadd.f32 %v2723_v57, %v7847_v2  ;;  %v2777_v53 = vadd.f32 %v2764_v19, %v7848_v33  ;;  %v4355_v57 = vpop.eup %4354 }
 0x75a   :  { %v2725_v48 = vpop.f32.mrf.mxu0  ;;  %v2766_v34 = vpop.f32.mrf.mxu1 }
 0x75b   :  { %4358 = vtanh.f32 %v2775_v44  ;;  %v4146_v7 = vmul.f32 -1.442695, %v2777_v53  ;;  %v2776_v31 = vadd.f32 %v2725_v48, %v7849_v42  ;;  %v2778_v56 = vadd.f32 %v2766_v34, %v7850_v26  ;;  %v4357_v32 = vpop.eup %4356 }
 0x75c   :  { %4360 = vrcp.f32 %v2798_v55  ;;  %v2727_v6 = vpop.f32.mrf.mxu0  ;;  %v2768_v49 = vpop.f32.mrf.mxu1  ;;  %v2817_v44 = vmul.f32 %v4355_v57, %v6146_v63  ;;  %v7853_v57 = vld [vmem:[#allocation117_spill] sm:$0xff] }
 0x75d   :  { %4362 = vpow2.f32 %v4146_v7  ;;  %v4147_v4 = vmul.f32 -1.442695, %v2778_v56 }
 0x75e   :  { %4364 = vtanh.f32 %v2776_v31  ;;  %v2728_v52 = vpop.f32.mrf.mxu0  ;;  %v2769_v16 = vpop.f32.mrf.mxu1 }
 0x75f   :  { %4366 = vpow2.f32 %v4147_v4 }
 0x768   :  { %v4359_v19 = vpop.eup %4358 }
 0x769   :  { %v4361_v2 = vpop.eup %4360  ;;  %v2819_v33 = vmul.f32 %v4359_v19, %v4353_v54  ;;  %v7855_v19 = vld [vmem:[#allocation119_spill] sm:$0xff] }
 0x76a   :  { %v4363_v53 = vpop.eup %4362  ;;  %v2818_v7 = vmul.f32 %v4361_v2, %v6150_v17  ;;  %v7856_v2 = vld [vmem:[#allocation120_spill] sm:$0xff] }
 0x76b   :  { %v4365_v48 = vpop.eup %4364  ;;  %v6304_v34 = vadd.f32 %v2819_v33, %v2817_v44  ;;  %v2811_v55 = vadd.f32 1.0, %v4363_v53  ;;  %v7857_v44 = vld [vmem:[#allocation121_spill] sm:$0xff]  ;;  %v7858_v33 = vld [vmem:[#allocation122_spill] sm:$0xff]  ;;  %v7859_v53 = vld [vmem:[#allocation123_spill] sm:$0xff] }
 0x76c   :  { %v4367_v42 = vpop.eup %4366  ;;  %v2820_v31 = vmul.f32 %v4365_v48, %v4357_v32  ;;  %v7854_v32 = vld [vmem:[#allocation118_spill] sm:$0xff]  ;;  %v7860_v48 = vld [vmem:[#allocation124_spill] sm:$0xff] }
 0x76d   :  { %4368 = vtanh.f32 %v6304_v34  ;;  %v2812_v26 = vadd.f32 1.0, %v4367_v42  ;;  %v7862_v42 = vld [vmem:[#allocation126_spill] sm:$0xff] }
 0x76e   :  { %4370 = vrcp.f32 %v2811_v55  ;;  %v6308_v56 = vadd.f32 %v2820_v31, %v2818_v7  ;;  %v7861_v55 = vld [vmem:[#allocation125_spill] sm:$0xff]  ;;  %v7863_v7 = vld [vmem:[#allocation127_spill] sm:$0xff]  ;;  %v7864_v31 = vld [vmem:[#allocation128_spill] sm:$0xff] }
 0x76f   :  { %4372 = vrcp.f32 %v2812_v26  ;;  %v7865_v26 = vld [vmem:[#allocation129_spill] sm:$0xff] }
 0x770   :  { %4374 = vtanh.f32 %v6308_v56 }
 0x77a   :  { %v4369_v63 = vpop.eup %4368 }
 0x77b   :  { %v4371_v6 = vpop.eup %4370 }
 0x77c   :  { %v4373_v49 = vpop.eup %4372  ;;  %v6311_v52 = vmul.f32 %v4371_v6, %v4369_v63  ;;  %v7866_v63 = vld [vmem:[#allocation130_spill] sm:$0xff]  ;;  %v7867_v6 = vld [vmem:[#allocation131_spill] sm:$0xff] }
 0x77d   :  { %v4375_v4 = vpop.eup %4374 }
 0x77e   :  { %7851 = vst [vmem:[#allocation84_spill] sm:$0xff] %v6311_v52  ;;  %v6313_v16 = vmul.f32 %v4375_v4, %v4373_v49  ;;  %v6319_v54 = vpack.c.bf16 %v6311_v52, %v6311_v52  ;;  %v7868_v49 = vld [vmem:[#allocation132_spill] sm:$0xff]  ;;  %v7869_v4 = vld [vmem:[#allocation133_spill] sm:$0xff] }
 0x77f   :  { %v7872_v52 = vld [vmem:[#allocation136_spill] sm:$0xff] }
 0x780   :  { %7852 = vst [vmem:[#allocation85_spill] sm:$0xff] %v6313_v16  ;;  %v2830_v17 = vpack.c.bf16 %v6313_v16, %v6313_v16  ;;  %v7871_v16 = vld [vmem:[#allocation135_spill] sm:$0xff] }
 0x782   :  { %2874 = vmatprep.mubr.bf16.mxu0 %v2830_v17  ;;  %2915 = vmatprep.mubr.bf16.mxu1 %v2830_v17 }
 0x783   :  { %2875 = vmatmul.mubr.bf16.vlgmr.msra.gmra.mxu0 %v6319_v54  ;;  %2916 = vmatmul.mubr.bf16.vlgmr.msra.gmra.mxu1 %v6319_v54 }
 0x784   :  { %2925 = vmatpush1.bf16.msra.mxu0 %v7359_v25  ;;  %2966 = vmatpush1.bf16.msra.mxu1 %v7360_v41 }
 0x785   :  { %2956 = vmatprep.mubr.bf16.mxu0 %v2830_v17  ;;  %2997 = vmatprep.mubr.bf16.mxu1 %v2830_v17  ;;  %v7870_v17 = vld [vmem:[#allocation134_spill] sm:$0xff] }
 0x786   :  { %2926 = vmatprep.subr.bf16.mxu0 %v7361_v24  ;;  %2967 = vmatprep.subr.bf16.mxu1 %v7362_v58 }
 0x788   :  { %2927 = vmatpush1.bf16.msra.mxu0 %v7363_v39  ;;  %2968 = vmatpush1.bf16.msra.mxu1 %v7364_v40 }
 0x789   :  { %2928 = vmatprep.subr.bf16.mxu0 %v7365_v51  ;;  %2969 = vmatprep.subr.bf16.mxu1 %v7366_v46 }
 0x78c   :  { %2929 = vmatpush1.bf16.msra.mxu0 %v7367_v61  ;;  %2970 = vmatpush1.bf16.msra.mxu1 %v7368_v5 }
 0x78d   :  { %2930 = vmatprep.subr.bf16.mxu0 %v7369_v9  ;;  %2971 = vmatprep.subr.bf16.mxu1 %v7370_v1 }
 0x790   :  { %2931 = vmatpush1.bf16.msra.mxu0 %v7371_v60  ;;  %2972 = vmatpush1.bf16.msra.mxu1 %v7372_v0 }
 0x791   :  { %2932 = vmatprep.subr.bf16.mxu0 %v7373_v8  ;;  %2973 = vmatprep.subr.bf16.mxu1 %v7374_v10 }
 0x794   :  { %2933 = vmatpush1.bf16.msra.mxu0 %v7375_v18  ;;  %2974 = vmatpush1.bf16.msra.mxu1 %v7376_v45 }
 0x795   :  { %2934 = vmatprep.subr.bf16.mxu0 %v7465_v13  ;;  %2975 = vmatprep.subr.bf16.mxu1 %v7466_v28 }
 0x798   :  { %2935 = vmatpush1.bf16.msra.mxu0 %v7467_v22  ;;  %2976 = vmatpush1.bf16.msra.mxu1 %v7468_v29 }
 0x799   :  { %2936 = vmatprep.subr.bf16.mxu0 %v7469_v30  ;;  %2977 = vmatprep.subr.bf16.mxu1 %v7470_v37 }
 0x79c   :  { %2937 = vmatpush1.bf16.msra.mxu0 %v7471_v12  ;;  %2978 = vmatpush1.bf16.msra.mxu1 %v7472_v11 }
 0x79d   :  { %2938 = vmatprep.subr.bf16.mxu0 %v7473_v14  ;;  %2979 = vmatprep.subr.bf16.mxu1 %v7474_v38 }
 0x7a0   :  { %2939 = vmatpush1.bf16.msra.mxu0 %v7475_v27  ;;  %2980 = vmatpush1.bf16.msra.mxu1 %v7476_v43 }
 0x7a1   :  { %2940 = vmatprep.subr.bf16.mxu0 %v7562_v3  ;;  %2981 = vmatprep.subr.bf16.mxu1 %v7478_v47 }
 0x7a4   :  { %2941 = vmatpush2.bf16.msra.mxu0 %v7479_v21  ;;  %2982 = vmatpush2.bf16.msra.mxu1 %v7480_v35 }
 0x7a5   :  { %2942 = vmatprep.subr.bf16.mxu0 %v7481_v62  ;;  %2983 = vmatprep.subr.bf16.mxu1 %v7482_v15 }
 0x7a8   :  { %2943 = vmatpush2.bf16.msra.mxu0 %v7483_v36  ;;  %2984 = vmatpush2.bf16.msra.mxu1 %v7396_v23 }
 0x7a9   :  { %2944 = vmatprep.subr.bf16.mxu0 %v7397_v59  ;;  %2985 = vmatprep.subr.bf16.mxu1 %v7398_v50 }
 0x7ac   :  { %2945 = vmatpush2.bf16.msra.mxu0 %v7484_v20  ;;  %2986 = vmatpush2.bf16.msra.mxu1 %v7853_v57 }
 0x7ad   :  { %2946 = vmatprep.subr.bf16.mxu0 %v7854_v32  ;;  %2987 = vmatprep.subr.bf16.mxu1 %v7855_v19 }
 0x7b0   :  { %2947 = vmatpush2.bf16.msra.mxu0 %v7856_v2  ;;  %2988 = vmatpush2.bf16.msra.mxu1 %v7857_v44  ;;  %v7942_v44 = vld [vmem:[#allocation163_spill] sm:$0xff] }
 0x7b1   :  { %2948 = vmatprep.subr.bf16.mxu0 %v7858_v33  ;;  %2989 = vmatprep.subr.bf16.mxu1 %v7859_v53  ;;  %v7940_v53 = vld [vmem:[#allocation161_spill] sm:$0xff]  ;;  %v7941_v33 = vld [vmem:[#allocation162_spill] sm:$0xff] }
 0x7b4   :  { %2949 = vmatpush2.bf16.msra.mxu0 %v7860_v48  ;;  %2990 = vmatpush2.bf16.msra.mxu1 %v7861_v55 }
 0x7b5   :  { %2950 = vmatprep.subr.bf16.mxu0 %v7862_v42  ;;  %2991 = vmatprep.subr.bf16.mxu1 %v7863_v7  ;;  %v7873_v42 = vld [vmem:[#allocation137_spill] sm:$0xff]  ;;  %v7874_v7 = vld [vmem:[#allocation10_spill] sm:$0xff] }
 0x7b8   :  { %2951 = vmatpush2.bf16.msra.mxu0 %v7864_v31  ;;  %2992 = vmatpush2.bf16.msra.mxu1 %v7865_v26  ;;  %v7875_v31 = vld [vmem:[#allocation11_spill] sm:$0xff] }
 0x7b9   :  { %2952 = vmatprep.subr.bf16.mxu0 %v7866_v63  ;;  %2993 = vmatprep.subr.bf16.mxu1 %v7867_v6  ;;  %v7876_v6 = vld [vmem:[#allocation12_spill] sm:$0xff]  ;;  %v7885_v63 = vld [vmem:[#allocation21_spill] sm:$0xff] }
 0x7bc   :  { %2953 = vmatpush2.bf16.msra.mxu0 %v7868_v49  ;;  %2994 = vmatpush2.bf16.msra.mxu1 %v7869_v4  ;;  %v7877_v49 = vld [vmem:[#allocation13_spill] sm:$0xff]  ;;  %v7878_v4 = vld [vmem:[#allocation14_spill] sm:$0xff] }
 0x7bd   :  { %2954 = vmatprep.subr.bf16.mxu0 %v7870_v17  ;;  %2995 = vmatprep.subr.bf16.mxu1 %v7871_v16  ;;  %v7879_v17 = vld [vmem:[#allocation15_spill] sm:$0xff]  ;;  %v7880_v16 = vld [vmem:[#allocation16_spill] sm:$0xff] }
 0x7c0   :  { %2955 = vmatpush2.bf16.msra.mxu0 %v7872_v52  ;;  %2996 = vmatpush2.bf16.msra.mxu1 %v7873_v42  ;;  %v7881_v52 = vld [vmem:[#allocation17_spill] sm:$0xff]  ;;  %v7882_v42 = vld [vmem:[#allocation18_spill] sm:$0xff] }
 0x7c1   :  { %3077 = vmatprep.subr.bf16.mxu0 %v7874_v7  ;;  %3118 = vmatprep.subr.bf16.mxu1 %v7875_v31  ;;  %v7883_v7 = vld [vmem:[#allocation19_spill] sm:$0xff]  ;;  %v7884_v31 = vld [vmem:[#allocation20_spill] sm:$0xff] }
 0x7c3   :  { %2957 = vmatmul.mubr.bf16.vlgmr.msra.gmra.mxu0 %v6319_v54  ;;  %2998 = vmatmul.mubr.bf16.vlgmr.msra.gmra.mxu1 %v6319_v54  ;;  %v7886_v54 = vld [vmem:[#allocation22_spill] sm:$0xff] }
 0x7c4   :  { %3078 = vmatpush1.bf16.msra.mxu0 %v7876_v6  ;;  %3119 = vmatpush1.bf16.msra.mxu1 %v7877_v49  ;;  %v7887_v6 = vld [vmem:[#allocation23_spill] sm:$0xff]  ;;  %v7888_v49 = vld [vmem:[#allocation24_spill] sm:$0xff] }
 0x7c5   :  { %3079 = vmatprep.subr.bf16.mxu0 %v7878_v4  ;;  %3120 = vmatprep.subr.bf16.mxu1 %v7879_v17  ;;  %v7889_v4 = vld [vmem:[#allocation25_spill] sm:$0xff]  ;;  %v7890_v17 = vld [vmem:[#allocation26_spill] sm:$0xff] }
 0x7c8   :  { %3080 = vmatpush1.bf16.msra.mxu0 %v7880_v16  ;;  %3121 = vmatpush1.bf16.msra.mxu1 %v7881_v52  ;;  %v7891_v16 = vld [vmem:[#allocation27_spill] sm:$0xff]  ;;  %v7892_v52 = vld [vmem:[#allocation28_spill] sm:$0xff] }
 0x7c9   :  { %3081 = vmatprep.subr.bf16.mxu0 %v7882_v42  ;;  %3122 = vmatprep.subr.bf16.mxu1 %v7883_v7  ;;  %v7893_v42 = vld [vmem:[#allocation29_spill] sm:$0xff]  ;;  %v7894_v7 = vld [vmem:[#allocation30_spill] sm:$0xff] }
 0x7cc   :  { %3082 = vmatpush1.bf16.msra.mxu0 %v7884_v31  ;;  %3123 = vmatpush1.bf16.msra.mxu1 %v7885_v63  ;;  %v7895_v31 = vld [vmem:[#allocation31_spill] sm:$0xff]  ;;  %v7896_v63 = vld [vmem:[#allocation32_spill] sm:$0xff] }
 0x7cd   :  { %3083 = vmatprep.subr.bf16.mxu0 %v7886_v54  ;;  %3124 = vmatprep.subr.bf16.mxu1 %v7887_v6  ;;  %v7897_v54 = vld [vmem:[#allocation33_spill] sm:$0xff]  ;;  %v7898_v6 = vld [vmem:[#allocation34_spill] sm:$0xff] }
 0x7d0   :  { %3084 = vmatpush1.bf16.msra.mxu0 %v7888_v49  ;;  %3125 = vmatpush1.bf16.msra.mxu1 %v7889_v4  ;;  %v7899_v49 = vld [vmem:[#allocation35_spill] sm:$0xff]  ;;  %v7900_v4 = vld [vmem:[#allocation36_spill] sm:$0xff] }
 0x7d1   :  { %3085 = vmatprep.subr.bf16.mxu0 %v7890_v17  ;;  %3126 = vmatprep.subr.bf16.mxu1 %v7891_v16  ;;  %v7901_v17 = vld [vmem:[#allocation37_spill] sm:$0xff]  ;;  %v7902_v16 = vld [vmem:[#allocation38_spill] sm:$0xff] }
 0x7d4   :  { %3086 = vmatpush1.bf16.msra.mxu0 %v7892_v52  ;;  %3127 = vmatpush1.bf16.msra.mxu1 %v7893_v42  ;;  %v7903_v52 = vld [vmem:[#allocation39_spill] sm:$0xff]  ;;  %v7904_v42 = vld [vmem:[#allocation40_spill] sm:$0xff] }
 0x7d5   :  { %3087 = vmatprep.subr.bf16.mxu0 %v7894_v7  ;;  %3128 = vmatprep.subr.bf16.mxu1 %v7895_v31  ;;  %v7905_v7 = vld [vmem:[#allocation41_spill] sm:$0xff]  ;;  %v7906_v31 = vld [vmem:[#allocation42_spill] sm:$0xff] }
 0x7d8   :  { %3088 = vmatpush1.bf16.msra.mxu0 %v7896_v63  ;;  %3129 = vmatpush1.bf16.msra.mxu1 %v7897_v54  ;;  %v7907_v63 = vld [vmem:[#allocation43_spill] sm:$0xff]  ;;  %v7908_v54 = vld [vmem:[#allocation44_spill] sm:$0xff] }
 0x7d9   :  { %3089 = vmatprep.subr.bf16.mxu0 %v7898_v6  ;;  %3130 = vmatprep.subr.bf16.mxu1 %v7899_v49  ;;  %v7909_v6 = vld [vmem:[#allocation45_spill] sm:$0xff]  ;;  %v7910_v49 = vld [vmem:[#allocation46_spill] sm:$0xff] }
 0x7dc   :  { %3090 = vmatpush1.bf16.msra.mxu0 %v7900_v4  ;;  %3131 = vmatpush1.bf16.msra.mxu1 %v7901_v17  ;;  %v7911_v4 = vld [vmem:[#allocation47_spill] sm:$0xff]  ;;  %v7912_v17 = vld [vmem:[#allocation48_spill] sm:$0xff] }
 0x7dd   :  { %3091 = vmatprep.subr.bf16.mxu0 %v7902_v16  ;;  %3132 = vmatprep.subr.bf16.mxu1 %v7903_v52  ;;  %v7913_v16 = vld [vmem:[#allocation49_spill] sm:$0xff]  ;;  %v7914_v52 = vld [vmem:[#allocation50_spill] sm:$0xff] }
 0x7e0   :  { %3092 = vmatpush1.bf16.msra.mxu0 %v7904_v42  ;;  %3133 = vmatpush1.bf16.msra.mxu1 %v7905_v7  ;;  %v7915_v42 = vld [vmem:[#allocation51_spill] sm:$0xff]  ;;  %v7916_v7 = vld [vmem:[#allocation52_spill] sm:$0xff] }
 0x7e1   :  { %3093 = vmatprep.subr.bf16.mxu0 %v7906_v31  ;;  %3134 = vmatprep.subr.bf16.mxu1 %v7907_v63  ;;  %v7917_v31 = vld [vmem:[#allocation53_spill] sm:$0xff]  ;;  %v7918_v63 = vld [vmem:[#allocation54_spill] sm:$0xff] }
 0x7e4   :  { %3094 = vmatpush2.bf16.msra.mxu0 %v7908_v54  ;;  %3135 = vmatpush2.bf16.msra.mxu1 %v7909_v6  ;;  %v7919_v54 = vld [vmem:[#allocation55_spill] sm:$0xff]  ;;  %v7920_v6 = vld [vmem:[#allocation56_spill] sm:$0xff] }
 0x7e5   :  { %3095 = vmatprep.subr.bf16.mxu0 %v7910_v49  ;;  %3136 = vmatprep.subr.bf16.mxu1 %v7911_v4  ;;  %v7921_v49 = vld [vmem:[#allocation57_spill] sm:$0xff]  ;;  %v7922_v4 = vld [vmem:[#allocation58_spill] sm:$0xff] }
 0x7e8   :  { %3096 = vmatpush2.bf16.msra.mxu0 %v7912_v17  ;;  %3137 = vmatpush2.bf16.msra.mxu1 %v7913_v16  ;;  %v7923_v17 = vld [vmem:[#allocation59_spill] sm:$0xff]  ;;  %v7924_v16 = vld [vmem:[#allocation60_spill] sm:$0xff] }
 0x7e9   :  { %3097 = vmatprep.subr.bf16.mxu0 %v7914_v52  ;;  %3138 = vmatprep.subr.bf16.mxu1 %v7915_v42  ;;  %v7925_v52 = vld [vmem:[#allocation61_spill] sm:$0xff]  ;;  %v7926_v42 = vld [vmem:[#allocation62_spill] sm:$0xff] }
 0x7ec   :  { %3098 = vmatpush2.bf16.msra.mxu0 %v7916_v7  ;;  %3139 = vmatpush2.bf16.msra.mxu1 %v7917_v31  ;;  %v7927_v7 = vld [vmem:[#allocation63_spill] sm:$0xff]  ;;  %v7928_v31 = vld [vmem:[#allocation64_spill] sm:$0xff] }
 0x7ed   :  { %3099 = vmatprep.subr.bf16.mxu0 %v7918_v63  ;;  %3140 = vmatprep.subr.bf16.mxu1 %v7919_v54  ;;  %v7929_v63 = vld [vmem:[#allocation65_spill] sm:$0xff]  ;;  %v7930_v54 = vld [vmem:[#allocation66_spill] sm:$0xff] }
 0x7f0   :  { %3100 = vmatpush2.bf16.msra.mxu0 %v7920_v6  ;;  %3141 = vmatpush2.bf16.msra.mxu1 %v7921_v49  ;;  %v7931_v6 = vld [vmem:[#allocation67_spill] sm:$0xff]  ;;  %v7932_v49 = vld [vmem:[#allocation68_spill] sm:$0xff] }
 0x7f1   :  { %3101 = vmatprep.subr.bf16.mxu0 %v7922_v4  ;;  %3142 = vmatprep.subr.bf16.mxu1 %v7923_v17  ;;  %v7933_v4 = vld [vmem:[#allocation69_spill] sm:$0xff]  ;;  %v7934_v17 = vld [vmem:[#allocation70_spill] sm:$0xff] }
 0x7f4   :  { %3102 = vmatpush2.bf16.msra.mxu0 %v7924_v16  ;;  %3143 = vmatpush2.bf16.msra.mxu1 %v7925_v52  ;;  %v7935_v16 = vld [vmem:[#allocation71_spill] sm:$0xff]  ;;  %v7936_v52 = vld [vmem:[#allocation72_spill] sm:$0xff] }
 0x7f5   :  { %3103 = vmatprep.subr.bf16.mxu0 %v7926_v42  ;;  %3144 = vmatprep.subr.bf16.mxu1 %v7927_v7  ;;  %v7937_v42 = vld [vmem:[#allocation73_spill] sm:$0xff]  ;;  %v7938_v7 = vld [vmem:[#allocation74_spill] sm:$0xff] }
 0x7f8   :  { %3104 = vmatpush2.bf16.msra.mxu0 %v7928_v31  ;;  %3145 = vmatpush2.bf16.msra.mxu1 %v7929_v63  ;;  %v7939_v31 = vld [vmem:[#allocation75_spill] sm:$0xff] }
 0x7f9   :  { %3105 = vmatprep.subr.bf16.mxu0 %v7930_v54  ;;  %3146 = vmatprep.subr.bf16.mxu1 %v7931_v6 }
 0x7fc   :  { %3106 = vmatpush2.bf16.msra.mxu0 %v7932_v49  ;;  %3147 = vmatpush2.bf16.msra.mxu1 %v7933_v4 }
 0x7fd   :  { %3107 = vmatprep.subr.bf16.mxu0 %v7934_v17  ;;  %3148 = vmatprep.subr.bf16.mxu1 %v7935_v16 }
 0x800   :  { %3108 = vmatpush2.bf16.msra.mxu0 %v7936_v52  ;;  %3149 = vmatpush2.bf16.msra.mxu1 %v7937_v42  ;;  %v7943_v42 = vld [vmem:[#allocation164_spill] sm:$0xff] }
 0x801   :  { %3159 = vmatprep.subr.bf16.mxu0 %v7938_v7  ;;  %3200 = vmatprep.subr.bf16.mxu1 %v7939_v31 }
 0x843   :  { %v2876_v63 = vpop.f32.mrf.mxu0  ;;  %v2917_v54 = vpop.f32.mrf.mxu1 }
 0x844   :  { %v3006_v17 = vadd.f32 %v2876_v63, %v7940_v53  ;;  %v3008_v16 = vadd.f32 %v2917_v54, %v7941_v33  ;;  %v7944_v54 = vld [vmem:[#allocation189_spill] sm:$0xff] }
 0x845   :  { %v2878_v26 = vpop.f32.mrf.mxu0  ;;  %v2919_v6 = vpop.f32.mrf.mxu1 }
 0x846   :  { %v3007_v52 = vadd.f32 %v2878_v26, %v7942_v44  ;;  %v4148_v2 = vmul.f32 -1.442695, %v3006_v17  ;;  %v3009_v19 = vadd.f32 %v2919_v6, %v7943_v42  ;;  %v4150_v7 = vmul.f32 -1.442695, %v3008_v16  ;;  %v7945_v17 = vld [vmem:[#allocation190_spill] sm:$0xff] }
 0x847   :  { %v2880_v55 = vpop.f32.mrf.mxu0  ;;  %v2921_v49 = vpop.f32.mrf.mxu1 }
 0x848   :  { %v4149_v32 = vmul.f32 -1.442695, %v3007_v52  ;;  %4376 = vpow2.f32 %v4148_v2  ;;  %v4151_v31 = vmul.f32 -1.442695, %v3009_v19  ;;  %v7946_v52 = vld [vmem:[#allocation191_spill] sm:$0xff] }
 0x849   :  { %v2881_v48 = vpop.f32.mrf.mxu0  ;;  %v2922_v4 = vpop.f32.mrf.mxu1  ;;  %4378 = vpow2.f32 %v4150_v7  ;;  %v7947_v7 = vld [vmem:[#allocation192_spill] sm:$0xff] }
 0x84a   :  { %4380 = vpow2.f32 %v4149_v32 }
 0x84b   :  { %4382 = vpow2.f32 %v4151_v31 }
 0x855   :  { %v4377_v55 = vpop.eup %4376 }
 0x856   :  { %v4379_v49 = vpop.eup %4378  ;;  %v3020_v4 = vadd.f32 1.0, %v4377_v55 }
 0x857   :  { %v4381_v48 = vpop.eup %4380  ;;  %v3032_v53 = vadd.f32 1.0, %v4379_v49 }
 0x858   :  { %v4383_v57 = vpop.eup %4382  ;;  %v3021_v63 = vadd.f32 1.0, %v4381_v48  ;;  %4384 = vrcp.f32 %v3020_v4 }
 0x859   :  { %v3033_v33 = vadd.f32 1.0, %v4383_v57  ;;  %4386 = vrcp.f32 %v3032_v53 }
 0x85a   :  { %4388 = vrcp.f32 %v3021_v63 }
 0x865   :  { %v4385_v53 = vpop.eup %4384 }
 0x883   :  { %v2958_v44 = vpop.f32.mrf.mxu0  ;;  %v2999_v26 = vpop.f32.mrf.mxu1 }
 0x884   :  { %v3010_v6 = vadd.f32 %v2958_v44, %v7944_v54  ;;  %v3012_v2 = vadd.f32 %v2999_v26, %v7945_v17  ;;  %v4387_v44 = vpop.eup %4386 }
 0x885   :  { %v2960_v19 = vpop.f32.mrf.mxu0  ;;  %v3001_v32 = vpop.f32.mrf.mxu1 }
 0x886   :  { %4390 = vtanh.f32 %v3010_v6  ;;  %v4152_v16 = vmul.f32 -1.442695, %v3012_v2  ;;  %v3011_v42 = vadd.f32 %v2960_v19, %v7946_v52  ;;  %v3013_v31 = vadd.f32 %v3001_v32, %v7947_v7  ;;  %v4389_v63 = vpop.eup %4388 }
 0x887   :  { %4392 = vrcp.f32 %v3033_v33  ;;  %v2962_v55 = vpop.f32.mrf.mxu0  ;;  %v3003_v49 = vpop.f32.mrf.mxu1  ;;  %v3052_v6 = vmul.f32 %v4387_v44, %v6304_v34 }
 0x888   :  { %4394 = vpow2.f32 %v4152_v16  ;;  %v4153_v57 = vmul.f32 -1.442695, %v3013_v31 }
 0x889   :  { %4396 = vtanh.f32 %v3011_v42  ;;  %v2963_v48 = vpop.f32.mrf.mxu0  ;;  %v3004_v4 = vpop.f32.mrf.mxu1 }
 0x88a   :  { %4398 = vpow2.f32 %v4153_v57 }
 0x893   :  { %v4391_v26 = vpop.eup %4390 }
 0x894   :  { %v4393_v54 = vpop.eup %4392  ;;  %v3054_v17 = vmul.f32 %v4391_v26, %v4385_v53 }
 0x895   :  { %v4395_v2 = vpop.eup %4394  ;;  %v3053_v16 = vmul.f32 %v4393_v54, %v6308_v56 }
 0x896   :  { %v4397_v19 = vpop.eup %4396  ;;  %v6462_v32 = vadd.f32 %v3054_v17, %v3052_v6  ;;  %v3046_v33 = vadd.f32 1.0, %v4395_v2 }
 0x897   :  { %v4399_v52 = vpop.eup %4398  ;;  %v3055_v42 = vmul.f32 %v4397_v19, %v4389_v63 }
 0x898   :  { %4400 = vtanh.f32 %v6462_v32  ;;  %v3047_v7 = vadd.f32 1.0, %v4399_v52 }
 0x899   :  { %4402 = vrcp.f32 %v3046_v33  ;;  %v6466_v31 = vadd.f32 %v3055_v42, %v3053_v16  ;;  %v7973_v16 = vld [vmem:[#allocation193_spill] sm:$0xff] }
 0x89a   :  { %4404 = vrcp.f32 %v3047_v7  ;;  %v7974_v7 = vld [vmem:[#allocation194_spill] sm:$0xff] }
 0x89b   :  { %4406 = vtanh.f32 %v6466_v31 }
 0x8a5   :  { %v4401_v34 = vpop.eup %4400 }
 0x8a6   :  { %v4403_v55 = vpop.eup %4402 }
 0x8a7   :  { %v4405_v49 = vpop.eup %4404  ;;  %v6469_v48 = vmul.f32 %v4403_v55, %v4401_v34 }
 0x8a8   :  { %v4407_v57 = vpop.eup %4406 }
 0x8a9   :  { %v6471_v4 = vmul.f32 %v4407_v57, %v4405_v49  ;;  %v6477_v53 = vpack.c.bf16 %v6469_v48, %v6469_v48 }
 0x8ab   :  { %v3065_v56 = vpack.c.bf16 %v6471_v4, %v6471_v4 }
 0x8ad   :  { %3109 = vmatprep.mubr.bf16.mxu0 %v3065_v56  ;;  %3150 = vmatprep.mubr.bf16.mxu1 %v3065_v56 }
 0x8ae   :  { %3110 = vmatmul.mubr.bf16.vlgmr.msra.gmra.mxu0 %v6477_v53  ;;  %3151 = vmatmul.mubr.bf16.vlgmr.msra.gmra.mxu1 %v6477_v53 }
 0x8af   :  { %3160 = vmatpush1.bf16.msra.mxu0 %v7359_v25  ;;  %3201 = vmatpush1.bf16.msra.mxu1 %v7360_v41  ;;  %v7948_v25 = vld [vmem:[#allocation117_spill] sm:$0xff]  ;;  %v7949_v41 = vld [vmem:[#allocation118_spill] sm:$0xff] }
 0x8b0   :  { %3191 = vmatprep.mubr.bf16.mxu0 %v3065_v56  ;;  %3232 = vmatprep.mubr.bf16.mxu1 %v3065_v56  ;;  %v7975_v56 = vld [vmem:[#allocation195_spill] sm:$0xff] }
 0x8b1   :  { %3161 = vmatprep.subr.bf16.mxu0 %v7361_v24  ;;  %3202 = vmatprep.subr.bf16.mxu1 %v7362_v58  ;;  %v7950_v24 = vld [vmem:[#allocation119_spill] sm:$0xff]  ;;  %v7951_v58 = vld [vmem:[#allocation120_spill] sm:$0xff] }
 0x8b3   :  { %3162 = vmatpush1.bf16.msra.mxu0 %v7363_v39  ;;  %3203 = vmatpush1.bf16.msra.mxu1 %v7364_v40  ;;  %v7952_v39 = vld [vmem:[#allocation121_spill] sm:$0xff]  ;;  %v7953_v40 = vld [vmem:[#allocation122_spill] sm:$0xff] }
 0x8b4   :  { %3163 = vmatprep.subr.bf16.mxu0 %v7365_v51  ;;  %3204 = vmatprep.subr.bf16.mxu1 %v7366_v46  ;;  %v7954_v51 = vld [vmem:[#allocation123_spill] sm:$0xff]  ;;  %v7955_v46 = vld [vmem:[#allocation124_spill] sm:$0xff] }
 0x8b7   :  { %3164 = vmatpush1.bf16.msra.mxu0 %v7367_v61  ;;  %3205 = vmatpush1.bf16.msra.mxu1 %v7368_v5  ;;  %v7958_v61 = vld [vmem:[#allocation127_spill] sm:$0xff]  ;;  %v7959_v5 = vld [vmem:[#allocation128_spill] sm:$0xff] }
 0x8b8   :  { %3165 = vmatprep.subr.bf16.mxu0 %v7369_v9  ;;  %3206 = vmatprep.subr.bf16.mxu1 %v7370_v1  ;;  %v7960_v9 = vld [vmem:[#allocation129_spill] sm:$0xff]  ;;  %v7961_v1 = vld [vmem:[#allocation130_spill] sm:$0xff] }
 0x8bb   :  { %3166 = vmatpush1.bf16.msra.mxu0 %v7371_v60  ;;  %3207 = vmatpush1.bf16.msra.mxu1 %v7372_v0  ;;  %v7962_v60 = vld [vmem:[#allocation131_spill] sm:$0xff]  ;;  %v7963_v0 = vld [vmem:[#allocation132_spill] sm:$0xff] }
 0x8bc   :  { %3167 = vmatprep.subr.bf16.mxu0 %v7373_v8  ;;  %3208 = vmatprep.subr.bf16.mxu1 %v7374_v10  ;;  %v7964_v8 = vld [vmem:[#allocation133_spill] sm:$0xff]  ;;  %v7965_v10 = vld [vmem:[#allocation134_spill] sm:$0xff] }
 0x8bf   :  { %3168 = vmatpush1.bf16.msra.mxu0 %v7375_v18  ;;  %3209 = vmatpush1.bf16.msra.mxu1 %v7376_v45  ;;  %v7966_v18 = vld [vmem:[#allocation135_spill] sm:$0xff]  ;;  %v7967_v45 = vld [vmem:[#allocation136_spill] sm:$0xff] }
 0x8c0   :  { %3169 = vmatprep.subr.bf16.mxu0 %v7465_v13  ;;  %3210 = vmatprep.subr.bf16.mxu1 %v7466_v28 }
 0x8c3   :  { %3170 = vmatpush1.bf16.msra.mxu0 %v7467_v22  ;;  %3211 = vmatpush1.bf16.msra.mxu1 %v7468_v29 }
 0x8c4   :  { %3171 = vmatprep.subr.bf16.mxu0 %v7469_v30  ;;  %3212 = vmatprep.subr.bf16.mxu1 %v7470_v37 }
 0x8c7   :  { %3172 = vmatpush1.bf16.msra.mxu0 %v7471_v12  ;;  %3213 = vmatpush1.bf16.msra.mxu1 %v7472_v11  ;;  %v7969_v12 = vld [vmem:[#allocation165_spill] sm:$0xff] }
 0x8c8   :  { %3173 = vmatprep.subr.bf16.mxu0 %v7473_v14  ;;  %3214 = vmatprep.subr.bf16.mxu1 %v7474_v38  ;;  %v7970_v14 = vld [vmem:[#allocation166_spill] sm:$0xff] }
 0x8cb   :  { %3174 = vmatpush1.bf16.msra.mxu0 %v7475_v27  ;;  %3215 = vmatpush1.bf16.msra.mxu1 %v7476_v43  ;;  %v7971_v27 = vld [vmem:[#allocation167_spill] sm:$0xff] }
 0x8cc   :  { %3175 = vmatprep.subr.bf16.mxu0 %v7562_v3  ;;  %3216 = vmatprep.subr.bf16.mxu1 %v7478_v47 }
 0x8cf   :  { %3176 = vmatpush2.bf16.msra.mxu0 %v7479_v21  ;;  %3217 = vmatpush2.bf16.msra.mxu1 %v7480_v35  ;;  %v7972_v21 = vld [vmem:[#allocation168_spill] sm:$0xff] }
 0x8d0   :  { %3177 = vmatprep.subr.bf16.mxu0 %v7481_v62  ;;  %3218 = vmatprep.subr.bf16.mxu1 %v7482_v15 }
 0x8d3   :  { %3178 = vmatpush2.bf16.msra.mxu0 %v7483_v36  ;;  %3219 = vmatpush2.bf16.msra.mxu1 %v7396_v23  ;;  %v7968_v23 = vld [vmem:[#allocation137_spill] sm:$0xff] }
 0x8d4   :  { %3179 = vmatprep.subr.bf16.mxu0 %v7397_v59  ;;  %3220 = vmatprep.subr.bf16.mxu1 %v7398_v50  ;;  %v7956_v59 = vld [vmem:[#allocation125_spill] sm:$0xff]  ;;  %v7957_v50 = vld [vmem:[#allocation126_spill] sm:$0xff] }
 0x8d7   :  { %3180 = vmatpush2.bf16.msra.mxu0 %v7484_v20  ;;  %3221 = vmatpush2.bf16.msra.mxu1 %v7948_v25  ;;  %v7976_v25 = vld [vmem:[#allocation196_spill] sm:$0xff] }
 0x8d8   :  { %3181 = vmatprep.subr.bf16.mxu0 %v7949_v41  ;;  %3222 = vmatprep.subr.bf16.mxu1 %v7950_v24 }
 0x8db   :  { %3182 = vmatpush2.bf16.msra.mxu0 %v7951_v58  ;;  %3223 = vmatpush2.bf16.msra.mxu1 %v7952_v39 }
 0x8dc   :  { %3183 = vmatprep.subr.bf16.mxu0 %v7953_v40  ;;  %3224 = vmatprep.subr.bf16.mxu1 %v7954_v51 }
 0x8df   :  { %3184 = vmatpush2.bf16.msra.mxu0 %v7955_v46  ;;  %3225 = vmatpush2.bf16.msra.mxu1 %v7956_v59 }
 0x8e0   :  { %3185 = vmatprep.subr.bf16.mxu0 %v7957_v50  ;;  %3226 = vmatprep.subr.bf16.mxu1 %v7958_v61 }
 0x8e3   :  { %3186 = vmatpush2.bf16.msra.mxu0 %v7959_v5  ;;  %3227 = vmatpush2.bf16.msra.mxu1 %v7960_v9  ;;  %v6553_v9 = vpop.permute.xlu0 %3341 }
 0x8e4   :  { %3187 = vmatprep.subr.bf16.mxu0 %v7961_v1  ;;  %3228 = vmatprep.subr.bf16.mxu1 %v7962_v60 }
 0x8e7   :  { %3188 = vmatpush2.bf16.msra.mxu0 %v7963_v0  ;;  %3229 = vmatpush2.bf16.msra.mxu1 %v7964_v8 }
 0x8e8   :  { %3189 = vmatprep.subr.bf16.mxu0 %v7965_v10  ;;  %3230 = vmatprep.subr.bf16.mxu1 %v7966_v18  ;;  %v6556_v10 = vpop.permute.xlu1 %3351  ;;  %v7977_v18 = vld [vmem:[#allocation76_spill] sm:$0xff] }
 0x8eb   :  { %3190 = vmatpush2.bf16.msra.mxu0 %v7967_v45  ;;  %3231 = vmatpush2.bf16.msra.mxu1 %v7968_v23  ;;  %v6559_v45 = vmax.f32 %v7977_v18, 0.0 }
 0x8ee   :  { %3192 = vmatmul.mubr.bf16.vlgmr.msra.gmra.mxu0 %v6477_v53  ;;  %3233 = vmatmul.mubr.bf16.vlgmr.msra.gmra.mxu1 %v6477_v53 }
 0x96e   :  { %v3111_v20 = vpop.f32.mrf.mxu0  ;;  %v3152_v36 = vpop.f32.mrf.mxu1 }
 0x96f   :  { %v3241_v11 = vadd.f32 %v3111_v20, %v7969_v12  ;;  %v3243_v38 = vadd.f32 %v3152_v36, %v7970_v14 }
 0x970   :  { %v3113_v13 = vpop.f32.mrf.mxu0  ;;  %v3154_v28 = vpop.f32.mrf.mxu1 }
 0x971   :  { %v3242_v43 = vadd.f32 %v3113_v13, %v7971_v27  ;;  %v4154_v47 = vmul.f32 -1.442695, %v3241_v11  ;;  %v3244_v35 = vadd.f32 %v3154_v28, %v7972_v21  ;;  %v4156_v62 = vmul.f32 -1.442695, %v3243_v38  ;;  %v7980_v38 = vld [vmem:[#allocation80_spill] sm:$0xff]  ;;  %v7981_v21 = vld [vmem:[#allocation82_spill] sm:$0xff] }
 0x972   :  { %v3115_v22 = vpop.f32.mrf.mxu0  ;;  %v3156_v29 = vpop.f32.mrf.mxu1  ;;  %v6570_v27 = vmax.f32 %v7980_v38, 0.0 }
 0x973   :  { %v4155_v15 = vmul.f32 -1.442695, %v3242_v43  ;;  %4408 = vpow2.f32 %v4154_v47  ;;  %v4157_v3 = vmul.f32 -1.442695, %v3244_v35  ;;  %v7978_v22 = vld [vmem:[#allocation197_spill] sm:$0xff]  ;;  %v6577_v35 = vmax.f32 %v7981_v21, 0.0 }
 0x974   :  { %v3116_v30 = vpop.f32.mrf.mxu0  ;;  %v3157_v37 = vpop.f32.mrf.mxu1  ;;  %4410 = vpow2.f32 %v4156_v62  ;;  %v6563_v29 = vmax.f32 %v7978_v22, 0.0 }
 0x975   :  { %4412 = vpow2.f32 %v4155_v15  ;;  %v3347_v30 = vpop.permute.xlu0 %3346  ;;  %v7979_v37 = vld [vmem:[#allocation78_spill] sm:$0xff] }
 0x976   :  { %4414 = vpow2.f32 %v4157_v3  ;;  %v3381_v14 = vmul.f32 %v3347_v30, %v6559_v45  ;;  %v3379_v43 = vmul.f32 %v6553_v9, %v6563_v29 }
 0x978   :  { %v3423_v62 = vmul.f32 %v3381_v14, %v6559_v45 }
 0x979   :  { %v3362_v15 = vpop.permute.xlu0 %3361 }
 0x980   :  { %v4409_v44 = vpop.eup %4408 }
 0x981   :  { %v4411_v63 = vpop.eup %4410  ;;  %v3255_v54 = vadd.f32 1.0, %v4409_v44  ;;  %v7982_v44 = vld [vmem:[#allocation84_spill] sm:$0xff] }
 0x982   :  { %v4413_v26 = vpop.eup %4412  ;;  %v3267_v17 = vadd.f32 1.0, %v4411_v63  ;;  %v6582_v63 = vmax.f32 %v7982_v44, 0.0 }
 0x983   :  { %v4415_v6 = vpop.eup %4414  ;;  %v3256_v2 = vadd.f32 1.0, %v4413_v26  ;;  %4416 = vrcp.f32 %v3255_v54  ;;  %v3421_v26 = vmul.f32 %v3379_v43, %v6563_v29 }
 0x984   :  { %v3268_v19 = vadd.f32 1.0, %v4415_v6  ;;  %4418 = vrcp.f32 %v3267_v17  ;;  %v3387_v6 = vmul.f32 %v3362_v15, %v6577_v35  ;;  %v3395_v17 = vadd.f32 %v3381_v14, %v3379_v43 }
 0x985   :  { %4420 = vrcp.f32 %v3256_v2  ;;  %v6588_v2 = vmax.f32 %v6469_v48, 0.0  ;;  %v6595_v48 = vmax.f32 %v6471_v4, 0.0 }
 0x990   :  { %v4417_v46 = vpop.eup %4416 }
 0x991   :  { %v4419_v59 = vpop.eup %4418 }
 0x992   :  { %v4421_v50 = vpop.eup %4420  ;;  %v3287_v1 = vmul.f32 %v4419_v59, %v6462_v32  ;;  %v6566_v32 = vmax.f32 %v7979_v37, 0.0 }
 0x994   :  { %v3383_v47 = vmul.f32 %v6556_v10, %v6566_v32 }
 0x996   :  { %v3425_v54 = vmul.f32 %v3383_v47, %v6566_v32 }
 0x9ae   :  { %v3193_v33 = vpop.f32.mrf.mxu0  ;;  %v3234_v52 = vpop.f32.mrf.mxu1 }
 0x9af   :  { %v3245_v42 = vadd.f32 %v3193_v33, %v7973_v16  ;;  %v3247_v34 = vadd.f32 %v3234_v52, %v7974_v7  ;;  %v3437_v33 = vadd.f32 %v3423_v62, %v3421_v26  ;;  %v3396_v16 = vadd.f32 %v3395_v17, %v3383_v47  ;;  %v3372_v7 = vpop.permute.xlu0 %3371 }
 0x9b0   :  { %v3195_v55 = vpop.f32.mrf.mxu0  ;;  %v3236_v49 = vpop.f32.mrf.mxu1 }
 0x9b1   :  { %4422 = vtanh.f32 %v3245_v42  ;;  %v4158_v57 = vmul.f32 -1.442695, %v3247_v34  ;;  %v3246_v53 = vadd.f32 %v3195_v55, %v7975_v56  ;;  %v3248_v41 = vadd.f32 %v3236_v49, %v7976_v25 }
 0x9b2   :  { %4424 = vrcp.f32 %v3268_v19  ;;  %v3197_v24 = vpop.f32.mrf.mxu0  ;;  %v3238_v58 = vpop.f32.mrf.mxu1  ;;  %v3438_v34 = vadd.f32 %v3437_v33, %v3425_v54  ;;  %v3429_v55 = vmul.f32 %v3387_v6, %v6577_v35  ;;  %v3391_v56 = vmul.f32 %v3372_v7, %v6588_v2 }
 0x9b3   :  { %4426 = vpow2.f32 %v4158_v57  ;;  %v4159_v39 = vmul.f32 -1.442695, %v3248_v41 }
 0x9b4   :  { %4428 = vtanh.f32 %v3246_v53  ;;  %v3198_v40 = vpop.f32.mrf.mxu0  ;;  %v3239_v51 = vpop.f32.mrf.mxu1 }
 0x9b5   :  { %4430 = vpow2.f32 %v4159_v39 }
 0x9be   :  { %v4423_v61 = vpop.eup %4422 }
 0x9bf   :  { %v4425_v5 = vpop.eup %4424  ;;  %v3289_v60 = vmul.f32 %v4423_v61, %v4417_v46  ;;  %v7983_v46 = vld [vmem:[#allocation85_spill] sm:$0xff]  ;;  %v3433_v61 = vmul.f32 %v3391_v56, %v6588_v2 }
 0x9c0   :  { %v4427_v0 = vpop.eup %4426  ;;  %v3288_v13 = vmul.f32 %v4425_v5, %v6466_v31  ;;  %v3357_v31 = vpop.permute.xlu1 %3356  ;;  %v6599_v59 = vmax.f32 %v7983_v46, 0.0 }
 0x9c1   :  { %v4429_v8 = vpop.eup %4428  ;;  %v3291_v23 = vadd.f32 %v3289_v60, %v3287_v1  ;;  %v3281_v20 = vadd.f32 1.0, %v4427_v0  ;;  %v3385_v3 = vmul.f32 %v3357_v31, %v6570_v27  ;;  %v7984_v0 = vld [vmem:[#allocation83_spill] sm:$0xff] }
 0x9c2   :  { %v4431_v36 = vpop.eup %4430  ;;  %v3290_v28 = vmul.f32 %v4429_v8, %v4421_v50  ;;  %v6605_v4 = vmax.f32 %v7984_v0, 0.0  ;;  %v3382_v8 = vmul.f32 %v3347_v30, %v6595_v48  ;;  %v3384_v22 = vmul.f32 %v6556_v10, %v6599_v59  ;;  %v7986_v30 = vld [vmem:[#allocation79_spill] sm:$0xff]  ;;  %v7987_v10 = vld [vmem:[#allocation77_spill] sm:$0xff] }
 0x9c3   :  { %4432 = vtanh.f32 %v3291_v23  ;;  %v3282_v12 = vadd.f32 1.0, %v4431_v36  ;;  %v3427_v52 = vmul.f32 %v3385_v3, %v6570_v27  ;;  %v3397_v57 = vadd.f32 %v3396_v16, %v3385_v3  ;;  %v7988_v16 = vld [vmem:[#allocation198_spill] sm:$0xff] }
 0x9c4   :  { %4434 = vrcp.f32 %v3281_v20  ;;  %v3292_v11 = vadd.f32 %v3290_v28, %v3288_v13  ;;  %v3367_v19 = vpop.permute.xlu1 %3366  ;;  %v7985_v13 = vld [vmem:[#allocation81_spill] sm:$0xff]  ;;  %v6620_v38 = vmax.f32 %v7986_v30, 0.0  ;;  %v3386_v43 = vmul.f32 %v3357_v31, %v6605_v4 }
 0x9c5   :  { %4436 = vrcp.f32 %v3282_v12  ;;  %v3389_v42 = vmul.f32 %v3367_v19, %v6582_v63  ;;  %v3439_v25 = vadd.f32 %v3438_v34, %v3427_v52  ;;  %v3398_v24 = vadd.f32 %v3397_v57, %v3387_v6 }
 0x9c6   :  { %4438 = vtanh.f32 %v3292_v11  ;;  %v6612_v28 = vmax.f32 %v7985_v13, 0.0  ;;  %v3424_v47 = vmul.f32 %v3382_v8, %v6595_v48  ;;  %v6626_v26 = vmax.f32 %v7987_v10, 0.0 }
 0x9c7   :  { %v3431_v58 = vmul.f32 %v3389_v42, %v6582_v63  ;;  %v3440_v51 = vadd.f32 %v3439_v25, %v3429_v55  ;;  %v3399_v50 = vadd.f32 %v3398_v24, %v3389_v42  ;;  %v3426_v6 = vmul.f32 %v3384_v22, %v6599_v59 }
 0x9c8   :  { %v3377_v60 = vpop.permute.xlu1 %3376  ;;  %v3388_v54 = vmul.f32 %v3362_v15, %v6612_v28  ;;  %v6631_v31 = vmax.f32 %v7988_v16, 0.0  ;;  %v3390_v42 = vmul.f32 %v3367_v19, %v6620_v38  ;;  %v3428_v34 = vmul.f32 %v3386_v43, %v6605_v4 }
 0x9c9   :  { %v3441_v18 = vadd.f32 %v3440_v51, %v3431_v58  ;;  %v3400_v23 = vadd.f32 %v3399_v50, %v3391_v56 }
 0x9ca   :  { %v3430_v15 = vmul.f32 %v3388_v54, %v6612_v28 }
 0x9cb   :  { %v3442_v37 = vadd.f32 %v3441_v18, %v3433_v61 }
 0x9d0   :  { %v4433_v49 = vpop.eup %4432 }
 0x9d1   :  { %v4435_v53 = vpop.eup %4434 }
 0x9d2   :  { %v4437_v41 = vpop.eup %4436  ;;  %v3295_v39 = vmul.f32 %v4435_v53, %v4433_v49  ;;  %v3392_v53 = vmul.f32 %v3372_v7, %v6626_v26 }
 0x9d3   :  { %v4439_v40 = vpop.eup %4438 }
 0x9d4   :  { %v6602_v5 = vmax.f32 %v3295_v39, 0.0  ;;  %v3296_v1 = vmul.f32 %v4439_v40, %v4437_v41  ;;  %v3394_v39 = vmul.f32 %v3377_v60, %v6631_v31  ;;  %v3432_v40 = vmul.f32 %v3390_v42, %v6620_v38 }
 0x9d5   :  { %v3434_v61 = vmul.f32 %v3392_v53, %v6626_v26 }
 0x9d6   :  { %v3393_v20 = vmul.f32 %v3377_v60, %v6602_v5  ;;  %v6609_v36 = vmax.f32 %v3296_v1, 0.0  ;;  %v3436_v18 = vmul.f32 %v3394_v39, %v6631_v31 }
 0x9d8   :  { %v3401_v12 = vadd.f32 %v3400_v23, %v3393_v20  ;;  %v3435_v11 = vmul.f32 %v3393_v20, %v6602_v5  ;;  %v3380_v14 = vmul.f32 %v6553_v9, %v6609_v36 }
 0x9da   :  { %v3402_v21 = vrot.slane %v3401_v12, 4  ;;  %v3443_v62 = vadd.f32 %v3442_v37, %v3435_v11  ;;  %v3408_v3 = vadd.f32 %v3382_v8, %v3380_v14  ;;  %v3422_v44 = vmul.f32 %v3380_v14, %v6609_v36 }
 0x9dc   :  { %v3403_v9 = vadd.f32 %v3402_v21, %v3401_v12  ;;  %v3444_v17 = vrot.slane %v3443_v62, 4  ;;  %v3409_v33 = vadd.f32 %v3408_v3, %v3384_v22  ;;  %v3450_v52 = vadd.f32 %v3424_v47, %v3422_v44 }
 0x9de   :  { %v3404_v55 = vrot.slane %v3403_v9, 2  ;;  %v3445_v49 = vadd.f32 %v3444_v17, %v3443_v62  ;;  %v3410_v57 = vadd.f32 %v3409_v33, %v3386_v43  ;;  %v3451_v56 = vadd.f32 %v3450_v52, %v3426_v6 }
 0x9e0   :  { %v3405_v25 = vadd.f32 %v3404_v55, %v3403_v9  ;;  %v3446_v41 = vrot.slane %v3445_v49, 2  ;;  %v3411_v24 = vadd.f32 %v3410_v57, %v3388_v54  ;;  %v3452_v58 = vadd.f32 %v3451_v56, %v3428_v34 }
 0x9e1   :  { %v4560_v57 = vmov 1966171168  }
 0x9e2   :  { %v3406_v51 = vrot.slane %v3405_v25, 1  ;;  %v3447_v19 = vadd.f32 %v3446_v41, %v3445_v49  ;;  %v3412_v46 = vadd.f32 %v3411_v24, %v3390_v42  ;;  %v3453_v50 = vadd.f32 %v3452_v58, %v3430_v15 }
 0x9e3   :  { %v3483_v56 = vunpack.c.l.s4 %v4560_v57 }
 0x9e4   :  { %v3413_v1 = vadd.f32 %v3412_v46, %v3392_v53  ;;  %v3454_v0 = vadd.f32 %v3453_v50, %v3432_v40  ;;  %v3407_v8 = vadd.f32 %v3406_v51, %v3405_v25  ;;  %v3448_v7 = vrot.slane %v3447_v19, 1  ;;  %v7989_v25 = vld [vmem:[#allocation138_spill] sm:$0xff]  ;;  %v3474_v40 = vld [vmem:[%s6856_s7] sm:$0x3]  ;;  %v7990_v46 = vld [vmem:[#allocation140_spill] sm:$0xff] }
 0x9e5   :  { %v3484_v53 = vunpack.c.0.s8 %v3483_v56 }
 0x9e6   :  { %v3414_v23 = vadd.f32 %v3413_v1, %v3394_v39  ;;  %v3455_v20 = vadd.f32 %v3454_v0, %v3434_v61  ;;  %v3449_v37 = vadd.f32 %v3448_v7, %v3447_v19  ;;  %v3464_v60 = vmul.f32 0.0625, %v3407_v8  ;;  %v7991_v61 = vld [vmem:[#allocation139_spill] sm:$0xff] }
 0x9e7   :  { %v3487_v41 = vsub.s32 %v3484_v53, %v7989_v25 }
 0x9e8   :  { %v3415_v13 = vrot.slane %v3414_v23, 4  ;;  %v3456_v22 = vadd.f32 %v3455_v20, %v3436_v18  ;;  %v3466_v43 = vmul.f32 0.0625, %v3449_v37  ;;  %v3468_v47 = vmul.f32 %v3464_v60, %v3464_v60  ;;  %v3498_v20 = vld [vmem:[%s6857_s8] sm:$0x3] }
 0x9ea   :  { %v3416_v12 = vadd.f32 %v3415_v13, %v3414_v23  ;;  %v3457_v11 = vrot.slane %v3456_v22, 4  ;;  %v3470_v10 = vsub.f32 %v3466_v43, %v3468_v47  ;;  %v3574_v13 = vld [vmem:[%s6854_s5] sm:$0x3] }
 0x9ec   :  { %v3417_v14 = vrot.slane %v3416_v12, 2  ;;  %v3458_v30 = vadd.f32 %v3457_v11, %v3456_v22  ;;  %v3472_v33 = vmax.f32 %v3470_v10, 0.0  ;;  %v3579_v11 = vrot.slane %v3574_v13, %v7991_v61 }
 0x9ee   :  { %v3418_v21 = vadd.f32 %v3417_v14, %v3416_v12  ;;  %v3459_v62 = vrot.slane %v3458_v30, 2  ;;  %v3475_v34 = vadd.f32 1e-05, %v3472_v33 }
 0x9f0   :  { %v3419_v3 = vrot.slane %v3418_v21, 1  ;;  %v3460_v44 = vadd.f32 %v3459_v62, %v3458_v30  ;;  %4440 = vrsqrt.f32 %v3475_v34 }
 0x9f2   :  { %v3420_v54 = vadd.f32 %v3419_v3, %v3418_v21  ;;  %v3461_v6 = vrot.slane %v3460_v44, 1 }
 0x9f4   :  { %v3462_v9 = vadd.f32 %v3461_v6, %v3460_v44  ;;  %v3465_v17 = vmul.f32 0.0625, %v3420_v54 }
 0x9f6   :  { %v3467_v52 = vmul.f32 0.0625, %v3462_v9  ;;  %v3469_v16 = vmul.f32 %v3465_v17, %v3465_v17 }
 0x9f8   :  { %v3471_v42 = vsub.f32 %v3467_v52, %v3469_v16 }
 0x9fa   :  { %v3473_v55 = vmax.f32 %v3471_v42, 0.0 }
 0x9fc   :  { %v3476_v49 = vadd.f32 1e-05, %v3473_v55 }
 0x9fd   :  { %v4441_v15 = vpop.eup %4440 }
 0x9fe   :  { %4442 = vrsqrt.f32 %v3476_v49 }
 0xa0b   :  { %v4443_v24 = vpop.eup %4442 }
 0xa0c   :  { %v3481_v58 = vcombine.low %v4441_v15, %v4443_v24 }
 0xa0e   :  { %v3488_v39 = vrot.slane %v3481_v58, %v3487_v41 }
 0xa10   :  { %v3495_v51 = vrot.slane %v3488_v39, %v3487_v41 }
 0xa12   :  { %v3497_v19 = vmul.f32 %v3495_v51, %v3474_v40 }
 0xa14   :  { %v6646_v50 = vrot.slane %v3497_v19, %v7990_v46  ;;  %v3503_v1 = vrot.slane %v3497_v19, %v7991_v61 }
 0xa16   :  { %v3511_v0 = vmul.f32 %v6646_v50, %v3465_v17  ;;  %v3510_v8 = vmul.f32 %v3503_v1, %v3464_v60  ;;  %v3532_v7 = vmul.f32 %v6646_v50, %v6609_v36  ;;  %v3533_v12 = vmul.f32 %v3503_v1, %v6559_v45 }
 0xa17   :  { %v3583_v60 = vrot.slane %v3574_v13, %v7990_v46  ;;  %v3534_v36 = vmul.f32 %v6646_v50, %v6595_v48  ;;  %v3531_v14 = vmul.f32 %v3503_v1, %v6563_v29  ;;  %v3539_v30 = vmul.f32 %v3503_v1, %v6577_v35 }
 0xa18   :  { %v3514_v18 = vcombine.low %v3510_v8, %v3511_v0  ;;  %v3540_v43 = vmul.f32 %v6646_v50, %v6612_v28  ;;  %v3535_v45 = vmul.f32 %v3503_v1, %v6566_v32  ;;  %v3536_v62 = vmul.f32 %v6646_v50, %v6599_v59 }
 0xa19   :  { %v3543_v3 = vmul.f32 %v3503_v1, %v6588_v2  ;;  %v3544_v48 = vmul.f32 %v6646_v50, %v6626_v26  ;;  %v3537_v29 = vmul.f32 %v3503_v1, %v6570_v27  ;;  %v3538_v35 = vmul.f32 %v6646_v50, %v6605_v4 }
 0xa1a   :  { %v3521_v23 = vrot.slane %v3514_v18, %v3487_v41  ;;  %v3541_v53 = vmul.f32 %v3503_v1, %v6582_v63  ;;  %v3542_v15 = vmul.f32 %v6646_v50, %v6620_v38  ;;  %v3546_v0 = vmul.f32 %v6646_v50, %v6631_v31  ;;  %v4526_v50 = vld [vmem:[%s6850_s1 + $0x8] sm:$0xff] }
 0xa1c   :  { %v3528_v22 = vrot.slane %v3521_v23, %v3487_v41 }
 0xa1e   :  { %v3530_v37 = vsub.f32 %v3498_v20, %v3528_v22 }
 0xa20   :  { %v3551_v47 = vrot.slane %v3530_v37, %v7991_v61  ;;  %v3555_v21 = vrot.slane %v3530_v37, %v7990_v46  ;;  %v3545_v46 = vmul.f32 %v3503_v1, %v6602_v5  ;;  %v4160_v5 = vld [vmem:[#allocation4] ss:$0 sm:$0xff] }
 0xa22   :  { %v3560_v28 = vadd.f32 %v3551_v47, %v3533_v12  ;;  %v3561_v44 = vadd.f32 %v3555_v21, %v3534_v36  ;;  %v3558_v10 = vadd.f32 %v3551_v47, %v3531_v14  ;;  %v3559_v54 = vadd.f32 %v3555_v21, %v3532_v7 }
 0xa23   :  { %v3566_v6 = vadd.f32 %v3551_v47, %v3539_v30  ;;  %v3567_v9 = vadd.f32 %v3555_v21, %v3540_v43  ;;  %v3562_v32 = vadd.f32 %v3551_v47, %v3535_v45  ;;  %v3563_v17 = vadd.f32 %v3555_v21, %v3536_v62 }
 0xa24   :  { %v3588_v33 = vmul.f32 %v3579_v11, %v3560_v28  ;;  %v3589_v59 = vmul.f32 %v3583_v60, %v3561_v44  ;;  %v3586_v52 = vmul.f32 %v3579_v11, %v3558_v10  ;;  %v3587_v2 = vmul.f32 %v3583_v60, %v3559_v54 }
 0xa25   :  { %v3594_v16 = vmul.f32 %v3579_v11, %v3566_v6  ;;  %v3595_v42 = vmul.f32 %v3583_v60, %v3567_v9  ;;  %v3590_v26 = vmul.f32 %v3579_v11, %v3562_v32  ;;  %v3591_v34 = vmul.f32 %v3583_v60, %v3563_v17  ;;  %v4529_v6 = vld [vmem:[%s6850_s1 + $0x20] sm:$0xff] }
 0xa26   :  { %v3605_v27 = vadd.f32 %v3589_v59, %v3588_v33  ;;  %v3602_v55 = vadd.f32 %v3587_v2, %v3586_v52  ;;  %v3570_v49 = vadd.f32 %v3551_v47, %v3543_v3  ;;  %v3571_v4 = vadd.f32 %v3555_v21, %v3544_v48  ;;  %v4530_v2 = vld [vmem:[%s6850_s1 + $0x18] sm:$0xff] }
 0xa27   :  { %v3564_v57 = vadd.f32 %v3551_v47, %v3537_v29  ;;  %v3565_v56 = vadd.f32 %v3555_v21, %v3538_v35  ;;  %v3614_v25 = vadd.f32 %v3595_v42, %v3594_v16  ;;  %v3608_v41 = vadd.f32 %v3591_v34, %v3590_v26  ;;  %v4528_v29 = vld [vmem:[%s6850_s1 + $0x10] sm:$0xff] }
 0xa28   :  { %3606 = vadd.xlane.f32.xlu1 %v3605_v27  ;;  %3603 = vadd.xlane.f32.xlu0 %v3602_v55  ;;  %v3598_v24 = vmul.f32 %v3579_v11, %v3570_v49  ;;  %v3599_v58 = vmul.f32 %v3583_v60, %v3571_v4  ;;  %v3568_v51 = vadd.f32 %v3551_v47, %v3541_v53  ;;  %v4531_v4 = vld [vmem:[%s6850_s1 + $0x30] sm:$0xff] }
 0xa29   :  { %v3592_v39 = vmul.f32 %v3579_v11, %v3564_v57  ;;  %v3593_v40 = vmul.f32 %v3583_v60, %v3565_v56  ;;  %v3569_v19 = vadd.f32 %v3555_v21, %v3542_v15  ;;  %v3572_v63 = vadd.f32 %v3551_v47, %v3545_v46 }
 0xa2a   :  { %v3620_v8 = vadd.f32 %v3599_v58, %v3598_v24  ;;  %v3596_v18 = vmul.f32 %v3579_v11, %v3568_v51  ;;  %v3573_v23 = vadd.f32 %v3555_v21, %v3546_v0 }
 0xa2b   :  { %v3611_v7 = vadd.f32 %v3593_v40, %v3592_v39  ;;  %v3597_v38 = vmul.f32 %v3583_v60, %v3569_v19  ;;  %v3600_v13 = vmul.f32 %v3579_v11, %v3572_v63  ;;  %v4527_v11 = vld [vmem:[%s6850_s1] sm:$0xff]  ;;  %v4532_v39 = vld [vmem:[%s6850_s1 + $0x28] sm:$0xff] }
 0xa2c   :  { %3615 = vadd.xlane.f32.xlu1 %v3614_v25  ;;  %3609 = vadd.xlane.f32.xlu0 %v3608_v41  ;;  %v3601_v22 = vmul.f32 %v3583_v60, %v3573_v23  ;;  %v4533_v23 = vld [vmem:[%s6850_s1 + $0x38] sm:$0xff] }
 0xa2d   :  { %v3617_v20 = vadd.f32 %v3597_v38, %v3596_v18 }
 0xa2e   :  { %v3623_v37 = vadd.f32 %v3601_v22, %v3600_v13 }
 0xa30   :  { %3621 = vadd.xlane.f32.xlu1 %v3620_v8  ;;  %3612 = vadd.xlane.f32.xlu0 %v3611_v7 }
 0xa34   :  { %3618 = vadd.xlane.f32.xlu0 %v3617_v20 }
 0xa38   :  { %3624 = vadd.xlane.f32.xlu0 %v3623_v37 }
 0xab1   :  { %v3607_v1 = vpop.xlane.xlu1 %3606  ;;  %v3604_v12 = vpop.xlane.xlu0 %3603 }
 0xab2   :  { %v6684_v36 = vadd.f32 %v4160_v5, %v3607_v1  ;;  %v6686_v31 = vadd.f32 %v4160_v5, %v3604_v12 }
 0xab4   :  { %v3642_v14 = vmul.f32 %v4526_v50, %v6684_v36  ;;  %v3641_v60 = vmul.f32 %v4527_v11, %v6686_v31 }
 0xab5   :  { %v3616_v30 = vpop.xlane.xlu1 %3615  ;;  %v3610_v43 = vpop.xlane.xlu0 %3609 }
 0xab6   :  { %v3651_v47 = vsel %vm3649_vm2, %v3642_v14, 0.0  ;;  %v3672_v21 = vmul.f32 %v3642_v14, %v6684_v36  ;;  %v3650_v45 = vsel %vm3649_vm2, %v3641_v60, 0.0  ;;  %v3671_v62 = vmul.f32 %v3641_v60, %v6686_v31 }
 0xab7   :  { %v6700_v3 = vadd.f32 %v4160_v5, %v3616_v30  ;;  %v6702_v48 = vadd.f32 %v4160_v5, %v3610_v43  ;;  %v3652_v54 = vadd.f32 %v3651_v47, %v3650_v45 }
 0xab8   :  { %v3680_v10 = vsel %vm3649_vm2, %v3672_v21, 0.0  ;;  %v3679_v17 = vsel %vm3649_vm2, %v3671_v62, 0.0 }
 0xab9   :  { %v3643_v35 = vmul.f32 %v4528_v29, %v6702_v48  ;;  %v3622_v28 = vpop.xlane.xlu1 %3621  ;;  %v3613_v44 = vpop.xlane.xlu0 %3612  ;;  %v3645_v9 = vmul.f32 %v4529_v6, %v6700_v3  ;;  %v3681_v27 = vadd.f32 %v3680_v10, %v3679_v17 }
 0xaba   :  { %v6713_v32 = vadd.f32 %v4160_v5, %v3613_v44  ;;  %v6718_v52 = vadd.f32 %v4160_v5, %v3622_v28 }
 0xabb   :  { %v3653_v33 = vsel %vm3649_vm2, %v3643_v35, 0.0  ;;  %v3673_v59 = vmul.f32 %v3643_v35, %v6702_v48  ;;  %v3675_v55 = vmul.f32 %v3645_v9, %v6700_v3  ;;  %v3657_v25 = vsel %vm3649_vm2, %v3645_v9, 0.0 }
 0xabc   :  { %v3644_v16 = vmul.f32 %v4530_v2, %v6713_v32  ;;  %v3654_v42 = vadd.f32 %v3653_v33, %v3652_v54  ;;  %v3647_v57 = vmul.f32 %v4531_v4, %v6718_v52 }
 0xabd   :  { %v3682_v26 = vsel %vm3649_vm2, %v3673_v59, 0.0  ;;  %v3619_v34 = vpop.xlane.xlu0 %3618  ;;  %v3686_v0 = vsel %vm3649_vm2, %v3675_v55, 0.0 }
 0xabe   :  { %v3655_v49 = vsel %vm3649_vm2, %v3644_v16, 0.0  ;;  %v3674_v53 = vmul.f32 %v3644_v16, %v6713_v32  ;;  %v6732_v15 = vadd.f32 %v4160_v5, %v3619_v34  ;;  %v3683_v41 = vadd.f32 %v3682_v26, %v3681_v27  ;;  %v3709_v27 = vld [vmem:[#allocation6] sm:$0x1] }
 0xabf   :  { %v3656_v56 = vadd.f32 %v3655_v49, %v3654_v42  ;;  %v3677_v8 = vmul.f32 %v3647_v57, %v6718_v52  ;;  %v3661_v13 = vsel %vm3649_vm2, %v3647_v57, 0.0  ;;  %v3705_v42 = vld [vmem:[#allocation5] sm:$0x1] }
 0xac0   :  { %v3684_v24 = vsel %vm3649_vm2, %v3674_v53, 0.0  ;;  %v3646_v40 = vmul.f32 %v4532_v39, %v6732_v15 }
 0xac1   :  { %v3658_v58 = vadd.f32 %v3657_v25, %v3656_v56  ;;  %v3625_v51 = vpop.xlane.xlu0 %3624  ;;  %v3685_v19 = vadd.f32 %v3684_v24, %v3683_v41  ;;  %v3690_v50 = vsel %vm3649_vm2, %v3677_v8, 0.0 }
 0xac2   :  { %v3640_v46 = vadd.f32 %v4160_v5, %v3625_v51  ;;  %v3659_v63 = vsel %vm3649_vm2, %v3646_v40, 0.0  ;;  %v3676_v7 = vmul.f32 %v3646_v40, %v6732_v15 }
 0xac3   :  { %v3687_v18 = vadd.f32 %v3686_v0, %v3685_v19  ;;  %v3660_v38 = vadd.f32 %v3659_v63, %v3658_v58 }
 0xac4   :  { %v3648_v20 = vmul.f32 %v4533_v23, %v3640_v46  ;;  %v3688_v22 = vsel %vm3649_vm2, %v3676_v7, 0.0 }
 0xac5   :  { %v3689_v37 = vadd.f32 %v3688_v22, %v3687_v18  ;;  %v3662_v5 = vadd.f32 %v3661_v13, %v3660_v38 }
 0xac6   :  { %v3663_v1 = vsel %vm3649_vm2, %v3648_v20, 0.0  ;;  %v3678_v12 = vmul.f32 %v3648_v20, %v3640_v46 }
 0xac7   :  { %v3691_v14 = vadd.f32 %v3690_v50, %v3689_v37  ;;  %v3664_v11 = vadd.f32 %v3663_v1, %v3662_v5 }
 0xac8   :  { %v3692_v60 = vsel %vm3649_vm2, %v3678_v12, 0.0 }
 0xac9   :  { %v3665_v30 = vrot.slane %v3664_v11, 4  ;;  %v3693_v43 = vadd.f32 %v3692_v60, %v3691_v14 }
 0xacb   :  { %v3666_v47 = vadd.f32 %v3665_v30, %v3664_v11  ;;  %v3694_v21 = vrot.slane %v3693_v43, 4 }
 0xacd   :  { %v3667_v45 = vrot.slane %v3666_v47, 2  ;;  %v3695_v62 = vadd.f32 %v3694_v21, %v3693_v43 }
 0xacf   :  { %v3668_v29 = vadd.f32 %v3667_v45, %v3666_v47  ;;  %v3696_v35 = vrot.slane %v3695_v62, 2 }
 0xad1   :  { %v3669_v28 = vrot.slane %v3668_v29, 1  ;;  %v3697_v44 = vadd.f32 %v3696_v35, %v3695_v62 }
 0xad3   :  { %v3670_v10 = vadd.f32 %v3669_v28, %v3668_v29  ;;  %v3698_v54 = vrot.slane %v3697_v44, 1 }
 0xad5   :  { %v3699_v6 = vadd.f32 %v3698_v54, %v3697_v44  ;;  %v3700_v9 = vmul.f32 0.0625, %v3670_v10  ;;  %v3797_v54 = vld [vmem:[%s6849_s0 + $0x8] sm:$0xff] }
 0xad7   :  { %v3701_v17 = vmul.f32 0.0625, %v3699_v6  ;;  %v3702_v33 = vmul.f32 %v3700_v9, %v3700_v9  ;;  %v3796_v6 = vld [vmem:[%s6849_s0] sm:$0xff] }
 0xad9   :  { %v3703_v59 = vsub.f32 %v3701_v17, %v3702_v33  ;;  %v3798_v17 = vld [vmem:[%s6849_s0 + $0x10] sm:$0xff] }
 0xada   :  { %v3802_v33 = vld [vmem:[%s6849_s0 + $0x30] sm:$0xff] }
 0xadb   :  { %v3704_v2 = vmax.f32 %v3703_v59, 0.0  ;;  %v3799_v59 = vld [vmem:[%s6849_s0 + $0x18] sm:$0xff] }
 0xadd   :  { %v3706_v16 = vadd.f32 1e-05, %v3704_v2  ;;  %v3801_v2 = vld [vmem:[%s6849_s0 + $0x28] sm:$0xff] }
 0xadf   :  { %4444 = vrsqrt.f32 %v3706_v16 }
 0xaec   :  { %v4445_v26 = vpop.eup %4444 }
 0xaed   :  { %v3708_v34 = vmul.f32 %v4445_v26, %v3705_v42  ;;  %v3803_v26 = vld [vmem:[%s6849_s0 + $0x38] sm:$0xff] }
 0xaef   :  { %v3710_v55 = vmul.f32 %v3708_v34, %v3700_v9  ;;  %v3716_v49 = vrot.slane %v3708_v34, %v7991_v61  ;;  %v3800_v9 = vld [vmem:[%s6849_s0 + $0x20] sm:$0xff] }
 0xaf1   :  { %v3711_v4 = vsub.f32 %v3709_v27, %v3710_v55  ;;  %v3725_v57 = vmul.f32 %v3716_v49, %v3640_v46  ;;  %v3719_v53 = vmul.f32 %v3716_v49, %v6684_v36  ;;  %v3718_v25 = vmul.f32 %v3716_v49, %v6686_v31 }
 0xaf2   :  { %v3722_v41 = vmul.f32 %v3716_v49, %v6700_v3  ;;  %v3720_v24 = vmul.f32 %v3716_v49, %v6702_v48  ;;  %v3724_v58 = vmul.f32 %v3716_v49, %v6718_v52  ;;  %v3721_v39 = vmul.f32 %v3716_v49, %v6713_v32 }
 0xaf3   :  { %v3730_v56 = vrot.slane %v3711_v4, %v7991_v61  ;;  %v3723_v61 = vmul.f32 %v3716_v49, %v6732_v15 }
 0xaf5   :  { %v3739_v40 = vadd.f32 %v3730_v56, %v3725_v57  ;;  %v3733_v51 = vadd.f32 %v3730_v56, %v3719_v53  ;;  %v3732_v19 = vadd.f32 %v3730_v56, %v3718_v25  ;;  %v3736_v0 = vadd.f32 %v3730_v56, %v3722_v41 }
 0xaf6   :  { %v3734_v8 = vadd.f32 %v3730_v56, %v3720_v24  ;;  %v3738_v46 = vadd.f32 %v3730_v56, %v3724_v58  ;;  %v3735_v31 = vadd.f32 %v3730_v56, %v3721_v39  ;;  %v3737_v3 = vadd.f32 %v3730_v56, %v3723_v61 }
 0xaf7   :  { %v4168_v63 = vmul.f32 -1.442695, %v3739_v40  ;;  %v4162_v36 = vmul.f32 -1.442695, %v3733_v51  ;;  %v4161_v7 = vmul.f32 -1.442695, %v3732_v19 }
 0xaf8   :  { %v4165_v18 = vmul.f32 -1.442695, %v3736_v0  ;;  %v4163_v48 = vmul.f32 -1.442695, %v3734_v8  ;;  %v4167_v52 = vmul.f32 -1.442695, %v3738_v46 }
 0xaf9   :  { %4446 = vpow2.f32 %v4168_v63  ;;  %v4164_v32 = vmul.f32 -1.442695, %v3735_v31  ;;  %v4166_v38 = vmul.f32 -1.442695, %v3737_v3 }
 0xafa   :  { %4448 = vpow2.f32 %v4162_v36 }
 0xafb   :  { %4450 = vpow2.f32 %v4161_v7 }
 0xafc   :  { %4452 = vpow2.f32 %v4165_v18 }
 0xafd   :  { %4454 = vpow2.f32 %v4163_v48 }
 0xafe   :  { %4456 = vpow2.f32 %v4167_v52 }
 0xaff   :  { %4458 = vpow2.f32 %v4164_v32 }
 0xb00   :  { %4460 = vpow2.f32 %v4166_v38 }
 0xb06   :  { %v4447_v23 = vpop.eup %4446 }
 0xb07   :  { %v4449_v15 = vpop.eup %4448  ;;  %v3771_v20 = vadd.f32 1.0, %v4447_v23 }
 0xb08   :  { %v4451_v13 = vpop.eup %4450  ;;  %v3765_v22 = vadd.f32 1.0, %v4449_v15 }
 0xb09   :  { %v4453_v37 = vpop.eup %4452  ;;  %4462 = vrcp.f32 %v3771_v20  ;;  %v3764_v5 = vadd.f32 1.0, %v4451_v13 }
 0xb0a   :  { %v4455_v1 = vpop.eup %4454  ;;  %4464 = vrcp.f32 %v3765_v22  ;;  %v3768_v12 = vadd.f32 1.0, %v4453_v37 }
 0xb0b   :  { %v4457_v50 = vpop.eup %4456  ;;  %4466 = vrcp.f32 %v3764_v5  ;;  %v3766_v14 = vadd.f32 1.0, %v4455_v1 }
 0xb0c   :  { %v4459_v11 = vpop.eup %4458  ;;  %4468 = vrcp.f32 %v3768_v12  ;;  %v3770_v60 = vadd.f32 1.0, %v4457_v50 }
 0xb0d   :  { %v4461_v30 = vpop.eup %4460  ;;  %4470 = vrcp.f32 %v3766_v14  ;;  %v3767_v43 = vadd.f32 1.0, %v4459_v11 }
 0xb0e   :  { %4472 = vrcp.f32 %v3770_v60  ;;  %v3769_v47 = vadd.f32 1.0, %v4461_v30 }
 0xb0f   :  { %4474 = vrcp.f32 %v3767_v43 }
 0xb10   :  { %4476 = vrcp.f32 %v3769_v47 }
 0xb11   :  { %4478 = vlog2.f32 %v3797_v54 }
 0xb12   :  { %4480 = vlog2.f32 %v3796_v6 }
 0xb13   :  { %4482 = vlog2.f32 %v3800_v9 }
 0xb14   :  { %4484 = vlog2.f32 %v3798_v17 }
 0xb15   :  { %4486 = vlog2.f32 %v3802_v33 }
 0xb16   :  { %v4463_v21 = vpop.eup %4462  ;;  %4488 = vlog2.f32 %v3799_v59 }
 0xb17   :  { %v4465_v45 = vpop.eup %4464  ;;  %3795 = vst.msk [vmem:[%s6859_s12 + $0x38] sm:$0xff] %vm3649_vm2, %v4463_v21  ;;  %4490 = vlog2.f32 %v3801_v2 }
 0xb18   :  { %v4467_v62 = vpop.eup %4466  ;;  %3827 = vperm.xlu0 %4174, %v4465_v45   ;;  %3789 = vst.msk [vmem:[%s6859_s12 + $0x8] sm:$0xff] %vm3649_vm2, %v4465_v45  ;;  %4492 = vlog2.f32 %v3803_v26 }
 0xb19   :  { %v4469_v29 = vpop.eup %4468  ;;  %3822 = vperm.xlu1 %4175, %v4467_v62   ;;  %3788 = vst.msk [vmem:[%s6859_s12] sm:$0xff] %vm3649_vm2, %v4467_v62 }
 0xb1a   :  { %v4471_v35 = vpop.eup %4470  ;;  %3792 = vst.msk [vmem:[%s6859_s12 + $0x20] sm:$0xff] %vm3649_vm2, %v4469_v29 }
 0xb1b   :  { %v4473_v28 = vpop.eup %4472  ;;  %3790 = vst.msk [vmem:[%s6859_s12 + $0x10] sm:$0xff] %vm3649_vm2, %v4471_v35 }
 0xb1c   :  { %v4475_v44 = vpop.eup %4474  ;;  %3842 = vperm.xlu0 %4174, %v4469_v29   ;;  %3794 = vst.msk [vmem:[%s6859_s12 + $0x30] sm:$0xff] %vm3649_vm2, %v4473_v28 }
 0xb1d   :  { %v4477_v10 = vpop.eup %4476  ;;  %3832 = vperm.xlu1 %4175, %v4471_v35   ;;  %3791 = vst.msk [vmem:[%s6859_s12 + $0x18] sm:$0xff] %vm3649_vm2, %v4475_v44 }
 0xb1e   :  { %3793 = vst.msk [vmem:[%s6859_s12 + $0x28] sm:$0xff] %vm3649_vm2, %v4477_v10  ;;  %v4479_v16 = vpop.eup %4478 }
 0xb1f   :  { %v4481_v42 = vpop.eup %4480  ;;  %v3807_v34 = vmul.f32 0.6931472, %v4479_v16 }
 0xb20   :  { %3852 = vperm.xlu0 %4174, %v4473_v28   ;;  %v4483_v27 = vpop.eup %4482  ;;  %v3805_v55 = vmul.f32 0.6931472, %v4481_v42 }
 0xb21   :  { %3837 = vperm.xlu1 %4175, %v4475_v44   ;;  %v4485_v49 = vpop.eup %4484  ;;  %v3813_v53 = vmul.f32 0.6931472, %v4483_v27 }
 0xb22   :  { %v4487_v25 = vpop.eup %4486  ;;  %v3809_v24 = vmul.f32 0.6931472, %v4485_v49 }
 0xb23   :  { %v4489_v58 = vpop.eup %4488  ;;  %v3817_v8 = vmul.f32 0.6931472, %v4487_v25 }
 0xb24   :  { %v3811_v61 = vmul.f32 0.6931472, %v4489_v58  ;;  %v4491_v63 = vpop.eup %4490 }
 0xb25   :  { %3847 = vperm.xlu1 %4175, %v4477_v10   ;;  %v3815_v52 = vmul.f32 0.6931472, %v4491_v63  ;;  %v4493_v32 = vpop.eup %4492 }
 0xb26   :  { %v3819_v13 = vmul.f32 0.6931472, %v4493_v32 }
 0xb29   :  { %3857 = vperm.xlu1 %4175, %v4463_v21  }
 0xb93   :  { %v3828_v4 = vpop.permute.xlu0 %3827 }
 0xb94   :  { %v3861_v57 = vmul.f32 %v3828_v4, %v3807_v34  ;;  %v3823_v56 = vpop.permute.xlu1 %3822 }
 0xb95   :  { %v3860_v41 = vmul.f32 %v3823_v56, %v3805_v55 }
 0xb96   :  { %v3870_v39 = vmul.f32 1.442695, %v3861_v57 }
 0xb97   :  { %v3868_v40 = vmul.f32 1.442695, %v3860_v41  ;;  %v3843_v51 = vpop.permute.xlu0 %3842 }
 0xb98   :  { %4494 = vpow2.f32 %v3870_v39  ;;  %v3864_v19 = vmul.f32 %v3843_v51, %v3813_v53  ;;  %v3833_v0 = vpop.permute.xlu1 %3832 }
 0xb99   :  { %4496 = vpow2.f32 %v3868_v40  ;;  %v3862_v46 = vmul.f32 %v3833_v0, %v3809_v24 }
 0xb9a   :  { %4498 = vrcp.f32 %v3828_v4  ;;  %v3876_v36 = vmul.f32 1.442695, %v3864_v19 }
 0xb9b   :  { %4500 = vrcp.f32 %v3823_v56  ;;  %v3872_v7 = vmul.f32 1.442695, %v3862_v46  ;;  %v3853_v31 = vpop.permute.xlu0 %3852 }
 0xb9c   :  { %4502 = vpow2.f32 %v3876_v36  ;;  %v3866_v18 = vmul.f32 %v3853_v31, %v3817_v8  ;;  %v3838_v3 = vpop.permute.xlu1 %3837 }
 0xb9d   :  { %4504 = vpow2.f32 %v3872_v7  ;;  %v3863_v48 = vmul.f32 %v3838_v3, %v3811_v61 }
 0xb9e   :  { %4506 = vrcp.f32 %v3843_v51  ;;  %v3880_v38 = vmul.f32 1.442695, %v3866_v18 }
 0xb9f   :  { %4508 = vrcp.f32 %v3833_v0  ;;  %v3874_v23 = vmul.f32 1.442695, %v3863_v48 }
 0xba0   :  { %4510 = vpow2.f32 %v3880_v38  ;;  %v3848_v15 = vpop.permute.xlu1 %3847 }
 0xba1   :  { %4512 = vpow2.f32 %v3874_v23  ;;  %v3865_v20 = vmul.f32 %v3848_v15, %v3815_v52 }
 0xba2   :  { %4514 = vrcp.f32 %v3853_v31 }
 0xba3   :  { %4516 = vrcp.f32 %v3838_v3  ;;  %v3878_v22 = vmul.f32 1.442695, %v3865_v20 }
 0xba4   :  { %v3858_v37 = vpop.permute.xlu1 %3857 }
 0xba5   :  { %v4495_v5 = vpop.eup %4494  ;;  %4518 = vpow2.f32 %v3878_v22  ;;  %v3867_v1 = vmul.f32 %v3858_v37, %v3819_v13 }
 0xba6   :  { %v4497_v12 = vpop.eup %4496  ;;  %v3885_v50 = vsub.f32 1.0, %v4495_v5  ;;  %4520 = vrcp.f32 %v3848_v15 }
 0xba7   :  { %v4499_v14 = vpop.eup %4498  ;;  %v3884_v11 = vsub.f32 1.0, %v4497_v12  ;;  %v3882_v60 = vmul.f32 1.442695, %v3867_v1 }
 0xba8   :  { %v4501_v30 = vpop.eup %4500  ;;  %v3895_v43 = vmul.f32 %v4499_v14, %v3885_v50 }
 0xba9   :  { %v4503_v47 = vpop.eup %4502  ;;  %v3893_v21 = vmul.f32 %v4501_v30, %v3884_v11  ;;  %4522 = vpow2.f32 %v3882_v60 }
 0xbaa   :  { %v4505_v45 = vpop.eup %4504  ;;  %3910 = vst.msk [vmem:[%s6858_s11 + $0x8] sm:$0xff] %vm3908_vm3, %v3895_v43  ;;  %v3888_v62 = vsub.f32 1.0, %v4503_v47  ;;  %4524 = vrcp.f32 %v3858_v37 }
 0xbab   :  { %v4507_v29 = vpop.eup %4506  ;;  %3909 = vst.msk [vmem:[%s6858_s11] sm:$0xff] %vm3908_vm3, %v3893_v21  ;;  %v3886_v35 = vsub.f32 1.0, %v4505_v45 }
 0xbac   :  { %v4509_v28 = vpop.eup %4508  ;;  %v3901_v44 = vmul.f32 %v4507_v29, %v3888_v62 }
 0xbad   :  { %v4511_v10 = vpop.eup %4510  ;;  %v3897_v54 = vmul.f32 %v4509_v28, %v3886_v35 }
 0xbae   :  { %v4513_v6 = vpop.eup %4512  ;;  %3913 = vst.msk [vmem:[%s6858_s11 + $0x20] sm:$0xff] %vm3908_vm3, %v3901_v44  ;;  %v3890_v9 = vsub.f32 1.0, %v4511_v10 }
 0xbaf   :  { %v4515_v17 = vpop.eup %4514  ;;  %3911 = vst.msk [vmem:[%s6858_s11 + $0x10] sm:$0xff] %vm3908_vm3, %v3897_v54  ;;  %v3887_v33 = vsub.f32 1.0, %v4513_v6 }
 0xbb0   :  { %v4517_v59 = vpop.eup %4516  ;;  %v3905_v2 = vmul.f32 %v4515_v17, %v3890_v9 }
 0xbb1   :  { %v3899_v16 = vmul.f32 %v4517_v59, %v3887_v33 }
 0xbb2   :  { %v4519_v42 = vpop.eup %4518  ;;  %3915 = vst.msk [vmem:[%s6858_s11 + $0x30] sm:$0xff] %vm3908_vm3, %v3905_v2 }
 0xbb3   :  { %3912 = vst.msk [vmem:[%s6858_s11 + $0x18] sm:$0xff] %vm3908_vm3, %v3899_v16  ;;  %v3889_v26 = vsub.f32 1.0, %v4519_v42  ;;  %v4521_v34 = vpop.eup %4520 }
 0xbb5   :  { %v3903_v27 = vmul.f32 %v4521_v34, %v3889_v26 }
 0xbb6   :  { %v4523_v55 = vpop.eup %4522 }
 0xbb7   :  { %3914 = vst.msk [vmem:[%s6858_s11 + $0x28] sm:$0xff] %vm3908_vm3, %v3903_v27  ;;  %v3891_v49 = vsub.f32 1.0, %v4523_v55  ;;  %v4525_v4 = vpop.eup %4524 }
 0xbb9   :  { %v3907_v57 = vmul.f32 %v4525_v4, %v3891_v49 }
 0xbbb   :  { %3916 = vst.msk [vmem:[%s6858_s11 + $0x38] sm:$0xff] %vm3908_vm3, %v3907_v57 }
 0xbbc   :  { %3925 = vsyncpa [#allocation8], 1 }

</bundles_post_ra>
